<compile_context>
chip_gen: v5e
topology: v5e:2x2
jax: 0.10.0
libtpu: 0.0.40
codegen_flags: <defaults>
</compile_context>

<pallas_src>
import jax
import jax.numpy as jnp
import numpy as np
from jax.experimental import pallas as pl
from jax.experimental.pallas import tpu as pltpu

NEG_SLOPE = 0.01          # F.leaky_relu default
MASK_BIAS = -1e30         # finite large-negative additive mask (no NaN from -inf rows)


def _leaky_relu(x):
    return jnp.where(x >= 0, x, NEG_SLOPE * x)


def _fast_recip(x):
    # EUP approximate reciprocal + one Newton-Raphson step (full f32 accuracy, no VPU divide).
    r = pl.reciprocal(x, approx=True)
    return r * (2.0 - x * r)


def hier_attn_kernel(
    out2d_ref,        # (Bb*O, D)      decoder outputs, batch-flattened
    ctx2d_ref,        # (Bb*CT, D)     [word rows | span rows | zero pad] per batch element
    span_bias_ref,    # (Bb, 1, S)     additive span bias (score bias + mask)
    word_bias_ref,    # (Bb, 1, SW)    additive word bias (score bias + mask)
    w_out_ref,        # (D, 2D)        [wo_word | wo_span]  (pre-transposed on host)
    w_ctx_ref,        # (D, 2D)        [wc_word | wc_span]  (pre-transposed on host)
    b_ctx_ref,        # (1, 2D)        [bw_word | bw_span]
    sw_s_ref,         # (1, D)         span score weight
    sw_w_ref,         # (1, D)         word score weight
    seg_ref,          # (SW, S)        word->span segment indicator
    segt_ref,         # (S, SW)        span->word segment indicator
    o_ref,            # (Bb, O, D)     float32 output
):
    Bb, O, D = o_ref.shape
    S = span_bias_ref.shape[2]
    SW = word_bias_ref.shape[2]
    CT = ctx2d_ref.shape[0] // Bb
    PAD = CT - SW - S

    # ---- hoisted, loop-invariant loads ----
    sw_s = sw_s_ref[...][None, :, :]       # [1, 1, D]
    sw_w = sw_w_ref[...][None, :, :]       # [1, 1, D]
    seg = seg_ref[...]                     # [SW, S]
    seg_t = segt_ref[...]                  # [S, SW]

    # ---- batched projections across the whole block (one MXU matmul each, N = 2D) ----
    # lanes [0:D] -> word-attention head, lanes [D:2D] -> span-attention head
    a_all = jnp.dot(out2d_ref[...], w_out_ref[...],
                    preferred_element_type=jnp.float32)                       # [Bb*O, 2D]
    c_all = jnp.dot(ctx2d_ref[...], w_ctx_ref[...],
                    preferred_element_type=jnp.float32) + b_ctx_ref[...]      # [Bb*CT, 2D]

    for bi in range(Bb):                   # small static per-batch loop (softmax + mix only)
        r = bi * O
        p = bi * CT
        a_w = a_all[r:r + O, :D]           # [O, D]   (all slice starts 8/128 aligned)
        a_s = a_all[r:r + O, D:]           # [O, D]
        c_w = c_all[p:p + SW, :D]          # [SW, D]
        c_s = c_all[p + SW:p + SW + S, D:]  # [S, D]

        # ---- span attention (mix=False): only the attention weights are used ----
        h_s = _leaky_relu(a_s[:, None, :] + c_s[None, :, :])                  # [O, S, D]
        score_s = jnp.sum(h_s * sw_s, axis=-1) + span_bias_ref[bi]            # [O, S]
        score_s = score_s - jnp.max(score_s, axis=-1, keepdims=True)
        e_s = jnp.exp(score_s)
        attn_s = e_s * _fast_recip(jnp.sum(e_s, axis=-1, keepdims=True))      # [O, S]

        # ---- word attention over ALL spans at once (mix=True), fused with the final mix ----
        h_w = _leaky_relu(a_w[:, None, :] + c_w[None, :, :])                  # [O, SW, D]
        score_w = jnp.sum(h_w * sw_w, axis=-1) + word_bias_ref[bi]            # [O, SW]
        # shared max shift across spans; the per-span denominator below renormalises it.
        score_w = score_w - jnp.max(score_w, axis=-1, keepdims=True)
        e_w = jnp.exp(score_w)                                                # [O, SW]
        denom = jnp.dot(e_w, seg, preferred_element_type=jnp.float32)         # [O, S]
        denom = jnp.maximum(denom, 1e-30)   # fully-masked span: e_w == 0 there, so result 0
        g = attn_s * _fast_recip(denom)                                       # [O, S]
        combined = e_w * jnp.dot(g, seg_t, preferred_element_type=jnp.float32)  # [O, SW]

        # ---- single merged final-mix matmul: [O, CT] x [CT, D] ----
        parts = [combined, attn_s]
        if PAD:
            parts.append(jnp.zeros((O, PAD), jnp.float32))
        mix_w = jnp.concatenate(parts, axis=1)                                # [O, CT]
        ctx_b = ctx2d_ref[p:p + CT, :]                                        # [CT, D]
        acc = jnp.dot(mix_w.astype(ctx_b.dtype), ctx_b,
                      preferred_element_type=jnp.float32)                     # [O, D]
        o_ref[bi] = acc.astype(o_ref.dtype)


def hierarchical_attention(output, span_context, word_contexts, span_mask, word_masks,
                           params, *, block_batch=8, compute_dtype=jnp.float32):
    B, O, D = output.shape
    S = span_context.shape[1]
    word_ctx = jnp.stack(word_contexts, axis=1)               # [B, S, W, D]
    W = word_ctx.shape[2]
    SW = S * W
    CT = -(-(SW + S) // 8) * 8                                # context rows, sublane-padded
    Op = -(-O // 8) * 8                                       # output rows, sublane-padded
    cdt = compute_dtype

    # contexts: word rows (span-major flatten) | span rows | zero pad  -> [B, CT, D]
    ctx_all = jnp.concatenate(
        [word_ctx.reshape(B, SW, D), span_context,
         jnp.zeros((B, CT - SW - S, D), span_context.dtype)], axis=1)

    # additive score biases: scalar score bias + (-1e30 per masked slot), folded on host
    sb_s = params["span_score_bias"].astype(jnp.float32).reshape(())
    sb_w = params["word_score_bias"].astype(jnp.float32).reshape(())
    span_bias = jnp.full((B, 1, S), sb_s, jnp.float32)
    if span_mask is not None:
        span_bias = span_bias + MASK_BIAS * span_mask.astype(jnp.float32).reshape(B, 1, S)
    word_bias = jnp.full((B, 1, SW), sb_w, jnp.float32)
    if word_masks is not None:
        wm = jnp.stack(word_masks, axis=1).astype(jnp.float32).reshape(B, 1, SW)
        word_bias = word_bias + MASK_BIAS * wm

    # split each Linear(2D, D) into output-half / context-half, pre-transpose, and lane-concat
    # word|span so each projection is a single [.., D] x [D, 2D] matmul.
    wo_s = params["span_w_weight"][:, :D].T
    wc_s = params["span_w_weight"][:, D:].T
    wo_w = params["word_w_weight"][:, :D].T
    wc_w = params["word_w_weight"][:, D:].T
    w_out = jnp.concatenate([wo_w, wo_s], axis=1).astype(cdt)        # [D, 2D]
    w_ctx = jnp.concatenate([wc_w, wc_s], axis=1).astype(cdt)        # [D, 2D]
    b_ctx = jnp.concatenate([params["word_w_bias"], params["span_w_bias"]],
                            axis=0).astype(jnp.float32)[None, :]      # [1, 2D]
    sw_s = params["span_score_weight"].astype(jnp.float32).reshape(1, D)
    sw_w = params["word_score_weight"].astype(jnp.float32).reshape(1, D)

    # segment indicator matrices (constant inputs, DMA'd once via constant index_map)
    k = np.arange(SW)
    seg_np = (k[:, None] // W == np.arange(S)[None, :]).astype(np.float32)
    seg = jnp.asarray(seg_np)          # [SW, S]
    seg_t = jnp.asarray(seg_np.T)      # [S, SW]

    # batch / output-row padding and blocking
    Bb = max(1, min(block_batch, B))
    Bp = -(-B // Bb) * Bb
    pad = Bp - B
    out_in = output.astype(cdt)
    if Op != O:
        out_in = jnp.pad(out_in, ((0, 0), (0, Op - O), (0, 0)))
    ctx_in = ctx_all.astype(cdt)
    if pad:
        pad_b = lambda x: jnp.pad(x, ((0, pad),) + ((0, 0),) * (x.ndim - 1))
        out_in, ctx_in, span_bias, word_bias = map(
            pad_b, (out_in, ctx_in, span_bias, word_bias))
    out2d = out_in.reshape(Bp * Op, D)
    ctx2d = ctx_in.reshape(Bp * CT, D)

    full2 = lambda i: (0, 0)
    in_specs = [
        pl.BlockSpec((Bb * Op, D), lambda i: (i, 0)),
        pl.BlockSpec((Bb * CT, D), lambda i: (i, 0)),
        pl.BlockSpec((Bb, 1, S), lambda i: (i, 0, 0)),
        pl.BlockSpec((Bb, 1, SW), lambda i: (i, 0, 0)),
        pl.BlockSpec((D, 2 * D), full2),
        pl.BlockSpec((D, 2 * D), full2),
        pl.BlockSpec((1, 2 * D), full2),
        pl.BlockSpec((1, D), full2),
        pl.BlockSpec((1, D), full2),
        pl.BlockSpec((SW, S), full2),
        pl.BlockSpec((S, SW), full2),
    ]
    out_specs = pl.BlockSpec((Bb, Op, D), lambda i: (i, 0, 0))

    res = pl.pallas_call(
        hier_attn_kernel,
        out_shape=jax.ShapeDtypeStruct((Bp, Op, D), jnp.float32),
        grid=(Bp // Bb,),
        in_specs=in_specs,
        out_specs=out_specs,
        compiler_params=pltpu.CompilerParams(
            dimension_semantics=("parallel",),
            vmem_limit_bytes=32 * 1024 * 1024),
    )(out2d, ctx2d, span_bias, word_bias, w_out, w_ctx, b_ctx, sw_s, sw_w, seg, seg_t)
    return res[:B, :O]


# ---------------- pure-JAX reference (mirrors the PyTorch module) ----------------
def _attention_ref(output, context, w_w, w_b, s_w, s_b, mask, mix):
    B, O, D = output.shape
    I = context.shape[1]
    in_out = jnp.broadcast_to(output[:, :, None, :], (B, O, I, D))
    in_ctx = jnp.broadcast_to(context[:, None, :, :], (B, O, I, D))
    si = jnp.concatenate([in_out, in_ctx], axis=-1)
    h = _leaky_relu(si @ w_w.T + w_b)
    score = (h @ s_w.T + s_b).reshape(B, O, I)
    if mask is not None:
        m = jnp.broadcast_to(mask[:, None, :], (B, O, I))
        score = jnp.where(m == 1, -jnp.inf, score)
    attn = jax.nn.softmax(score, axis=-1)
    attn_output = jnp.einsum("boi,bid->bod", attn, context) if mix else None
    return attn_output, attn


def hierarchical_attention_ref(output, span_context, word_contexts, span_mask, word_masks, p):
    B, O, D = output.shape
    S = span_context.shape[1]
    _, span_attn = _attention_ref(output, span_context, p["span_w_weight"], p["span_w_bias"],
                                  p["span_score_weight"], p["span_score_bias"], span_mask, False)
    word_outs = []
    for wc, wm in zip(word_contexts, word_masks):
        wo, _ = _attention_ref(output, wc, p["word_w_weight"], p["word_w_bias"],
                               p["word_score_weight"], p["word_score_bias"], wm, True)
        word_outs.append(wo[:, :, None, :])
    word_out = jnp.concatenate(word_outs, axis=-2)                    # [B, O, S, D]
    span_ctx_e = jnp.broadcast_to(span_context[:, None, :, :], (B, O, S, D))
    return jnp.einsum("bos,bosd->bod", span_attn, span_ctx_e + word_out)


if __name__ == "__main__":
    # lane/sublane friendly small shapes: D multiple of 128, O fills 8 sublanes
    B, O, S, W, D = 4, 8, 3, 8, 128
    key = jax.random.PRNGKey(0)
    ks = jax.random.split(key, 12)

    params = {
        "span_w_weight": 0.1 * jax.random.normal(ks[0], (D, 2 * D), jnp.float32),
        "span_w_bias":   0.1 * jax.random.normal(ks[1], (D,), jnp.float32),
        "span_score_weight": 0.1 * jax.random.normal(ks[2], (1, D), jnp.float32),
        "span_score_bias":   0.1 * jax.random.normal(ks[3], (1,), jnp.float32),
        "word_w_weight": 0.1 * jax.random.normal(ks[4], (D, 2 * D), jnp.float32),
        "word_w_bias":   0.1 * jax.random.normal(ks[5], (D,), jnp.float32),
        "word_score_weight": 0.1 * jax.random.normal(ks[6], (1, D), jnp.float32),
        "word_score_bias":   0.1 * jax.random.normal(ks[7], (1,), jnp.float32),
    }

    output = jax.random.normal(ks[8], (B, O, D), jnp.float32)
    span_context = jax.random.normal(ks[9], (B, S, D), jnp.float32)
    word_contexts = [jax.random.normal(jax.random.fold_in(ks[10], s), (B, W, D), jnp.float32)
                     for s in range(S)]

    # masks: 1 = masked out (never a fully-masked row, matching sane usage)
    span_mask_np = np.zeros((B, S), dtype=np.int32)
    span_mask_np[1, 2] = 1
    span_mask_np[2, 0] = 1
    span_mask = jnp.asarray(span_mask_np)
    word_masks = []
    for s in range(S):
        m = np.zeros((B, W), dtype=np.int32)
        m[1, (W - 1 - s) % W] = 1
        m[2, s % W] = 1
        word_masks.append(jnp.asarray(m))

    ref = hierarchical_attention_ref(output, span_context, word_contexts,
                                     span_mask, word_masks, params)

    # f32 path (tight check); block_batch=2 keeps grid=(2,) so both v7x TCs get work
    res_f32 = hierarchical_attention(output, span_context, word_contexts, span_mask,
                                     word_masks, params, block_batch=2,
                                     compute_dtype=jnp.float32)
    res_f32 = jax.block_until_ready(res_f32)
    np.testing.assert_allclose(np.asarray(res_f32), np.asarray(ref), rtol=2e-4, atol=2e-4)

    # bf16 MXU-operand path (valid on v5e/v6e/v7x), looser numerics
    res_bf16 = hierarchical_attention(output, span_context, word_contexts, span_mask,
                                      word_masks, params, block_batch=2,
                                      compute_dtype=jnp.bfloat16)
    res_bf16 = jax.block_until_ready(res_bf16)
    np.testing.assert_allclose(np.asarray(res_bf16), np.asarray(ref), rtol=5e-2, atol=5e-2)

    print("KERNEL_OK")
</pallas_src>

<mosaic_0001>
module attributes {stable_mosaic.version = 11 : i64} {
  func.func @hier_attn_kernel(%arg0: i32, %arg1: memref<16x128xf32, #tpu.memory_space<vmem>>, %arg2: memref<64x128xf32, #tpu.memory_space<vmem>>, %arg3: memref<2x1x3xf32, #tpu.memory_space<vmem>>, %arg4: memref<2x1x24xf32, #tpu.memory_space<vmem>>, %arg5: memref<128x256xf32, #tpu.memory_space<vmem>>, %arg6: memref<128x256xf32, #tpu.memory_space<vmem>>, %arg7: memref<1x256xf32, #tpu.memory_space<vmem>>, %arg8: memref<1x128xf32, #tpu.memory_space<vmem>>, %arg9: memref<1x128xf32, #tpu.memory_space<vmem>>, %arg10: memref<24x3xf32, #tpu.memory_space<vmem>>, %arg11: memref<3x24xf32, #tpu.memory_space<vmem>>, %arg12: memref<2x8x128xf32, #tpu.memory_space<vmem>>) attributes {dimension_semantics = [#tpu.dimension_semantics<parallel>], iteration_bounds = array<i64: 2>, scalar_prefetch = 0 : i64, scratch_operands = 0 : i64, tpu.core_type = #tpu.core_type<tc>, window_params = [{transform_indices = @transform_0, window_bounds = array<i64: 16, 128>}, {transform_indices = @transform_1, window_bounds = array<i64: 64, 128>}, {transform_indices = @transform_2, window_bounds = array<i64: 2, 1, 3>}, {transform_indices = @transform_3, window_bounds = array<i64: 2, 1, 24>}, {pipeline_mode = #tpu.pipeline_mode<synchronous>, transform_indices = @transform_4, window_bounds = array<i64: 128, 256>}, {pipeline_mode = #tpu.pipeline_mode<synchronous>, transform_indices = @transform_5, window_bounds = array<i64: 128, 256>}, {pipeline_mode = #tpu.pipeline_mode<synchronous>, transform_indices = @transform_6, window_bounds = array<i64: 1, 256>}, {pipeline_mode = #tpu.pipeline_mode<synchronous>, transform_indices = @transform_7, window_bounds = array<i64: 1, 128>}, {pipeline_mode = #tpu.pipeline_mode<synchronous>, transform_indices = @transform_8, window_bounds = array<i64: 1, 128>}, {pipeline_mode = #tpu.pipeline_mode<synchronous>, transform_indices = @transform_9, window_bounds = array<i64: 24, 3>}, {pipeline_mode = #tpu.pipeline_mode<synchronous>, transform_indices = @transform_10, window_bounds = array<i64: 3, 24>}, {transform_indices = @transform_11, window_bounds = array<i64: 2, 8, 128>}]} {
    %c0 = arith.constant 0 : index
    %c0_0 = arith.constant 0 : index
    %0 = vector.load %arg8[%c0, %c0_0] : memref<1x128xf32, #tpu.memory_space<vmem>>, vector<1x128xf32>
    %1 = vector.shape_cast %0 : vector<1x128xf32> to vector<1x1x128xf32>
    %c0_1 = arith.constant 0 : index
    %c0_2 = arith.constant 0 : index
    %2 = vector.load %arg9[%c0_1, %c0_2] : memref<1x128xf32, #tpu.memory_space<vmem>>, vector<1x128xf32>
    %3 = vector.shape_cast %2 : vector<1x128xf32> to vector<1x1x128xf32>
    %c0_3 = arith.constant 0 : index
    %c0_4 = arith.constant 0 : index
    %4 = vector.load %arg10[%c0_3, %c0_4] : memref<24x3xf32, #tpu.memory_space<vmem>>, vector<24x3xf32>
    %c0_5 = arith.constant 0 : index
    %c0_6 = arith.constant 0 : index
    %5 = vector.load %arg11[%c0_5, %c0_6] : memref<3x24xf32, #tpu.memory_space<vmem>>, vector<3x24xf32>
    %c0_7 = arith.constant 0 : index
    %c0_8 = arith.constant 0 : index
    %6 = vector.load %arg1[%c0_7, %c0_8] : memref<16x128xf32, #tpu.memory_space<vmem>>, vector<16x128xf32>
    %c0_9 = arith.constant 0 : index
    %c0_10 = arith.constant 0 : index
    %7 = vector.load %arg5[%c0_9, %c0_10] : memref<128x256xf32, #tpu.memory_space<vmem>>, vector<128x256xf32>
    %cst = arith.constant dense<0.000000e+00> : vector<16x256xf32>
    %8 = tpu.matmul %6, %7, %cst {dimension_numbers = #tpu.dot_dimension_numbers<[1], [0], [0], [1], [0, 0, 1, 1], [], []>} : vector<16x128xf32>, vector<128x256xf32>, vector<16x256xf32> -> vector<16x256xf32>
    %c0_11 = arith.constant 0 : index
    %c0_12 = arith.constant 0 : index
    %9 = vector.load %arg2[%c0_11, %c0_12] : memref<64x128xf32, #tpu.memory_space<vmem>>, vector<64x128xf32>
    %c0_13 = arith.constant 0 : index
    %c0_14 = arith.constant 0 : index
    %10 = vector.load %arg6[%c0_13, %c0_14] : memref<128x256xf32, #tpu.memory_space<vmem>>, vector<128x256xf32>
    %cst_15 = arith.constant dense<0.000000e+00> : vector<64x256xf32>
    %11 = tpu.matmul %9, %10, %cst_15 {dimension_numbers = #tpu.dot_dimension_numbers<[1], [0], [0], [1], [0, 0, 1, 1], [], []>} : vector<64x128xf32>, vector<128x256xf32>, vector<64x256xf32> -> vector<64x256xf32>
    %c0_16 = arith.constant 0 : index
    %c0_17 = arith.constant 0 : index
    %12 = vector.load %arg7[%c0_16, %c0_17] : memref<1x256xf32, #tpu.memory_space<vmem>>, vector<1x256xf32>
    %13 = vector.broadcast %12 : vector<1x256xf32> to vector<64x256xf32>
    %14 = arith.addf %11, %13 : vector<64x256xf32>
    %15 = vector.extract_strided_slice %8 {offsets = [0, 0], sizes = [8, 128], strides = [1, 1]} : vector<16x256xf32> to vector<8x128xf32>
    %16 = vector.extract_strided_slice %8 {offsets = [0, 128], sizes = [8, 128], strides = [1, 1]} : vector<16x256xf32> to vector<8x128xf32>
    %17 = vector.extract_strided_slice %14 {offsets = [0, 0], sizes = [24, 128], strides = [1, 1]} : vector<64x256xf32> to vector<24x128xf32>
    %18 = vector.extract_strided_slice %14 {offsets = [24, 128], sizes = [3, 128], strides = [1, 1]} : vector<64x256xf32> to vector<3x128xf32>
    %19 = vector.shape_cast %16 : vector<8x128xf32> to vector<8x1x128xf32>
    %20 = vector.shape_cast %18 : vector<3x128xf32> to vector<1x3x128xf32>
    %21 = vector.broadcast %19 : vector<8x1x128xf32> to vector<8x3x128xf32>
    %22 = vector.broadcast %20 : vector<1x3x128xf32> to vector<8x3x128xf32>
    %23 = arith.addf %21, %22 : vector<8x3x128xf32>
    %cst_18 = arith.constant 0.000000e+00 : f32
    %24 = vector.broadcast %cst_18 : f32 to vector<8x3x128xf32>
    %25 = arith.cmpf oge, %23, %24 : vector<8x3x128xf32>
    %cst_19 = arith.constant 0.00999999977 : f32
    %26 = vector.broadcast %cst_19 : f32 to vector<8x3x128xf32>
    %27 = arith.mulf %26, %23 : vector<8x3x128xf32>
    %28 = arith.select %25, %23, %27 : vector<8x3x128xi1>, vector<8x3x128xf32>
    %29 = vector.broadcast %1 : vector<1x1x128xf32> to vector<8x3x128xf32>
    %30 = arith.mulf %28, %29 : vector<8x3x128xf32>
    %cst_20 = arith.constant dense<0.000000e+00> : vector<8x3xf32>
    %31 = vector.multi_reduction <add>, %30, %cst_20 [2] : vector<8x3x128xf32> to vector<8x3xf32>
    %c0_21 = arith.constant 0 : index
    %c0_22 = arith.constant 0 : index
    %c0_23 = arith.constant 0 : index
    %32 = vector.load %arg3[%c0_21, %c0_22, %c0_23] : memref<2x1x3xf32, #tpu.memory_space<vmem>>, vector<1x1x3xf32>
    %33 = vector.shape_cast %32 : vector<1x1x3xf32> to vector<1x3xf32>
    %34 = vector.broadcast %33 : vector<1x3xf32> to vector<8x3xf32>
    %35 = arith.addf %31, %34 : vector<8x3xf32>
    %cst_24 = arith.constant dense<0xFF800000> : vector<8xf32>
    %36 = vector.multi_reduction <maximumf>, %35, %cst_24 [1] : vector<8x3xf32> to vector<8xf32>
    %37 = vector.shape_cast %36 : vector<8xf32> to vector<8x1xf32>
    %38 = vector.broadcast %37 : vector<8x1xf32> to vector<8x3xf32>
    %39 = arith.subf %35, %38 : vector<8x3xf32>
    %40 = math.exp %39 : vector<8x3xf32>
    %cst_25 = arith.constant dense<0.000000e+00> : vector<8xf32>
    %41 = vector.multi_reduction <add>, %40, %cst_25 [1] : vector<8x3xf32> to vector<8xf32>
    %42 = vector.shape_cast %41 : vector<8xf32> to vector<8x1xf32>
    %43 = tpu.reciprocal %42 {approx = true} : vector<8x1xf32> -> vector<8x1xf32>
    %44 = arith.mulf %42, %43 : vector<8x1xf32>
    %cst_26 = arith.constant 2.000000e+00 : f32
    %45 = vector.broadcast %cst_26 : f32 to vector<8x1xf32>
    %46 = arith.subf %45, %44 : vector<8x1xf32>
    %47 = arith.mulf %43, %46 : vector<8x1xf32>
    %48 = vector.broadcast %47 : vector<8x1xf32> to vector<8x3xf32>
    %49 = arith.mulf %40, %48 : vector<8x3xf32>
    %50 = vector.shape_cast %15 : vector<8x128xf32> to vector<8x1x128xf32>
    %51 = vector.shape_cast %17 : vector<24x128xf32> to vector<1x24x128xf32>
    %52 = vector.broadcast %50 : vector<8x1x128xf32> to vector<8x24x128xf32>
    %53 = vector.broadcast %51 : vector<1x24x128xf32> to vector<8x24x128xf32>
    %54 = arith.addf %52, %53 : vector<8x24x128xf32>
    %cst_27 = arith.constant 0.000000e+00 : f32
    %55 = vector.broadcast %cst_27 : f32 to vector<8x24x128xf32>
    %56 = arith.cmpf oge, %54, %55 : vector<8x24x128xf32>
    %cst_28 = arith.constant 0.00999999977 : f32
    %57 = vector.broadcast %cst_28 : f32 to vector<8x24x128xf32>
    %58 = arith.mulf %57, %54 : vector<8x24x128xf32>
    %59 = arith.select %56, %54, %58 : vector<8x24x128xi1>, vector<8x24x128xf32>
    %60 = vector.broadcast %3 : vector<1x1x128xf32> to vector<8x24x128xf32>
    %61 = arith.mulf %59, %60 : vector<8x24x128xf32>
    %cst_29 = arith.constant dense<0.000000e+00> : vector<8x24xf32>
    %62 = vector.multi_reduction <add>, %61, %cst_29 [2] : vector<8x24x128xf32> to vector<8x24xf32>
    %c0_30 = arith.constant 0 : index
    %c0_31 = arith.constant 0 : index
    %c0_32 = arith.constant 0 : index
    %63 = vector.load %arg4[%c0_30, %c0_31, %c0_32] : memref<2x1x24xf32, #tpu.memory_space<vmem>>, vector<1x1x24xf32>
    %64 = vector.shape_cast %63 : vector<1x1x24xf32> to vector<1x24xf32>
    %65 = vector.broadcast %64 : vector<1x24xf32> to vector<8x24xf32>
    %66 = arith.addf %62, %65 : vector<8x24xf32>
    %cst_33 = arith.constant dense<0xFF800000> : vector<8xf32>
    %67 = vector.multi_reduction <maximumf>, %66, %cst_33 [1] : vector<8x24xf32> to vector<8xf32>
    %68 = vector.shape_cast %67 : vector<8xf32> to vector<8x1xf32>
    %69 = vector.broadcast %68 : vector<8x1xf32> to vector<8x24xf32>
    %70 = arith.subf %66, %69 : vector<8x24xf32>
    %71 = math.exp %70 : vector<8x24xf32>
    %cst_34 = arith.constant dense<0.000000e+00> : vector<8x3xf32>
    %72 = tpu.matmul %71, %4, %cst_34 {dimension_numbers = #tpu.dot_dimension_numbers<[1], [0], [0], [1], [0, 0, 1, 1], [], []>} : vector<8x24xf32>, vector<24x3xf32>, vector<8x3xf32> -> vector<8x3xf32>
    %cst_35 = arith.constant 1.000000e-30 : f32
    %73 = vector.broadcast %cst_35 : f32 to vector<8x3xf32>
    %74 = arith.maximumf %72, %73 : vector<8x3xf32>
    %75 = tpu.reciprocal %74 {approx = true} : vector<8x3xf32> -> vector<8x3xf32>
    %76 = arith.mulf %74, %75 : vector<8x3xf32>
    %cst_36 = arith.constant 2.000000e+00 : f32
    %77 = vector.broadcast %cst_36 : f32 to vector<8x3xf32>
    %78 = arith.subf %77, %76 : vector<8x3xf32>
    %79 = arith.mulf %75, %78 : vector<8x3xf32>
    %80 = arith.mulf %49, %79 : vector<8x3xf32>
    %cst_37 = arith.constant dense<0.000000e+00> : vector<8x24xf32>
    %81 = tpu.matmul %80, %5, %cst_37 {dimension_numbers = #tpu.dot_dimension_numbers<[1], [0], [0], [1], [0, 0, 1, 1], [], []>} : vector<8x3xf32>, vector<3x24xf32>, vector<8x24xf32> -> vector<8x24xf32>
    %82 = arith.mulf %71, %81 : vector<8x24xf32>
    %cst_38 = arith.constant 0.000000e+00 : f32
    %83 = vector.broadcast %cst_38 : f32 to vector<8x5xf32>
    %84 = tpu.concatenate %82, %49, %83 in 1 : vector<8x24xf32>, vector<8x3xf32>, vector<8x5xf32> -> vector<8x32xf32>
    %c0_39 = arith.constant 0 : index
    %c0_40 = arith.constant 0 : index
    %85 = vector.load %arg2[%c0_39, %c0_40] : memref<64x128xf32, #tpu.memory_space<vmem>>, vector<32x128xf32>
    %cst_41 = arith.constant dense<0.000000e+00> : vector<8x128xf32>
    %86 = tpu.matmul %84, %85, %cst_41 {dimension_numbers = #tpu.dot_dimension_numbers<[1], [0], [0], [1], [0, 0, 1, 1], [], []>} : vector<8x32xf32>, vector<32x128xf32>, vector<8x128xf32> -> vector<8x128xf32>
    %c0_42 = arith.constant 0 : index
    %c0_43 = arith.constant 0 : index
    %c0_44 = arith.constant 0 : index
    %87 = vector.load %arg12[%c0_42, %c0_43, %c0_44] : memref<2x8x128xf32, #tpu.memory_space<vmem>>, vector<1x8x128xf32>
    %88 = vector.shape_cast %87 : vector<1x8x128xf32> to vector<8x128xf32>
    %89 = vector.shape_cast %86 : vector<8x128xf32> to vector<1x8x128xf32>
    tpu.vector_store %arg12[%c0_42, %c0_43, %c0_44], %89 {strides = array<i32>} : memref<2x8x128xf32, #tpu.memory_space<vmem>>, vector<1x8x128xf32>,
    %90 = vector.extract_strided_slice %8 {offsets = [8, 0], sizes = [8, 128], strides = [1, 1]} : vector<16x256xf32> to vector<8x128xf32>
    %91 = vector.extract_strided_slice %8 {offsets = [8, 128], sizes = [8, 128], strides = [1, 1]} : vector<16x256xf32> to vector<8x128xf32>
    %92 = vector.extract_strided_slice %14 {offsets = [32, 0], sizes = [24, 128], strides = [1, 1]} : vector<64x256xf32> to vector<24x128xf32>
    %93 = vector.extract_strided_slice %14 {offsets = [56, 128], sizes = [3, 128], strides = [1, 1]} : vector<64x256xf32> to vector<3x128xf32>
    %94 = vector.shape_cast %91 : vector<8x128xf32> to vector<8x1x128xf32>
    %95 = vector.shape_cast %93 : vector<3x128xf32> to vector<1x3x128xf32>
    %96 = vector.broadcast %94 : vector<8x1x128xf32> to vector<8x3x128xf32>
    %97 = vector.broadcast %95 : vector<1x3x128xf32> to vector<8x3x128xf32>
    %98 = arith.addf %96, %97 : vector<8x3x128xf32>
    %cst_45 = arith.constant 0.000000e+00 : f32
    %99 = vector.broadcast %cst_45 : f32 to vector<8x3x128xf32>
    %100 = arith.cmpf oge, %98, %99 : vector<8x3x128xf32>
    %cst_46 = arith.constant 0.00999999977 : f32
    %101 = vector.broadcast %cst_46 : f32 to vector<8x3x128xf32>
    %102 = arith.mulf %101, %98 : vector<8x3x128xf32>
    %103 = arith.select %100, %98, %102 : vector<8x3x128xi1>, vector<8x3x128xf32>
    %104 = vector.broadcast %1 : vector<1x1x128xf32> to vector<8x3x128xf32>
    %105 = arith.mulf %103, %104 : vector<8x3x128xf32>
    %cst_47 = arith.constant dense<0.000000e+00> : vector<8x3xf32>
    %106 = vector.multi_reduction <add>, %105, %cst_47 [2] : vector<8x3x128xf32> to vector<8x3xf32>
    %c1 = arith.constant 1 : index
    %c0_48 = arith.constant 0 : index
    %c0_49 = arith.constant 0 : index
    %107 = vector.load %arg3[%c1, %c0_48, %c0_49] : memref<2x1x3xf32, #tpu.memory_space<vmem>>, vector<1x1x3xf32>
    %108 = vector.shape_cast %107 : vector<1x1x3xf32> to vector<1x3xf32>
    %109 = vector.broadcast %108 : vector<1x3xf32> to vector<8x3xf32>
    %110 = arith.addf %106, %109 : vector<8x3xf32>
    %cst_50 = arith.constant dense<0xFF800000> : vector<8xf32>
    %111 = vector.multi_reduction <maximumf>, %110, %cst_50 [1] : vector<8x3xf32> to vector<8xf32>
    %112 = vector.shape_cast %111 : vector<8xf32> to vector<8x1xf32>
    %113 = vector.broadcast %112 : vector<8x1xf32> to vector<8x3xf32>
    %114 = arith.subf %110, %113 : vector<8x3xf32>
    %115 = math.exp %114 : vector<8x3xf32>
    %cst_51 = arith.constant dense<0.000000e+00> : vector<8xf32>
    %116 = vector.multi_reduction <add>, %115, %cst_51 [1] : vector<8x3xf32> to vector<8xf32>
    %117 = vector.shape_cast %116 : vector<8xf32> to vector<8x1xf32>
    %118 = tpu.reciprocal %117 {approx = true} : vector<8x1xf32> -> vector<8x1xf32>
    %119 = arith.mulf %117, %118 : vector<8x1xf32>
    %cst_52 = arith.constant 2.000000e+00 : f32
    %120 = vector.broadcast %cst_52 : f32 to vector<8x1xf32>
    %121 = arith.subf %120, %119 : vector<8x1xf32>
    %122 = arith.mulf %118, %121 : vector<8x1xf32>
    %123 = vector.broadcast %122 : vector<8x1xf32> to vector<8x3xf32>
    %124 = arith.mulf %115, %123 : vector<8x3xf32>
    %125 = vector.shape_cast %90 : vector<8x128xf32> to vector<8x1x128xf32>
    %126 = vector.shape_cast %92 : vector<24x128xf32> to vector<1x24x128xf32>
    %127 = vector.broadcast %125 : vector<8x1x128xf32> to vector<8x24x128xf32>
    %128 = vector.broadcast %126 : vector<1x24x128xf32> to vector<8x24x128xf32>
    %129 = arith.addf %127, %128 : vector<8x24x128xf32>
    %cst_53 = arith.constant 0.000000e+00 : f32
    %130 = vector.broadcast %cst_53 : f32 to vector<8x24x128xf32>
    %131 = arith.cmpf oge, %129, %130 : vector<8x24x128xf32>
    %cst_54 = arith.constant 0.00999999977 : f32
    %132 = vector.broadcast %cst_54 : f32 to vector<8x24x128xf32>
    %133 = arith.mulf %132, %129 : vector<8x24x128xf32>
    %134 = arith.select %131, %129, %133 : vector<8x24x128xi1>, vector<8x24x128xf32>
    %135 = vector.broadcast %3 : vector<1x1x128xf32> to vector<8x24x128xf32>
    %136 = arith.mulf %134, %135 : vector<8x24x128xf32>
    %cst_55 = arith.constant dense<0.000000e+00> : vector<8x24xf32>
    %137 = vector.multi_reduction <add>, %136, %cst_55 [2] : vector<8x24x128xf32> to vector<8x24xf32>
    %c1_56 = arith.constant 1 : index
    %c0_57 = arith.constant 0 : index
    %c0_58 = arith.constant 0 : index
    %138 = vector.load %arg4[%c1_56, %c0_57, %c0_58] : memref<2x1x24xf32, #tpu.memory_space<vmem>>, vector<1x1x24xf32>
    %139 = vector.shape_cast %138 : vector<1x1x24xf32> to vector<1x24xf32>
    %140 = vector.broadcast %139 : vector<1x24xf32> to vector<8x24xf32>
    %141 = arith.addf %137, %140 : vector<8x24xf32>
    %cst_59 = arith.constant dense<0xFF800000> : vector<8xf32>
    %142 = vector.multi_reduction <maximumf>, %141, %cst_59 [1] : vector<8x24xf32> to vector<8xf32>
    %143 = vector.shape_cast %142 : vector<8xf32> to vector<8x1xf32>
    %144 = vector.broadcast %143 : vector<8x1xf32> to vector<8x24xf32>
    %145 = arith.subf %141, %144 : vector<8x24xf32>
    %146 = math.exp %145 : vector<8x24xf32>
    %cst_60 = arith.constant dense<0.000000e+00> : vector<8x3xf32>
    %147 = tpu.matmul %146, %4, %cst_60 {dimension_numbers = #tpu.dot_dimension_numbers<[1], [0], [0], [1], [0, 0, 1, 1], [], []>} : vector<8x24xf32>, vector<24x3xf32>, vector<8x3xf32> -> vector<8x3xf32>
    %cst_61 = arith.constant 1.000000e-30 : f32
    %148 = vector.broadcast %cst_61 : f32 to vector<8x3xf32>
    %149 = arith.maximumf %147, %148 : vector<8x3xf32>
    %150 = tpu.reciprocal %149 {approx = true} : vector<8x3xf32> -> vector<8x3xf32>
    %151 = arith.mulf %149, %150 : vector<8x3xf32>
    %cst_62 = arith.constant 2.000000e+00 : f32
    %152 = vector.broadcast %cst_62 : f32 to vector<8x3xf32>
    %153 = arith.subf %152, %151 : vector<8x3xf32>
    %154 = arith.mulf %150, %153 : vector<8x3xf32>
    %155 = arith.mulf %124, %154 : vector<8x3xf32>
    %cst_63 = arith.constant dense<0.000000e+00> : vector<8x24xf32>
    %156 = tpu.matmul %155, %5, %cst_63 {dimension_numbers = #tpu.dot_dimension_numbers<[1], [0], [0], [1], [0, 0, 1, 1], [], []>} : vector<8x3xf32>, vector<3x24xf32>, vector<8x24xf32> -> vector<8x24xf32>
    %157 = arith.mulf %146, %156 : vector<8x24xf32>
    %cst_64 = arith.constant 0.000000e+00 : f32
    %158 = vector.broadcast %cst_64 : f32 to vector<8x5xf32>
    %159 = tpu.concatenate %157, %124, %158 in 1 : vector<8x24xf32>, vector<8x3xf32>, vector<8x5xf32> -> vector<8x32xf32>
    %c32 = arith.constant 32 : index
    %c0_65 = arith.constant 0 : index
    %160 = vector.load %arg2[%c32, %c0_65] : memref<64x128xf32, #tpu.memory_space<vmem>>, vector<32x128xf32>
    %cst_66 = arith.constant dense<0.000000e+00> : vector<8x128xf32>
    %161 = tpu.matmul %159, %160, %cst_66 {dimension_numbers = #tpu.dot_dimension_numbers<[1], [0], [0], [1], [0, 0, 1, 1], [], []>} : vector<8x32xf32>, vector<32x128xf32>, vector<8x128xf32> -> vector<8x128xf32>
    %c1_67 = arith.constant 1 : index
    %c0_68 = arith.constant 0 : index
    %c0_69 = arith.constant 0 : index
    %162 = vector.load %arg12[%c1_67, %c0_68, %c0_69] : memref<2x8x128xf32, #tpu.memory_space<vmem>>, vector<1x8x128xf32>
    %163 = vector.shape_cast %162 : vector<1x8x128xf32> to vector<8x128xf32>
    %164 = vector.shape_cast %161 : vector<8x128xf32> to vector<1x8x128xf32>
    tpu.vector_store %arg12[%c1_67, %c0_68, %c0_69], %164 {strides = array<i32>} : memref<2x8x128xf32, #tpu.memory_space<vmem>>, vector<1x8x128xf32>,
    return
  }
  func.func @transform_0(%arg0: i32) -> (i32, i32) {
    %c0_i32 = arith.constant 0 : i32
    %c0_i32_0 = arith.constant 0 : i32
    return %arg0, %c0_i32 : i32, i32
  }
  func.func @transform_1(%arg0: i32) -> (i32, i32) {
    %c0_i32 = arith.constant 0 : i32
    %c0_i32_0 = arith.constant 0 : i32
    return %arg0, %c0_i32 : i32, i32
  }
  func.func @transform_2(%arg0: i32) -> (i32, i32, i32) {
    %c0_i32 = arith.constant 0 : i32
    %c0_i32_0 = arith.constant 0 : i32
    %c0_i32_1 = arith.constant 0 : i32
    return %arg0, %c0_i32, %c0_i32_0 : i32, i32, i32
  }
  func.func @transform_3(%arg0: i32) -> (i32, i32, i32) {
    %c0_i32 = arith.constant 0 : i32
    %c0_i32_0 = arith.constant 0 : i32
    %c0_i32_1 = arith.constant 0 : i32
    return %arg0, %c0_i32, %c0_i32_0 : i32, i32, i32
  }
  func.func @transform_4(%arg0: i32) -> (i32, i32) {
    %c0_i32 = arith.constant 0 : i32
    %c0_i32_0 = arith.constant 0 : i32
    %c0_i32_1 = arith.constant 0 : i32
    return %c0_i32, %c0_i32_0 : i32, i32
  }
  func.func @transform_5(%arg0: i32) -> (i32, i32) {
    %c0_i32 = arith.constant 0 : i32
    %c0_i32_0 = arith.constant 0 : i32
    %c0_i32_1 = arith.constant 0 : i32
    return %c0_i32, %c0_i32_0 : i32, i32
  }
  func.func @transform_6(%arg0: i32) -> (i32, i32) {
    %c0_i32 = arith.constant 0 : i32
    %c0_i32_0 = arith.constant 0 : i32
    %c0_i32_1 = arith.constant 0 : i32
    return %c0_i32, %c0_i32_0 : i32, i32
  }
  func.func @transform_7(%arg0: i32) -> (i32, i32) {
    %c0_i32 = arith.constant 0 : i32
    %c0_i32_0 = arith.constant 0 : i32
    %c0_i32_1 = arith.constant 0 : i32
    return %c0_i32, %c0_i32_0 : i32, i32
  }
  func.func @transform_8(%arg0: i32) -> (i32, i32) {
    %c0_i32 = arith.constant 0 : i32
    %c0_i32_0 = arith.constant 0 : i32
    %c0_i32_1 = arith.constant 0 : i32
    return %c0_i32, %c0_i32_0 : i32, i32
  }
  func.func @transform_9(%arg0: i32) -> (i32, i32) {
    %c0_i32 = arith.constant 0 : i32
    %c0_i32_0 = arith.constant 0 : i32
    %c0_i32_1 = arith.constant 0 : i32
    return %c0_i32, %c0_i32_0 : i32, i32
  }
  func.func @transform_10(%arg0: i32) -> (i32, i32) {
    %c0_i32 = arith.constant 0 : i32
    %c0_i32_0 = arith.constant 0 : i32
    %c0_i32_1 = arith.constant 0 : i32
    return %c0_i32, %c0_i32_0 : i32, i32
  }
  func.func @transform_11(%arg0: i32) -> (i32, i32, i32) {
    %c0_i32 = arith.constant 0 : i32
    %c0_i32_0 = arith.constant 0 : i32
    %c0_i32_1 = arith.constant 0 : i32
    return %arg0, %c0_i32, %c0_i32_0 : i32, i32, i32
  }
}

</mosaic_0001>

<bundles_post_ra>
// kernel: tpu_custom_call.1
= control target key start
LH: loop header
LB: loop body
LE: loop exit
PB: predicated region body
PF: predicated region fallthrough
CT: control target
= control target key end

     0   :  { %s6515_s0 = inlined_call_operand.hbm [shape: f32[32,128], index: 0, kind: input, shape index: {}]   ;;  %s6516_s1 = inlined_call_operand.hbm [shape: f32[128,128], index: 1, kind: input, shape index: {}]   ;;  %s6517_s2 = inlined_call_operand.vmem [shape: f32[4,1,3], index: 2, kind: input, shape index: {}]   ;;  %s6518_s3 = inlined_call_operand.vmem [shape: f32[4,1,24], index: 3, kind: input, shape index: {}]   ;;  %s6519_s4 = inlined_call_operand.hbm [shape: f32[128,256], index: 4, kind: input, shape index: {}]   ;;  %s6520_s5 = inlined_call_operand.hbm [shape: f32[128,256], index: 5, kind: input, shape index: {}]   ;;  %s6521_s6 = inlined_call_operand.vmem [shape: f32[1,256], index: 6, kind: input, shape index: {}]   ;;  %s6522_s7 = inlined_call_operand.vmem [shape: f32[1,128], index: 7, kind: input, shape index: {}]   ;;  %s6523_s8 = inlined_call_operand.vmem [shape: f32[1,128], index: 8, kind: input, shape index: {}]   ;;  %s6524_s9 = inlined_call_operand.vmem [shape: f32[24,3], index: 9, kind: input, shape index: {}]   ;;  %s6525_s10 = inlined_call_operand.vmem [shape: f32[3,24], index: 10, kind: input, shape index: {}]   ;;  %s6526_s11 = inlined_call_operand.hbm [shape: f32[4,8,128], index: 11, kind: output, shape index: {}]  }
   0x1   :  { %6606 = sst [smem:[#allocation69_spill]] %s6515_s0 }
   0x2   :  { %6607 = sst [smem:[#allocation70_spill]] %s6519_s4 }
   0x3   :  { %6608 = sst [smem:[#allocation71_spill]] %s6520_s5 }
   0x4   :  { %6609 = sst [smem:[#allocation72_spill]] %s6525_s10 }
   0x5   :  { %6610 = sst [smem:[#allocation73_spill]] %s6526_s11 }
   0x6   :  { %16 = vsyncpa [#allocation3], 0 }
   0x7   :  { %18 = vsyncpa [#allocation3 + $0x1], 0 }
   0x8   :  { %19 = vsyncpa [#allocation6], 0 }
   0x9   :  { %21 = vsyncpa [#allocation6 + $0x1], 0 }
   0xa   :  { %22 = vsyncpa [#allocation9], 0 }
   0xb   :  { %23 = vsyncpa [#allocation4], 0 }
   0xc   :  { %25 = vsyncpa [#allocation4 + $0x1], 0  ;;  %s4482_s17 = smov 0   ;;  %s4484_s18 = smov 0  }
   0xd   :  { %s4486_s19 = smov 0   ;;  %s4488_s20 = smov 0  }
   0xe LB: > { %6611 = sst [smem:[#allocation16_spill]] %s4399_s17  ;;  %s4503_s21 = sadd.s32 4294967295, %s4411_s20   ;;  %s4411_s20 = sphi %s4488_s20, %s6765_s20   ;;  %s4407_s19 = sphi %s4486_s19, %s6767_s19   ;;  %s4403_s18 = sphi %s4484_s18, %s6769_s18   ;;  %s4399_s17 = sphi %s4482_s17, %s6768_s17  }
   0xf   : > { %6612 = sst [smem:[#allocation17_spill]] %s4407_s19  ;;  %s3887_s22 = sadd.s32 4294967294, %s4411_s20  }
  0x10   : > { %p51_p0 = scmp.ne.s32.totalorder %s4403_s18, %s4399_s17  ;;  %p52_p1 = scmp.eq.s32.totalorder %s4503_s21, 0 }
  0x11   : > { %p300_p2 = scmp.eq.s32.totalorder %s4503_s21, 1  ;;  %p306_p3 = scmp.eq.s32.totalorder %s3887_s22, 1 }
  0x12   : > { %p4512_p4 = por %p52_p1, %p51_p0  ;;  %p3888_p5 = scmp.ge.s32.totalorder %s4411_s20, 1 }
  0x13   : > { %p4517_p6 = por %p306_p3, %p51_p0  ;;  %p313_p7 = scmp.lt.s32.totalorder %s4411_s20, 3 }
  0x14   : > { %s6616_s4 = sld [smem:[#allocation70_spill]]  ;;  %s4413_s29 = smov [#allocation7]  }
  0x15   : > { %s6614_s24 = scalar_select %p4517_p6, 1, 0 }
  0x16   : > { %p4525_p8 = pnand %p3888_p5, %p313_p7  ;;  %s326_s30 = sshll.u32 %s4413_s29, 4  ;;  %s327_s30 = int_to_ptr.vmem [resolvable:$true] %s326_s30 }
  0x17   : > { %6615 = sst [smem:[#allocation18_spill]] %s6614_s24  ;;  %s4414_s15 = smov 256  }
  0x18   : > { %p3939_p9 = pneg %p4525_p8  ;;  %s6618_s5 = sld [smem:[#allocation71_spill]] }
  0x19   : > { %s4415_s16 = smov 16   ;;  %s4416_s22 = smov [#allocation8]  }
  0x1a   : > { %s324_s27 = sshll.u32 %s6616_s4, 4  ;;  %p3940_p10 = pnand %p3939_p9, %p52_p1  ;;  %s325_s27 = int_to_ptr.hbm [resolvable:$true] %s324_s27 }
  0x1b   : > { %s340_s25 = sshll.u32 %s4416_s22, 4  ;;  %s4538_s26 = sadd.s32 1, %s4411_s20   ;;  %s341_s25 = int_to_ptr.vmem [resolvable:$true] %s340_s25 }
  0x1c   : > { %3942 = dma.hbm_to_vmem [thread:$0]  (!%p3940_p10), %s325_s27, 4096, %s327_s30, [#allocation6], %s4414_s15, %s4414_s15, %s4415_s16  }
  0x1d   : > { %6619 = sst [smem:[#allocation19_spill]] %s4538_s26  ;;  %s38_s29 = sadd.s32 1, %s4407_s19 }
  0x1e   : > { %s338_s14 = sshll.u32 %s6618_s5, 4  ;;  %s35_s4 = ssub.s32 %s4411_s20, %s4538_s26  ;;  %s339_s14 = int_to_ptr.hbm [resolvable:$true] %s338_s14 }
  0x1f   : > { %3945 = dma.hbm_to_vmem [thread:$0]  (!%p3940_p10), %s339_s14, 4096, %s341_s25, [#allocation9], %s4414_s15, %s4414_s15, %s4415_s16  }
  0x20   : > { %p45_p12 = scmp.ne.s32.totalorder %s4407_s19, %s4403_s18  ;;  %p36_p13 = scmp.eq.s32.totalorder %s35_s4, 0 }
  0x21   : > { %p46_p0 = scmp.eq.s32.totalorder %s4411_s20, 0  ;;  %p3959_p5 = scmp.lt.s32.totalorder %s4411_s20, 2 }
  0x22   : > { %p4548_p3 = por %p300_p2, %p45_p12  ;;  %s4557_s30 = sand.u32 1, %s4407_s19  }
  0x23   : > { %s4554_s27 = scalar_select %p36_p13, %s4407_s19, %s38_s29  }
  0x24   : > { %s6620_s12 = scalar_select %p4548_p3, 1, 0 }
  0x25   : > { %6622 = sst [smem:[#allocation21_spill]] %s4554_s27  ;;  %p47_p7 = por %p46_p0, %p45_p12 }
  0x26   : > { %6621 = sst [smem:[#allocation20_spill]] %s6620_s12  ;;  %s3892_s13 = sshll.u32 %s4557_s30, 4 }
  0x27   : > { %s3922_s14 = sshll.u32 %s4411_s20, 4  ;;  %s6623_s0 = sld [smem:[#allocation69_spill]] }
  0x28   : > { %s373_s22 = scalar_lea.vmem [#allocation2], %s3892_s13  ;;  %p4564_p2 = pnand %p3959_p5, %p47_p7 }
  0x29   : > { %s381_s25 = sshll.u32 %s373_s22, 4  ;;  %s391_s29 = sand.u32 1, %s4411_s20   ;;  %s382_s25 = int_to_ptr.vmem [resolvable:$true] %s381_s25 }
  0x2a   : > { %s370_s27 = scalar_lea.sflag [#allocation3], %s4557_s30  ;;  %p4277_p10 = pneg %p4564_p2 }
  0x2d   : > { %s378_s4 = scalar_lea.hbm %s6623_s0, %s3922_s14  ;;  %s4280_s15 = scalar_lea.hbm %s6623_s0, 32 }
  0x2e   : > { %s379_s5 = sshll.u32 %s378_s4, 4  ;;  %s380_s5 = int_to_ptr.hbm [resolvable:$true] %s379_s5 }
  0x2f   : > { %s4273_s19 = sshra.s32 %s380_s5, 4  ;;  %s4274_s19 = int_to_ptr.hbm [resolvable:$true] %s4273_s19 }
  0x30   : > { %s4275_s24 = scalar_lea.hbm %s4274_s19, 16  ;;  %p4281_p0 = scmp.lt.s32.totalorder %s4274_s19, %s6623_s0 }
  0x31   : > { %p4276_p9 = scmp.ne.s32.totalorder %s4274_s19, %s4275_s24  ;;  %p4282_p5 = scmp.lt.s32.totalorder %s4280_s15, %s4275_s24 }
  0x33   : > { %p4278_p12 = pnand %p4277_p10, %p4276_p9  ;;  %p4283_p7 = por %p4282_p5, %p4281_p0 }
  0x35   : > { %p4279_p13 = pneg %p4278_p12 }
  0x37   : > { %p4284_p11 = pnand %p4283_p7, %p4279_p13 }
  0x39   : > { %4287 = shalt.err (!%p4284_p11)
}
  0x3a   : > { %s4417_s22 = smov 128   ;;  %s4418_s17 = smov 8  }
  0x3b   : > { %3949 = dma.hbm_to_vmem [thread:$0]  (!%p4564_p2), %s380_s5, 256, %s382_s25, %s370_s27, %s4417_s22, %s4417_s22, %s4418_s17  }
  0x3c   : > { %s3895_s11 = sshll.u32 %s4557_s30, 6  ;;  %s3923_s12 = sshll.u32 %s4411_s20, 6 }
  0x3d   : > { %s400_s10 = scalar_lea.hbm %s6516_s1, %s3923_s12  ;;  %s395_s16 = scalar_lea.vmem [#allocation5], %s3895_s11 }
  0x3e   : > { %s403_s19 = sshll.u32 %s395_s16, 4  ;;  %s401_s24 = sshll.u32 %s400_s10, 4  ;;  %s404_s19 = int_to_ptr.vmem [resolvable:$true] %s403_s19  ;;  %s402_s24 = int_to_ptr.hbm [resolvable:$true] %s401_s24 }
  0x3f   : > { %s392_s15 = scalar_lea.sflag [#allocation6], %s391_s29  ;;  %s4303_s4 = sshra.s32 %s402_s24, 4  ;;  %s4304_s4 = int_to_ptr.hbm [resolvable:$true] %s4303_s4 }
  0x40   : > { %s4305_s0 = scalar_lea.hbm %s4304_s4, 64  ;;  %s4310_s30 = scalar_lea.hbm %s6516_s1, 128 }
  0x41   : > { %p4306_p11 = scmp.ne.s32.totalorder %s4304_s4, %s4305_s0  ;;  %p4311_p13 = scmp.lt.s32.totalorder %s4304_s4, %s6516_s1 }
  0x42   : > { %p4312_p0 = scmp.lt.s32.totalorder %s4310_s30, %s4305_s0 }
  0x43   : > { %p4308_p9 = pnand %p4306_p11, %p4277_p10 }
  0x44   : > { %p4313_p5 = por %p4312_p0, %p4311_p13 }
  0x45   : > { %p4309_p12 = pneg %p4308_p9 }
  0x47   : > { %p4314_p7 = pnand %p4313_p5, %p4309_p12 }
  0x49   : > { %4317 = shalt.err (!%p4314_p7)
}
  0x4a   : > { %3952 = dma.hbm_to_vmem [thread:$0]  (!%p4564_p2), %s402_s24, 1024, %s404_s19, %s392_s15, %s4417_s22, %s4417_s22, %s4418_s17  }
  0x4b   : > { %431 = sbr.rel (%p4525_p8) target bundleno = 2856 (0xb28), region = 64 }
  0x50   : > { %s4602_s10 = sand.u32 1, %s4403_s18  }
  0x51   : > { %s3899_s11 = sshll.u32 %s4602_s10, 4  ;;  %s434_s29 = scalar_lea.sflag [#allocation3], %s4602_s10 }
  0x52   : > { %s4608_s0 = scalar_lea.vmem [#allocation2], %s3899_s11 }
  0x53   : > { %4378 = dma.done.wait (%p4512_p4), %s434_s29, 256  }
  0x54   : > { %4380 = vsyncadd (%p4512_p4), %s434_s29, 4294967040  ;;  %s443_s17 = sand.u32 1, %s4503_s21   ;;  %s3900_s28 = sshll.u32 %s4602_s10, 6 }
  0x55   : > { %s444_s26 = scalar_lea.sflag [#allocation6], %s443_s17  ;;  %s4616_s22 = scalar_lea.vmem [#allocation5], %s3900_s28 }
  0x56   : > { %4382 = dma.done.wait (%p4512_p4), %s444_s26, 1024  }
  0x57   : > { %4384 = vsyncadd (%p4512_p4), %s444_s26, 4294966272 }
  0x58   : > { %4386 = dma.done.wait (%p52_p1), [#allocation6], 4096  }
  0x59   : > { %4388 = vsyncadd (%p52_p1), [#allocation6], 4294963200 }
  0x5a   : > { %4390 = dma.done.wait (%p52_p1), [#allocation9], 4096  }
  0x5b   : > { %4392 = vsyncadd (%p52_p1), [#allocation9], 4294963200  ;;  %v647_v0 = vld [vmem:[#allocation8 + $0xf0] sm:$0xff]  ;;  %v645_v1 = vld [vmem:[#allocation8 + $0xe0] sm:$0xff]  ;;  %s3904_s23 = sshll.u32 %s4503_s21, 1  ;;  %s6720_s24 = sld [smem:[#allocation72_spill]] }
  0x5c   : > { %v561_v2 = vld [vmem:[#allocation7 + $0xf0] sm:$0xff]  ;;  %655 = vmatpush.msra.mxu2 %v647_v0  ;;  %v559_v3 = vld [vmem:[#allocation7 + $0xe0] sm:$0xff]  ;;  %v648_v8 = vld [vmem:[#allocation8 + $0xf8] sm:$0xff]  ;;  %p513_p1 = scmp.lt.s32.totalorder %s3904_s23, 3  ;;  %s6361_s12 = scalar_lea.vmem [#allocation10], %s3899_s11 }
  0x5d   : > { %563 = vmatpush.msra.mxu0 %v561_v2  ;;  %v643_v4 = vld [vmem:[#allocation8 + $0xd0] sm:$0xff]  ;;  %v641_v6 = vld [vmem:[#allocation8 + $0xc0] sm:$0xff]  ;;  %v646_v9 = vld [vmem:[#allocation8 + $0xe8] sm:$0xff]  ;;  %694 = vmatpush.msra.mxu3 %v648_v8  ;;  %s6760_s17 = sld [smem:[#allocation73_spill]]  ;;  %s3739_s14 = scalar_lea.sflag [#allocation4], %s4602_s10 }
  0x5e   : > { %v557_v5 = vld [vmem:[#allocation7 + $0xd0] sm:$0xff]  ;;  %656 = vmatpush.msra.mxu2 %v645_v1  ;;  %v555_v7 = vld [vmem:[#allocation7 + $0xc0] sm:$0xff]  ;;  %v644_v12 = vld [vmem:[#allocation8 + $0xd8] sm:$0xff]  ;;  %s6771_s23 = smov (!%p513_p1, %s3904_s23), 3 }
  0x5f   : > { %564 = vmatpush.msra.mxu0 %v559_v3  ;;  %v639_v10 = vld [vmem:[#allocation8 + $0xb0] sm:$0xff]  ;;  %v637_v13 = vld [vmem:[#allocation8 + $0xa0] sm:$0xff]  ;;  %695 = vmatpush.msra.mxu3 %v646_v9  ;;  %v642_v15 = vld [vmem:[#allocation8 + $0xc8] sm:$0xff]  ;;  %s4634_s16 = scalar_lea.vmem %s6518_s3, %s6771_s23  ;;  %s4639_s15 = scalar_lea.vmem %s6517_s2, %s6771_s23 }
  0x60   : > { %657 = vmatpush.msra.mxu2 %v643_v4  ;;  %v553_v11 = vld [vmem:[#allocation7 + $0xb0] sm:$0xff]  ;;  %v551_v14 = vld [vmem:[#allocation7 + $0xa0] sm:$0xff]  ;;  %v640_v18 = vld [vmem:[#allocation8 + $0xb8] sm:$0xff]  ;;  %s3751_s23 = sshll.u32 %s6361_s12, 4  ;;  %s3752_s23 = int_to_ptr.vmem [resolvable:$true] %s3751_s23 }
  0x61   : > { %565 = vmatpush.msra.mxu0 %v557_v5  ;;  %v635_v16 = vld [vmem:[#allocation8 + $0x90] sm:$0xff]  ;;  %696 = vmatpush.msra.mxu3 %v644_v12  ;;  %v633_v19 = vld [vmem:[#allocation8 + $0x80] sm:$0xff]  ;;  %v638_v21 = vld [vmem:[#allocation8 + $0xa8] sm:$0xff]  ;;  %v6537_v5 = vlaneseq }
  0x62   : > { %658 = vmatpush.msra.mxu2 %v641_v6  ;;  %v549_v17 = vld [vmem:[#allocation7 + $0x90] sm:$0xff]  ;;  %v547_v20 = vld [vmem:[#allocation7 + $0x80] sm:$0xff]  ;;  %v636_v24 = vld [vmem:[#allocation8 + $0x98] sm:$0xff] }
  0x63   : > { %566 = vmatpush.msra.mxu0 %v555_v7  ;;  %697 = vmatpush.msra.mxu3 %v642_v15  ;;  %v631_v22 = vld [vmem:[#allocation8 + $0x70] sm:$0xff]  ;;  %v629_v25 = vld [vmem:[#allocation8 + $0x60] sm:$0xff]  ;;  %v634_v28 = vld [vmem:[#allocation8 + $0x88] sm:$0xff]  ;;  %v4649_v8 = vshrl.u32 %v6537_v5, 7  ;;  %s6761_s28 = smov %s6760_s17 }
  0x64   : > { %659 = vmatpush.msra.mxu2 %v639_v10  ;;  %v545_v23 = vld [vmem:[#allocation7 + $0x70] sm:$0xff]  ;;  %v543_v27 = vld [vmem:[#allocation7 + $0x60] sm:$0xff]  ;;  %v562_v29 = vld [vmem:[#allocation7 + $0xf8] sm:$0xff] }
  0x65   : > { %567 = vmatpush.msra.mxu0 %v553_v11  ;;  %698 = vmatpush.msra.mxu3 %v640_v18  ;;  %v627_v26 = vld [vmem:[#allocation8 + $0x50] sm:$0xff]  ;;  %v560_v30 = vld [vmem:[#allocation7 + $0xe8] sm:$0xff]  ;;  %v625_v31 = vld [vmem:[#allocation8 + $0x40] sm:$0xff]  ;;  %v4652_v9 = vadd.s32 16, %v4649_v8 }
  0x66   : > { %660 = vmatpush.msra.mxu2 %v637_v13  ;;  %v541_v32 = vld [vmem:[#allocation7 + $0x50] sm:$0xff]  ;;  %v539_v33 = vld [vmem:[#allocation7 + $0x40] sm:$0xff]  ;;  %v632_v34 = vld [vmem:[#allocation8 + $0x78] sm:$0xff]  ;;  %586 = vmatpush.msra.mxu1 %v562_v29  ;;  %v4661_v13 = vadd.s32 8, %v4649_v8 }
  0x67   : > { %568 = vmatpush.msra.mxu0 %v551_v14  ;;  %699 = vmatpush.msra.mxu3 %v638_v21  ;;  %v558_v35 = vld [vmem:[#allocation7 + $0xd8] sm:$0xff]  ;;  %v630_v36 = vld [vmem:[#allocation8 + $0x68] sm:$0xff]  ;;  %v623_v38 = vld [vmem:[#allocation8 + $0x30] sm:$0xff]  ;;  %6625 = vst [vmem:[#allocation22_spill] sm:$0xff] %v4652_v9 }
  0x68   : > { %661 = vmatpush.msra.mxu2 %v635_v16  ;;  %587 = vmatpush.msra.mxu1 %v560_v30  ;;  %v556_v37 = vld [vmem:[#allocation7 + $0xc8] sm:$0xff]  ;;  %v537_v39 = vld [vmem:[#allocation7 + $0x30] sm:$0xff]  ;;  %v628_v40 = vld [vmem:[#allocation8 + $0x58] sm:$0xff]  ;;  %6626 = vst [vmem:[#allocation23_spill] sm:$0xff] %v4661_v13 }
  0x69   : > { %569 = vmatpush.msra.mxu0 %v549_v17  ;;  %700 = vmatpush.msra.mxu3 %v636_v24  ;;  %v554_v41 = vld [vmem:[#allocation7 + $0xb8] sm:$0xff]  ;;  %v621_v42 = vld [vmem:[#allocation8 + $0x20] sm:$0xff]  ;;  %v626_v44 = vld [vmem:[#allocation8 + $0x48] sm:$0xff] }
  0x6a   : > { %662 = vmatpush.msra.mxu2 %v633_v19  ;;  %588 = vmatpush.msra.mxu1 %v558_v35  ;;  %v535_v43 = vld [vmem:[#allocation7 + $0x20] sm:$0xff]  ;;  %v552_v45 = vld [vmem:[#allocation7 + $0xa8] sm:$0xff]  ;;  %v619_v46 = vld [vmem:[#allocation8 + $0x10] sm:$0xff] }
  0x6b   : > { %570 = vmatpush.msra.mxu0 %v547_v20  ;;  %701 = vmatpush.msra.mxu3 %v634_v28  ;;  %v533_v47 = vld [vmem:[#allocation7 + $0x10] sm:$0xff]  ;;  %v624_v48 = vld [vmem:[#allocation8 + $0x38] sm:$0xff]  ;;  %v617_v50 = vld [vmem:[#allocation8] sm:$0xff] }
  0x6c   : > { %663 = vmatpush.msra.mxu2 %v631_v22  ;;  %589 = vmatpush.msra.mxu1 %v556_v37  ;;  %v550_v49 = vld [vmem:[#allocation7 + $0x98] sm:$0xff]  ;;  %v531_v51 = vld [vmem:[#allocation7] sm:$0xff]  ;;  %v622_v54 = vld [vmem:[#allocation8 + $0x28] sm:$0xff] }
  0x6d   : > { %571 = vmatpush.msra.mxu0 %v545_v23  ;;  %702 = vmatpush.msra.mxu3 %v632_v34  ;;  %v609_v52 = vld [vmem:[%s4616_s22] sm:$0xff]  ;;  %v548_v55 = vld [vmem:[#allocation7 + $0x88] sm:$0xff]  ;;  %v620_v56 = vld [vmem:[#allocation8 + $0x18] sm:$0xff] }
  0x6e   : > { %664 = vmatpush.msra.mxu2 %v629_v25  ;;  %590 = vmatpush.msra.mxu1 %v554_v41  ;;  %v529_v53 = vld [vmem:[%s4608_s0] sm:$0xff]  ;;  %v546_v57 = vld [vmem:[#allocation7 + $0x78] sm:$0xff]  ;;  %v618_v58 = vld [vmem:[#allocation8 + $0x8] sm:$0xff] }
  0x6f   : > { %572 = vmatpush.msra.mxu0 %v543_v27  ;;  %703 = vmatpush.msra.mxu3 %v630_v36  ;;  %v544_v59 = vld [vmem:[#allocation7 + $0x68] sm:$0xff]  ;;  %v542_v60 = vld [vmem:[#allocation7 + $0x58] sm:$0xff]  ;;  %v611_v2 = vld [vmem:[%s4616_s22 + $0x10] sm:$0xff] }
  0x70   : > { %665 = vmatpush.msra.mxu2 %v627_v26  ;;  %591 = vmatpush.msra.mxu1 %v552_v45  ;;  %v610_v61 = vld [vmem:[%s4616_s22 + $0x8] sm:$0xff]  ;;  %v538_v63 = vld [vmem:[#allocation7 + $0x38] sm:$0xff]  ;;  %v613_v7 = vld [vmem:[%s4616_s22 + $0x20] sm:$0xff] }
  0x71   : > { %573 = vmatpush.msra.mxu0 %v541_v32  ;;  %704 = vmatpush.msra.mxu3 %v628_v40  ;;  %v540_v62 = vld [vmem:[#allocation7 + $0x48] sm:$0xff]  ;;  %v534_v1 = vld [vmem:[#allocation7 + $0x18] sm:$0xff]  ;;  %v4068_v10 = vld [vmem:[%s4639_s15] ss:$0 sm:$0xff] }
  0x72   : > { %666 = vmatpush.msra.mxu2 %v625_v31  ;;  %592 = vmatpush.msra.mxu1 %v550_v49  ;;  %v536_v0 = vld [vmem:[#allocation7 + $0x28] sm:$0xff]  ;;  %v612_v4 = vld [vmem:[%s4616_s22 + $0x18] sm:$0xff]  ;;  %v4067_v12 = vld [vmem:[%s4634_s16] ss:$0 sm:$0xff] }
  0x73   : > { %574 = vmatpush.msra.mxu0 %v539_v33  ;;  %705 = vmatpush.msra.mxu3 %v626_v44  ;;  %v532_v3 = vld [vmem:[#allocation7 + $0x8] sm:$0xff]  ;;  %v615_v14 = vld [vmem:[%s4616_s22 + $0x30] sm:$0xff]  ;;  %v616_v15 = vld [vmem:[%s4616_s22 + $0x38] sm:$0xff] }
  0x74   : > { %667 = vmatpush.msra.mxu2 %v623_v38  ;;  %593 = vmatpush.msra.mxu1 %v548_v55  ;;  %v530_v6 = vld [vmem:[%s4608_s0 + $0x8] sm:$0xff]  ;;  %v4069_v16 = vld [vmem:[%s4639_s15 + $0x1] ss:$0 sm:$0xff]  ;;  %v4699_v32 = vld [vmem:[%s6523_s8] ss:$0 sm:$0xff]  ;;  %s4353_s15 = scalar_lea.hbm %s6761_s28, 32 }
  0x75   : > { %575 = vmatpush.msra.mxu0 %v537_v39  ;;  %706 = vmatpush.msra.mxu3 %v624_v48  ;;  %v614_v11 = vld [vmem:[%s4616_s22 + $0x28] sm:$0xff]  ;;  %v4673_v18 = vld [vmem:[%s6521_s6] sm:$0x3] }
  0x76   : > { %668 = vmatpush.msra.mxu2 %v621_v42  ;;  %594 = vmatpush.msra.mxu1 %v546_v57  ;;  %v4679_v22 = vperm.slane %v4673_v18, 0 }
  0x77   : > { %576 = vmatpush.msra.mxu0 %v535_v43  ;;  %707 = vmatpush.msra.mxu3 %v622_v54 }
  0x78   : > { %669 = vmatpush.msra.mxu2 %v619_v46  ;;  %595 = vmatpush.msra.mxu1 %v544_v59 }
  0x79   : > { %577 = vmatpush.msra.mxu0 %v533_v47  ;;  %708 = vmatpush.msra.mxu3 %v620_v56 }
  0x7a   : > { %670 = vmatpush.msra.mxu2 %v617_v50  ;;  %596 = vmatpush.msra.mxu1 %v542_v60 }
  0x7b   : > { %578 = vmatpush.msra.mxu0 %v531_v51  ;;  %671 = vmatmul.f32.vlgmr.msra.gmra.mxu2 %v609_v52 }
  0x7c   : > { %579 = vmatmul.f32.vlgmr.msra.gmra.mxu0 %v529_v53  ;;  %709 = vmatpush.msra.mxu3 %v618_v58 }
  0x7d   : > { %710 = vmatmul.f32.vlgmr.msra.gmra.mxu3 %v609_v52  ;;  %597 = vmatpush.msra.mxu1 %v540_v62 }
  0x7e   : > { %4004 = vset.pattern.permute.xlu2 %v4649_v8  ;;  %4005 = vset.pattern.permute.xlu1 %v4649_v8 }
  0x7f   : > { %598 = vmatpush.msra.mxu1 %v538_v63  ;;  %4007 = vset.pattern.permute.xlu0 %v4652_v9 }
  0x81   : > { %599 = vmatpush.msra.mxu1 %v536_v0 }
  0x83   : > { %674 = vmatmul.f32.gmra.mxu2 %v610_v61  ;;  %600 = vmatpush.msra.mxu1 %v534_v1 }
  0x84   : > { %582 = vmatmul.f32.gmra.mxu0 %v530_v6 }
  0x85   : > { %712 = vmatmul.f32.gmra.mxu3 %v610_v61  ;;  %601 = vmatpush.msra.mxu1 %v532_v3 }
  0x86   : > { %602 = vmatmul.f32.vlgmr.msra.gmra.mxu1 %v529_v53  ;;  %828 = vperm.xlu2 %4004, %v4068_v10  }
  0x87   : > { %1223 = vperm.xlu1 %4005, %v4067_v12   ;;  %1235 = vperm.xlu0 %4007, %v4067_v12  }
  0x8b   : > { %677 = vmatmul.f32.gmra.mxu2 %v611_v2 }
  0x8d   : > { %714 = vmatmul.f32.gmra.mxu3 %v611_v2 }
  0x8e   : > { %605 = vmatmul.f32.gmra.mxu1 %v530_v6  ;;  %4006 = vset.pattern.permute.xlu2 %v4661_v13 }
  0x8f   : > { %4008 = vset.pattern.permute.xlu0 %v4649_v8 }
  0x93   : > { %680 = vmatmul.f32.gmra.mxu2 %v612_v4 }
  0x95   : > { %716 = vmatmul.f32.gmra.mxu3 %v612_v4 }
  0x96   : > { %1229 = vperm.xlu2 %4006, %v4067_v12  }
  0x97   : > { %2342 = vperm.xlu0 %4008, %v4069_v16  }
  0x9b   : > { %682 = vmatmul.f32.gmra.mxu2 %v613_v7 }
  0x9d   : > { %719 = vmatmul.f32.gmra.mxu3 %v613_v7 }
  0xa3   : > { %685 = vmatmul.f32.gmra.mxu2 %v614_v11 }
  0xa5   : > { %721 = vmatmul.f32.gmra.mxu3 %v614_v11 }
  0xab   : > { %688 = vmatmul.f32.gmra.mxu2 %v615_v14 }
  0xad   : > { %723 = vmatmul.f32.gmra.mxu3 %v615_v14 }
  0xb3   : > { %691 = vmatmul.f32.gmra.mxu2 %v616_v15 }
  0xb5   : > { %725 = vmatmul.f32.gmra.mxu3 %v616_v15 }
  0xf9   : > { %v4668_v17 = vpop.f32.mrf.mxu0 }
  0xfa   : > { %v1023_v19 = vrot.slane %v4668_v17, 2  ;;  %v1022_v20 = vrot.slane %v4668_v17, 1  ;;  %v1024_v21 = vrot.slane %v4668_v17, 3  ;;  %v4689_v28 = vperm.slane %v4668_v17, 0 }
  0xfb   : > { %v1025_v34 = vrot.slane %v4668_v17, 4  ;;  %v1026_v51 = vrot.slane %v4668_v17, 5  ;;  %v1027_v3 = vrot.slane %v4668_v17, 6 }
  0xfc   : > { %v1031_v23 = vperm.slane %v1023_v19, 0  ;;  %v4681_v24 = vperm.slane %v1022_v20, 0  ;;  %v4683_v26 = vperm.slane %v1024_v21, 0 }
  0xfd   : > { %v4706_v45 = vperm.slane %v1025_v34, 0  ;;  %v4721_v61 = vperm.slane %v1026_v51, 0  ;;  %v4736_v19 = vperm.slane %v1027_v3, 0 }
  0xfe   : > { %v672_v25 = vpop.f32.mrf.mxu2 }
  0xff   : > { %v4686_v27 = vadd.f32 %v672_v25, %v4679_v22 }
 0x100   : > { %v711_v38 = vpop.f32.mrf.mxu3 }
 0x101   : > { %v1051_v29 = vadd.f32 %v1031_v23, %v4686_v27  ;;  %v1048_v30 = vadd.f32 %v4681_v24, %v4686_v27  ;;  %v1045_v31 = vadd.f32 %v4689_v28, %v4686_v27  ;;  %v1054_v33 = vadd.f32 %v4683_v26, %v4686_v27 }
 0x102   : > { %v1057_v50 = vadd.f32 %v4706_v45, %v4686_v27  ;;  %v1060_v2 = vadd.f32 %v4721_v61, %v4686_v27 }
 0x103   : > { %vm1075_vm0 = vcmp.ge.f32.partialorder %v1051_v29, 0.0  ;;  %v1099_v35 = vmul.f32 0.01, %v1051_v29  ;;  %vm1072_vm1 = vcmp.ge.f32.partialorder %v1048_v30, 0.0  ;;  %v1096_v36 = vmul.f32 0.01, %v1048_v30 }
 0x104   : > { %vm1069_vm2 = vcmp.ge.f32.partialorder %v1045_v31, 0.0  ;;  %v1093_v37 = vmul.f32 0.01, %v1045_v31  ;;  %v1102_v48 = vmul.f32 0.01, %v1054_v33  ;;  %vm1078_vm3 = vcmp.ge.f32.partialorder %v1054_v33, 0.0 }
 0x105   : > { %v1123_v39 = vsel %vm1075_vm0, %v1051_v29, %v1099_v35  ;;  %v1120_v40 = vsel %vm1072_vm1, %v1048_v30, %v1096_v36  ;;  %v1105_v60 = vmul.f32 0.01, %v1057_v50  ;;  %vm1081_vm5 = vcmp.ge.f32.partialorder %v1057_v50, 0.0  ;;  %v4743_v35 = vpop.f32.mrf.mxu1 }
 0x106   : > { %v675_v41 = vpop.f32.mrf.mxu2  ;;  %v1150_v42 = vmul.f32 %v4699_v32, %v1123_v39  ;;  %v1147_v43 = vmul.f32 %v4699_v32, %v1120_v40  ;;  %v1117_v44 = vsel %vm1069_vm2, %v1045_v31, %v1093_v37  ;;  %v1126_v52 = vsel %vm1078_vm3, %v1054_v33, %v1102_v48 }
 0x107   : > { %v4709_v46 = vadd.f32 %v675_v41, %v4679_v22  ;;  %v1144_v47 = vmul.f32 %v4699_v32, %v1117_v44  ;;  %v1153_v58 = vmul.f32 %v4699_v32, %v1126_v52  ;;  %v1129_v1 = vsel %vm1081_vm5, %v1057_v50, %v1105_v60 }
 0x108   : > { %1180 = vadd.xlane.f32.xlu1 %v1150_v42  ;;  %1174 = vadd.xlane.f32.xlu2 %v1147_v43  ;;  %v713_v55 = vpop.f32.mrf.mxu3  ;;  %v1156_v14 = vmul.f32 %v4699_v32, %v1129_v1  ;;  %v1108_v21 = vmul.f32 0.01, %v1060_v2  ;;  %vm1084_vm8 = vcmp.ge.f32.partialorder %v1060_v2, 0.0  ;;  %v1028_v29 = vrot.slane %v4668_v17, 7 }
 0x109   : > { %1168 = vadd.xlane.f32.xlu0 %v1144_v47  ;;  %v1046_v49 = vadd.f32 %v4689_v28, %v4709_v46  ;;  %v1049_v54 = vadd.f32 %v4681_v24, %v4709_v46  ;;  %v1052_v7 = vadd.f32 %v1031_v23, %v4709_v46  ;;  %v1063_v30 = vadd.f32 %v4736_v19, %v4686_v27 }
 0x10a   : > { %v1132_v31 = vsel %vm1084_vm8, %v1060_v2, %v1108_v21  ;;  %v1055_v34 = vadd.f32 %v4683_v26, %v4709_v46  ;;  %v652_v17 = vperm.slane %v4673_v18, 1  ;;  %v4752_v40 = vperm.slane %v1028_v29, 0 }
 0x10b   : > { %vm1070_vm4 = vcmp.ge.f32.partialorder %v1046_v49, 0.0  ;;  %v1094_v53 = vmul.f32 0.01, %v1046_v49  ;;  %v1097_v63 = vmul.f32 0.01, %v1049_v54  ;;  %vm1073_vm6 = vcmp.ge.f32.partialorder %v1049_v54, 0.0 }
 0x10c   : > { %v1100_v25 = vmul.f32 0.01, %v1052_v7  ;;  %vm1076_vm9 = vcmp.ge.f32.partialorder %v1052_v7, 0.0  ;;  %v1159_v41 = vmul.f32 %v4699_v32, %v1132_v31  ;;  %v731_v43 = vrot.slane %v4743_v35, 2 }
 0x10d   : > { %v1118_v56 = vsel %vm1070_vm4, %v1046_v49, %v1094_v53  ;;  %v1121_v4 = vsel %vm1073_vm6, %v1049_v54, %v1097_v63  ;;  %vm1087_vm11 = vcmp.ge.f32.partialorder %v1063_v30, 0.0  ;;  %v1103_v47 = vmul.f32 0.01, %v1055_v34 }
 0x10e   : > { %v678_v57 = vpop.f32.mrf.mxu2  ;;  %v1145_v59 = vmul.f32 %v4699_v32, %v1118_v56  ;;  %v1148_v15 = vmul.f32 %v4699_v32, %v1121_v4  ;;  %v1124_v33 = vsel %vm1076_vm9, %v1052_v7, %v1100_v25  ;;  %vm1079_vm12 = vcmp.ge.f32.partialorder %v1055_v34, 0.0 }
 0x10f   : > { %v4724_v62 = vadd.f32 %v678_v57, %v4679_v22  ;;  %v1151_v42 = vmul.f32 %v4699_v32, %v1124_v33  ;;  %v1066_v50 = vadd.f32 %v4752_v40, %v4686_v27  ;;  %v739_v51 = vperm.slane %v731_v43, 0 }
 0x110   : > { %1186 = vadd.xlane.f32.xlu1 %v1153_v58  ;;  %1170 = vadd.xlane.f32.xlu2 %v1145_v59  ;;  %v715_v10 = vpop.f32.mrf.mxu3  ;;  %v1127_v52 = vsel %vm1079_vm12, %v1055_v34, %v1103_v47  ;;  %v1058_v53 = vadd.f32 %v4706_v45, %v4709_v46  ;;  %v732_v63 = vrot.slane %v4743_v35, 3  ;;  %vm796_vm4 = vcmask 1042432  }
 0x111   : > { %v1053_v0 = vadd.f32 %v1031_v23, %v4724_v62  ;;  %v1056_v11 = vadd.f32 %v4683_v26, %v4724_v62  ;;  %v1059_v38 = vadd.f32 %v4706_v45, %v4724_v62  ;;  %v4749_v39 = vadd.f32 %v4681_v24, %v4724_v62 }
 0x112   : > { %v1111_v26 = vmul.f32 0.01, %v1063_v30  ;;  %v1062_v56 = vadd.f32 %v4721_v61, %v4724_v62  ;;  %v1154_v58 = vmul.f32 %v4699_v32, %v1127_v52  ;;  %v1114_v59 = vmul.f32 0.01, %v1066_v50 }
 0x113   : > { %vm1077_vm7 = vcmp.ge.f32.partialorder %v1053_v0, 0.0  ;;  %v1101_v6 = vmul.f32 0.01, %v1053_v0  ;;  %v1104_v23 = vmul.f32 0.01, %v1056_v11  ;;  %vm1080_vm10 = vcmp.ge.f32.partialorder %v1056_v11, 0.0 }
 0x114   : > { %v1107_v24 = vmul.f32 0.01, %v1059_v38  ;;  %vm1083_vm13 = vcmp.ge.f32.partialorder %v1059_v38, 0.0  ;;  %v1135_v49 = vsel %vm1087_vm11, %v1063_v30, %v1111_v26  ;;  %vm1090_vm14 = vcmp.ge.f32.partialorder %v1066_v50, 0.0 }
 0x115   : > { %v1125_v12 = vsel %vm1077_vm7, %v1053_v0, %v1101_v6  ;;  %v1128_v36 = vsel %vm1080_vm10, %v1056_v11, %v1104_v23  ;;  %v1162_v57 = vmul.f32 %v4699_v32, %v1135_v49  ;;  %v1106_v0 = vmul.f32 0.01, %v1058_v53 }
 0x116   : > { %v1152_v16 = vmul.f32 %v4699_v32, %v1125_v12  ;;  %v681_v20 = vpop.f32.mrf.mxu2  ;;  %v1155_v44 = vmul.f32 %v4699_v32, %v1128_v36  ;;  %v1131_v54 = vsel %vm1083_vm13, %v1059_v38, %v1107_v24  ;;  %vm1082_vm15 = vcmp.ge.f32.partialorder %v1058_v53, 0.0 }
 0x117   : > { %v1158_v27 = vmul.f32 %v4699_v32, %v1131_v54  ;;  %v1110_v45 = vmul.f32 0.01, %v1062_v56  ;;  %vm1086_vm0 = vcmp.ge.f32.partialorder %v1062_v56, 0.0  ;;  %v1138_v1 = vsel %vm1090_vm14, %v1066_v50, %v1114_v59  ;;  %v4798_v50 = vpop.f32.mrf.mxu1 }
 0x118   : > { %1192 = vadd.xlane.f32.xlu1 %v1156_v14  ;;  %1176 = vadd.xlane.f32.xlu2 %v1148_v15  ;;  %v717_v37 = vpop.f32.mrf.mxu3  ;;  %v740_v3 = vperm.slane %v732_v63, 0  ;;  %v1130_v4 = vsel %vm1082_vm15, %v1058_v53, %v1106_v0  ;;  %v1061_v6 = vadd.f32 %v4721_v61, %v4709_v46  ;;  %v1065_v11 = vadd.f32 %v4736_v19, %v4724_v62  ;;  %v4781_v14 = vld [vmem:[%s6522_s7] ss:$0 sm:$0xff] }
 0x119   : > { %1184 = vadd.xlane.f32.xlu0 %v1152_v16  ;;  %v4760_v48 = vadd.f32 %v717_v37, %v652_v17  ;;  %v1134_v7 = vsel %vm1086_vm0, %v1062_v56, %v1110_v45  ;;  %v1165_v12 = vmul.f32 %v4699_v32, %v1138_v1  ;;  %v1157_v15 = vmul.f32 %v4699_v32, %v1130_v4 }
 0x11a   : > { %v736_v61 = vrot.slane %v4743_v35, 7  ;;  %v1161_v21 = vmul.f32 %v4699_v32, %v1134_v7  ;;  %v1109_v25 = vmul.f32 0.01, %v1061_v6  ;;  %vm1085_vm2 = vcmp.ge.f32.partialorder %v1061_v6, 0.0 }
 0x11b   : > { %v755_v60 = vadd.f32 %v739_v51, %v4760_v48  ;;  %v756_v20 = vadd.f32 %v740_v3, %v4760_v48  ;;  %v1113_v23 = vmul.f32 0.01, %v1065_v11  ;;  %vm1089_vm3 = vcmp.ge.f32.partialorder %v1065_v11, 0.0 }
 0x11c   : > { %v744_v31 = vperm.slane %v736_v61, 0  ;;  %v737_v33 = vperm.slane %v4743_v35, 0  ;;  %v1133_v34 = vsel %vm1085_vm2, %v1061_v6, %v1109_v25  ;;  %v1064_v36 = vadd.f32 %v4736_v19, %v4709_v46 }
 0x11d   : > { %v771_v2 = vmul.f32 0.01, %v755_v60  ;;  %vm763_vm1 = vcmp.ge.f32.partialorder %v755_v60, 0.0  ;;  %v772_v30 = vmul.f32 0.01, %v756_v20  ;;  %vm764_vm5 = vcmp.ge.f32.partialorder %v756_v20, 0.0 }
 0x11e   : > { %v1137_v37 = vsel %vm1089_vm3, %v1065_v11, %v1113_v23  ;;  %v1160_v26 = vmul.f32 %v4699_v32, %v1133_v34  ;;  %v753_v47 = vadd.f32 %v737_v33, %v4760_v48  ;;  %v1112_v49 = vmul.f32 0.01, %v1064_v36 }
 0x11f   : > { %v779_v16 = vsel %vm763_vm1, %v755_v60, %v771_v2  ;;  %v780_v43 = vsel %vm764_vm5, %v756_v20, %v772_v30  ;;  %v1164_v24 = vmul.f32 %v4699_v32, %v1137_v37  ;;  %vm1088_vm6 = vcmp.ge.f32.partialorder %v1064_v36, 0.0 }
 0x120   : > { %1198 = vadd.xlane.f32.xlu1 %v1159_v41  ;;  %1182 = vadd.xlane.f32.xlu2 %v1151_v42  ;;  %v720_v55 = vpop.f32.mrf.mxu3  ;;  %v790_v29 = vmul.f32 %v4781_v14, %v779_v16  ;;  %v1068_v41 = vadd.f32 %v4752_v40, %v4724_v62  ;;  %v1067_v51 = vadd.f32 %v4752_v40, %v4709_v46  ;;  %v730_v53 = vrot.slane %v4743_v35, 1 }
 0x121   : > { %1190 = vadd.xlane.f32.xlu0 %v1155_v44  ;;  %v760_v44 = vadd.f32 %v744_v31, %v4760_v48  ;;  %v791_v52 = vmul.f32 %v4781_v14, %v780_v43  ;;  %v769_v55 = vmul.f32 0.01, %v753_v47  ;;  %v1136_v56 = vsel %vm1088_vm6, %v1064_v36, %v1112_v49 }
 0x122   : > { %v803_v42 = vsel %vm796_vm4, %v790_v29, 0.0  ;;  %v1116_v19 = vmul.f32 0.01, %v1068_v41  ;;  %vm1092_vm7 = vcmp.ge.f32.partialorder %v1068_v41, 0.0  ;;  %vm761_vm9 = vcmp.ge.f32.partialorder %v753_v47, 0.0 }
 0x123   : > { %v776_v54 = vmul.f32 0.01, %v760_v44  ;;  %vm768_vm8 = vcmp.ge.f32.partialorder %v760_v44, 0.0  ;;  %v1115_v60 = vmul.f32 0.01, %v1067_v51  ;;  %v806_v63 = vsel %vm796_vm4, %v791_v52, 0.0 }
 0x124   : > { %vm1091_vm10 = vcmp.ge.f32.partialorder %v1067_v51, 0.0  ;;  %v738_v40 = vperm.slane %v730_v53, 0  ;;  %v777_v45 = vsel %vm761_vm9, %v753_v47, %v769_v55  ;;  %v2249_v1 = vrot.slane %v4798_v50, 3 }
 0x125   : > { %v784_v0 = vsel %vm768_vm8, %v760_v44, %v776_v54  ;;  %v1139_v4 = vsel %vm1091_vm10, %v1067_v51, %v1115_v60  ;;  %v735_v7 = vrot.slane %v4743_v35, 6  ;;  %v2252_v29 = vrot.slane %v4798_v50, 6 }
 0x126   : > { %v795_v18 = vmul.f32 %v4781_v14, %v784_v0  ;;  %v754_v6 = vadd.f32 %v738_v40, %v4760_v48  ;;  %v2257_v11 = vperm.slane %v2249_v1, 0  ;;  %v2248_v31 = vrot.slane %v4798_v50, 2 }
 0x127   : > { %v2260_v37 = vperm.slane %v2252_v29, 0  ;;  %v2251_v52 = vrot.slane %v4798_v50, 5  ;;  %vm1074_vm0 = vcmp.ge.f32.partialorder %v4749_v39, 0.0  ;;  %v734_v55 = vrot.slane %v4743_v35, 5 }
 0x128   : > { %1204 = vadd.xlane.f32.xlu1 %v1162_v57  ;;  %1188 = vadd.xlane.f32.xlu2 %v1154_v58  ;;  %v722_v10 = vpop.f32.mrf.mxu3  ;;  %v2254_v57 = vperm.slane %v4798_v50, 0  ;;  %v1140_v58 = vsel %vm1092_vm7, %v1068_v41, %v1116_v19  ;;  %v818_v16 = vsel %vm796_vm4, %v795_v18, 0.0  ;;  %v770_v61 = vmul.f32 0.01, %v754_v6 }
 0x129   : > { %1196 = vadd.xlane.f32.xlu0 %v1158_v27  ;;  %v1163_v27 = vmul.f32 %v4699_v32, %v1136_v56  ;;  %v1167_v2 = vmul.f32 %v4699_v32, %v1140_v58  ;;  %vm762_vm12 = vcmp.ge.f32.partialorder %v754_v6, 0.0  ;;  %v2256_v41 = vperm.slane %v2248_v31, 0 }
 0x12a   : > { %v778_v33 = vsel %vm762_vm12, %v754_v6, %v770_v61  ;;  %v1098_v19 = vmul.f32 0.01, %v4749_v39  ;;  %v742_v0 = vperm.slane %v734_v55, 0 }
 0x130   : > { %1210 = vadd.xlane.f32.xlu1 %v1165_v12  ;;  %1194 = vadd.xlane.f32.xlu2 %v1157_v15  ;;  %v724_v38 = vpop.f32.mrf.mxu3  ;;  %v1047_v12 = vadd.f32 %v4689_v28, %v4724_v62  ;;  %v1166_v15 = vmul.f32 %v4699_v32, %v1139_v4  ;;  %v733_v28 = vrot.slane %v4743_v35, 4 }
 0x131   : > { %1202 = vadd.xlane.f32.xlu0 %v1161_v21  ;;  %v743_v21 = vperm.slane %v735_v7, 0 }
 0x132   : > { %v1095_v30 = vmul.f32 0.01, %v1047_v12  ;;  %vm1071_vm13 = vcmp.ge.f32.partialorder %v1047_v12, 0.0 }
 0x133   : > { %v759_v34 = vadd.f32 %v743_v21, %v4760_v48  ;;  %v6535_v21 = vmov 0  }
 0x134   : > { %v1119_v38 = vsel %vm1071_vm13, %v1047_v12, %v1095_v30  ;;  %4010 = vset.pattern.permute.xlu0 %v6535_v21  ;;  %4009 = vset.pattern.permute.xlu2 %v6535_v21 }
 0x135   : > { %v775_v44 = vmul.f32 0.01, %v759_v34  ;;  %v1146_v47 = vmul.f32 %v4699_v32, %v1119_v38  ;;  %vm767_vm15 = vcmp.ge.f32.partialorder %v759_v34, 0.0  ;;  %4011 = vset.pattern.permute.xlu1 %v6535_v21 }
 0x138   : > { %1200 = vadd.xlane.f32.xlu2 %v1160_v26  ;;  %804 = vadd.xlane.f32.xlu1 %v803_v42  ;;  %v726_v59 = vpop.f32.mrf.mxu3  ;;  %v789_v42 = vmul.f32 %v4781_v14, %v778_v33  ;;  %v741_v26 = vperm.slane %v733_v28, 0 }
 0x139   : > { %1208 = vadd.xlane.f32.xlu0 %v1164_v24  ;;  %v4808_v46 = vadd.f32 %v726_v59, %v652_v17  ;;  %v788_v17 = vmul.f32 %v4781_v14, %v777_v45  ;;  %v1122_v59 = vsel %vm1074_vm0, %v4749_v39, %v1098_v19  ;;  %v4871_v19 = vpop.permute.xlu1 %1223 }
 0x13a   : > { %v800_v53 = vsel %vm796_vm4, %v789_v42, 0.0  ;;  %v757_v54 = vadd.f32 %v741_v26, %v4760_v48  ;;  %v1149_v35 = vmul.f32 %v4699_v32, %v1122_v59 }
 0x13b   : > { %v2270_v3 = vadd.f32 %v2254_v57, %v4808_v46  ;;  %v797_v20 = vsel %vm796_vm4, %v788_v17, 0.0  ;;  %v2273_v23 = vadd.f32 %v2257_v11, %v4808_v46  ;;  %v2276_v49 = vadd.f32 %v2260_v37, %v4808_v46 }
 0x13c   : > { %v2272_v51 = vadd.f32 %v2256_v41, %v4808_v46  ;;  %v783_v57 = vsel %vm767_vm15, %v759_v34, %v775_v44  ;;  %vm765_vm3 = vcmp.ge.f32.partialorder %v757_v54, 0.0  ;;  %v758_v17 = vadd.f32 %v742_v0, %v4760_v48 }
 0x13d   : > { %v2286_v10 = vmul.f32 0.01, %v2270_v3  ;;  %vm2278_vm11 = vcmp.ge.f32.partialorder %v2270_v3, 0.0  ;;  %v2289_v36 = vmul.f32 0.01, %v2273_v23  ;;  %vm2281_vm14 = vcmp.ge.f32.partialorder %v2273_v23, 0.0 }
 0x13e   : > { %v2292_v58 = vmul.f32 0.01, %v2276_v49  ;;  %vm2284_vm1 = vcmp.ge.f32.partialorder %v2276_v49, 0.0  ;;  %v2288_v60 = vmul.f32 0.01, %v2272_v51  ;;  %v794_v40 = vmul.f32 %v4781_v14, %v783_v57 }
 0x13f   : > { %v2294_v25 = vsel %vm2278_vm11, %v2270_v3, %v2286_v10  ;;  %v2297_v24 = vsel %vm2281_vm14, %v2273_v23, %v2289_v36  ;;  %vm2280_vm2 = vcmp.ge.f32.partialorder %v2272_v51, 0.0  ;;  %vm766_vm6 = vcmp.ge.f32.partialorder %v758_v17, 0.0 }
 0x140   : > { %1206 = vadd.xlane.f32.xlu2 %v1163_v27  ;;  %807 = vadd.xlane.f32.xlu1 %v806_v63  ;;  %v2302_v62 = vmul.f32 %v4781_v14, %v2294_v25  ;;  %v2305_v56 = vmul.f32 %v4781_v14, %v2297_v24  ;;  %v2259_v63 = vperm.slane %v2251_v52, 0  ;;  %v773_v27 = vmul.f32 0.01, %v757_v54 }
 0x141   : > { %1214 = vadd.xlane.f32.xlu0 %v1167_v2  ;;  %v2300_v1 = vsel %vm2284_vm1, %v2276_v49, %v2292_v58  ;;  %v2247_v2 = vrot.slane %v4798_v50, 1  ;;  %v2296_v3 = vsel %vm2280_vm2, %v2272_v51, %v2288_v60  ;;  %v815_v39 = vsel %vm796_vm4, %v794_v40, 0.0 }
 0x142   : > { %v2310_v43 = vsel %vm796_vm4, %v2302_v62, 0.0  ;;  %v2319_v45 = vsel %vm796_vm4, %v2305_v56, 0.0  ;;  %v2275_v4 = vadd.f32 %v2259_v63, %v4808_v46  ;;  %v781_v18 = vsel %vm765_vm3, %v757_v54, %v773_v27  ;;  %v4887_v27 = vpop.f32.mrf.mxu0 }
 0x143   : > { %v2308_v6 = vmul.f32 %v4781_v14, %v2300_v1  ;;  %v2304_v7 = vmul.f32 %v4781_v14, %v2296_v3  ;;  %v2255_v10 = vperm.slane %v2247_v2, 0  ;;  %v792_v11 = vmul.f32 %v4781_v14, %v781_v18 }
 0x144   : > { %v2291_v12 = vmul.f32 0.01, %v2275_v4  ;;  %vm2283_vm5 = vcmp.ge.f32.partialorder %v2275_v4, 0.0  ;;  %v2250_v48 = vrot.slane %v4798_v50, 4  ;;  %v2253_v37 = vrot.slane %v4798_v50, 7 }
 0x145   : > { %v2271_v61 = vadd.f32 %v2255_v10, %v4808_v46  ;;  %v809_v25 = vsel %vm796_vm4, %v792_v11, 0.0  ;;  %v2527_v1 = vrot.slane %v4887_v27, 2  ;;  %v2529_v10 = vrot.slane %v4887_v27, 4 }
 0x146   : > { %v2299_v23 = vsel %vm2283_vm5, %v2275_v4, %v2291_v12  ;;  %v2258_v28 = vperm.slane %v2250_v48, 0  ;;  %v2261_v26 = vperm.slane %v2253_v37, 0 }
 0x147   : > { %v2307_v30 = vmul.f32 %v4781_v14, %v2299_v23  ;;  %v2287_v31 = vmul.f32 0.01, %v2271_v61  ;;  %vm2279_vm7 = vcmp.ge.f32.partialorder %v2271_v61, 0.0  ;;  %v2535_v2 = vperm.slane %v2527_v1, 0 }
 0x148   : > { %1212 = vadd.xlane.f32.xlu2 %v1166_v15  ;;  %819 = vadd.xlane.f32.xlu1 %v818_v16  ;;  %v774_v15 = vmul.f32 0.01, %v758_v17  ;;  %v2328_v16 = vsel %vm796_vm4, %v2308_v6, 0.0  ;;  %v2274_v36 = vadd.f32 %v2258_v28, %v4808_v46  ;;  %v2277_v49 = vadd.f32 %v2261_v26, %v4808_v46 }
 0x149   : > { %798 = vadd.xlane.f32.xlu0 %v797_v20  ;;  %v2316_v20 = vsel %vm796_vm4, %v2304_v7, 0.0  ;;  %v2325_v33 = vsel %vm796_vm4, %v2307_v30, 0.0  ;;  %v2295_v34 = vsel %vm2279_vm7, %v2271_v61, %v2287_v31  ;;  %v2528_v7 = vrot.slane %v4887_v27, 3 }
 0x14a   : > { %v782_v29 = vsel %vm766_vm6, %v758_v17, %v774_v15  ;;  %v2303_v41 = vmul.f32 %v4781_v14, %v2295_v34  ;;  %v2290_v42 = vmul.f32 0.01, %v2274_v36  ;;  %vm2282_vm8 = vcmp.ge.f32.partialorder %v2274_v36, 0.0 }
 0x14b   : > { %v793_v62 = vmul.f32 %v4781_v14, %v782_v29  ;;  %v2293_v51 = vmul.f32 0.01, %v2277_v49  ;;  %vm2285_vm9 = vcmp.ge.f32.partialorder %v2277_v49, 0.0  ;;  %v2536_v15 = vperm.slane %v2528_v7, 0 }
 0x14c   : > { %v2313_v44 = vsel %vm796_vm4, %v2303_v41, 0.0  ;;  %v2298_v24 = vsel %vm2282_vm8, %v2274_v36, %v2290_v42  ;;  %vm881_vm7 = vcmask 1041409   ;;  %vm883_vm8 = vcmask 1042434  }
 0x14d   : > { %v812_v38 = vsel %vm796_vm4, %v793_v62, 0.0  ;;  %v2306_v50 = vmul.f32 %v4781_v14, %v2298_v24  ;;  %v2301_v55 = vsel %vm2285_vm9, %v2277_v49, %v2293_v51  ;;  %vm885_vm9 = vcmask 1043459  }
 0x14e   : > { %v2309_v57 = vmul.f32 %v4781_v14, %v2301_v55 }
 0x14f   : > { %v2322_v54 = vsel %vm796_vm4, %v2306_v50, 0.0 }
 0x150   : > { %1172 = vadd.xlane.f32.xlu2 %v1146_v47  ;;  %2311 = vadd.xlane.f32.xlu1 %v2310_v43  ;;  %v4867_v43 = vpop.permute.xlu2 %828  ;;  %v683_v47 = vpop.f32.mrf.mxu2  ;;  %v2331_v63 = vsel %vm796_vm4, %v2309_v57, 0.0 }
 0x151   : > { %801 = vadd.xlane.f32.xlu0 %v800_v53  ;;  %v4876_v53 = vpop.permute.xlu0 %1235 }
 0x158   : > { %1178 = vadd.xlane.f32.xlu2 %v1149_v35  ;;  %2320 = vadd.xlane.f32.xlu1 %v2319_v45  ;;  %v4874_v52 = vpop.permute.xlu2 %1229  ;;  %v686_v56 = vpop.f32.mrf.mxu2 }
 0x159   : > { %816 = vadd.xlane.f32.xlu0 %v815_v39  ;;  %v4880_v59 = vpop.permute.xlu0 %2342  ;;  %v4894_v14 = vadd.f32 %v686_v56, %v4679_v22  ;;  %v4899_v39 = vadd.f32 %v683_v47, %v4679_v22 }
 0x15b   : > { %v2556_v4 = vadd.f32 %v2535_v2, %v4894_v14  ;;  %6627 = vst [vmem:[#allocation24_spill] sm:$0xff] %v4899_v39  ;;  %v2559_v61 = vadd.f32 %v2536_v15, %v4894_v14  ;;  %v4914_v48 = vadd.f32 %v2535_v2, %v4899_v39 }
 0x15d   : > { %vm2580_vm10 = vcmp.ge.f32.partialorder %v2556_v4, 0.0  ;;  %v2604_v6 = vmul.f32 0.01, %v2556_v4  ;;  %vm2583_vm11 = vcmp.ge.f32.partialorder %v2559_v61, 0.0  ;;  %v2607_v29 = vmul.f32 0.01, %v2559_v61 }
 0x15e   : > { %vm2579_vm6 = vcmp.ge.f32.partialorder %v4914_v48, 0.0 }
 0x15f   : > { %v2628_v12 = vsel %vm2580_vm10, %v2556_v4, %v2604_v6  ;;  %v2631_v28 = vsel %vm2583_vm11, %v2559_v61, %v2607_v29  ;;  %vm887_vm11 = vcmask 1044484  }
 0x160   : > { %810 = vadd.xlane.f32.xlu2 %v809_v25  ;;  %2329 = vadd.xlane.f32.xlu1 %v2328_v16  ;;  %v689_v40 = vpop.f32.mrf.mxu2  ;;  %v2652_v16 = vmul.f32 %v4699_v32, %v2628_v12  ;;  %v4917_v25 = vadd.f32 %v2536_v15, %v4899_v39 }
 0x161   : > { %2317 = vadd.xlane.f32.xlu0 %v2316_v20  ;;  %v4910_v20 = vperm.slane %v2529_v10, 0  ;;  %v4932_v36 = vadd.f32 %v689_v40, %v4679_v22 }
 0x162   : > { %vm2582_vm10 = vcmp.ge.f32.partialorder %v4917_v25, 0.0 }
 0x163   : > { %v4921_v23 = vadd.f32 %v4910_v20, %v4899_v39  ;;  %6628 = vst [vmem:[#allocation25_spill] sm:$0xff] %v4932_v36  ;;  %v4942_v41 = vadd.f32 %v2536_v15, %v4932_v36  ;;  %v4956_v24 = vadd.f32 %v4910_v20, %v4894_v14 }
 0x165   : > { %vm2584_vm14 = vcmp.ge.f32.partialorder %v4942_v41, 0.0 }
 0x168   : > { %813 = vadd.xlane.f32.xlu2 %v812_v38  ;;  %v692_v3 = vpop.f32.mrf.mxu2  ;;  %2683 = vadd.xlane.f32.xlu1 %v2652_v16  ;;  %v4939_v38 = vadd.f32 %v2535_v2, %v4932_v36 }
 0x169   : > { %2326 = vadd.xlane.f32.xlu0 %v2325_v33  ;;  %v2655_v33 = vmul.f32 %v4699_v32, %v2631_v28 }
 0x16a   : > { %vm2581_vm13 = vcmp.ge.f32.partialorder %v4939_v38, 0.0 }
 0x170   : > { %2314 = vadd.xlane.f32.xlu2 %v2313_v44  ;;  %2689 = vadd.xlane.f32.xlu1 %v2655_v33 }
 0x178   : > { %2323 = vadd.xlane.f32.xlu2 %v2322_v54  ;;  %v2532_v54 = vrot.slane %v4887_v27, 7 }
 0x17a   : > { %v4966_v56 = vperm.slane %v2532_v54, 0 }
 0x17b   : > { %v1181_v58 = vpop.xlane.xlu1 %1180  ;;  %v1175_v46 = vpop.xlane.xlu2 %1174 }
 0x17c   : > { %v4883_v60 = vadd.f32 %v4871_v19, %v1181_v58  ;;  %v4891_v35 = vpop.xlane.xlu0 %1168  ;;  %v4935_v37 = vadd.f32 %v4871_v19, %v1175_v46  ;;  %6629 = vst [vmem:[#allocation26_spill] sm:$0xff] %v4966_v56  ;;  %v4970_v58 = vadd.f32 %v4966_v56, %v4932_v36 }
 0x17e   : > { %1307 = vperm.xlu0 %4010, %v4883_v60   ;;  %6630 = vst [vmem:[#allocation27_spill] sm:$0xff] %v4970_v58 }
 0x180   : > { %2332 = vadd.xlane.f32.xlu2 %v2331_v63 }
 0x183   : > { %v4889_v0 = vpop.xlane.xlu1 %1186  ;;  %v1171_v45 = vpop.xlane.xlu2 %1170 }
 0x184   : > { %v4951_v47 = vadd.f32 %v4874_v52, %v1171_v45  ;;  %v5087_v58 = vadd.f32 %v4871_v19, %v4889_v0 }
 0x18b   : > { %v4901_v18 = vpop.xlane.xlu1 %1192  ;;  %v4903_v17 = vpop.xlane.xlu2 %1176 }
 0x18c   : > { %v4907_v11 = vpop.xlane.xlu0 %1184 }
 0x193   : > { %v4923_v30 = vpop.xlane.xlu1 %1198  ;;  %v4925_v31 = vpop.xlane.xlu2 %1182 }
 0x194   : > { %v1191_v62 = vpop.xlane.xlu0 %1190 }
 0x195   : > { %v4929_v34 = vadd.f32 %v4876_v53, %v1191_v62 }
 0x197   : > { %1322 = vperm.xlu0 %4010, %v4929_v34  }
 0x198   : > { %1298 = vperm.xlu2 %4009, %v4935_v37  }
 0x19b   : > { %v4945_v42 = vpop.xlane.xlu1 %1204  ;;  %v1189_v26 = vpop.xlane.xlu2 %1188 }
 0x19c   : > { %v1197_v44 = vpop.xlane.xlu0 %1196  ;;  %v4963_v55 = vadd.f32 %v4874_v52, %v1189_v26 }
 0x19d   : > { %v4948_v22 = vadd.f32 %v4876_v53, %v1197_v44 }
 0x19f   : > { %1331 = vperm.xlu0 %4010, %v4948_v22  }
 0x1a0   : > { %1292 = vperm.xlu2 %4009, %v4951_v47  }
 0x1a3   : > { %v1195_v49 = vpop.xlane.xlu2 %1194  ;;  %v4959_v50 = vpop.xlane.xlu1 %1210 }
 0x1a4   : > { %v1203_v51 = vpop.xlane.xlu0 %1202  ;;  %v4973_v63 = vadd.f32 %v4874_v52, %v1195_v49 }
 0x1a5   : > { %v5001_v33 = vadd.f32 %v4876_v53, %v1203_v51  ;;  %v5018_v51 = vadd.f32 %v4876_v53, %v4907_v11 }
 0x1a8   : > { %1319 = vperm.xlu2 %4009, %v4963_v55  }
 0x1ab   : > { %v1201_v57 = vpop.xlane.xlu2 %1200  ;;  %v805_v40 = vpop.xlane.xlu1 %804 }
 0x1ac   : > { %v1209_v46 = vpop.xlane.xlu0 %1208  ;;  %v4977_v2 = vadd.f32 %v4874_v52, %v1201_v57 }
 0x1ad   : > { %v5014_v57 = vadd.f32 %v4876_v53, %v1209_v46  ;;  %v5030_v46 = vadd.f32 %v4867_v43, %v805_v40 }
 0x1af   : > { %6637 = vst [vmem:[#allocation34_spill] sm:$0xff] %v5030_v46 }
 0x1b0   : > { %1328 = vperm.xlu2 %4009, %v4973_v63  }
 0x1b3   : > { %v1207_v45 = vpop.xlane.xlu2 %1206  ;;  %v808_v3 = vpop.xlane.xlu1 %807 }
 0x1b4   : > { %v1215_v1 = vpop.xlane.xlu0 %1214  ;;  %v4984_v10 = vadd.f32 %v4874_v52, %v1207_v45 }
 0x1b8   : > { %1337 = vperm.xlu2 %4009, %v4977_v2  }
 0x1bb   : > { %v1213_v4 = vpop.xlane.xlu2 %1212  ;;  %v820_v12 = vpop.xlane.xlu1 %819 }
 0x1bc   : > { %v799_v6 = vpop.xlane.xlu0 %798  ;;  %v4989_v61 = vadd.f32 %v4867_v43, %v820_v12  ;;  %v4995_v28 = vadd.f32 %v4874_v52, %v1213_v4 }
 0x1bd   : > { %v4981_v7 = vadd.f32 %v4867_v43, %v799_v6 }
 0x1be   : > { %6632 = vst [vmem:[#allocation29_spill] sm:$0xff] %v4989_v61 }
 0x1bf   : > { %6631 = vst [vmem:[#allocation28_spill] sm:$0xff] %v4981_v7  ;;  %848 = vperm.xlu0 %4010, %v4981_v7  }
 0x1c0   : > { %1346 = vperm.xlu2 %4009, %v4984_v10   ;;  %6634 = vst [vmem:[#allocation31_spill] sm:$0xff] %v4995_v28 }
 0x1c3   : > { %v1173_v15 = vpop.xlane.xlu2 %1172  ;;  %v5003_v26 = vpop.xlane.xlu1 %2311 }
 0x1c4   : > { %v802_v16 = vpop.xlane.xlu0 %801  ;;  %v5051_v21 = vadd.f32 %v4876_v53, %v1173_v15  ;;  %v5075_v15 = vadd.f32 %v4874_v52, %v4925_v31 }
 0x1c5   : > { %v4992_v29 = vadd.f32 %v4867_v43, %v802_v16  ;;  %v5027_v16 = vadd.f32 %v4876_v53, %v1215_v1  ;;  %v5043_v1 = vadd.f32 %v4867_v43, %v808_v3 }
 0x1c7   : > { %6633 = vst [vmem:[#allocation30_spill] sm:$0xff] %v4992_v29  ;;  %869 = vperm.xlu0 %4010, %v4989_v61   ;;  %851 = vperm.xlu1 %4011, %v4992_v29  }
 0x1c8   : > { %1355 = vperm.xlu2 %4009, %v4995_v28   ;;  %6639 = vst [vmem:[#allocation36_spill] sm:$0xff] %v5043_v1 }
 0x1cb   : > { %v1179_v62 = vpop.xlane.xlu2 %1178  ;;  %v2321_v45 = vpop.xlane.xlu1 %2320 }
 0x1cc   : > { %v5006_v44 = vadd.f32 %v4876_v53, %v1179_v62  ;;  %v817_v4 = vpop.xlane.xlu0 %816 }
 0x1cd   : > { %v5024_v12 = vadd.f32 %v4867_v43, %v817_v4 }
 0x1cf   : > { %1340 = vperm.xlu0 %4010, %v5001_v33   ;;  %6636 = vst [vmem:[#allocation33_spill] sm:$0xff] %v5024_v12 }
 0x1d0   : > { %1304 = vperm.xlu2 %4009, %v5006_v44  }
 0x1d3   : > { %v811_v49 = vpop.xlane.xlu2 %810  ;;  %v2330_v11 = vpop.xlane.xlu1 %2329 }
 0x1d4   : > { %v5011_v54 = vadd.f32 %v4867_v43, %v811_v49  ;;  %v5037_v49 = vadd.f32 %v4871_v19, %v4891_v35  ;;  %v5040_v4 = vadd.f32 %v4880_v59, %v2330_v11  ;;  %v5062_v11 = vadd.f32 %v4874_v52, %v4903_v17  ;;  %v5069_v53 = vpop.xlane.xlu0 %2317 }
 0x1d5   : > { %v2533_v17 = vperm.slane %v4887_v27, 0 }
 0x1d6   : > { %6635 = vst [vmem:[#allocation32_spill] sm:$0xff] %v5011_v54  ;;  %860 = vperm.xlu1 %4011, %v5011_v54  }
 0x1d7   : > { %1349 = vperm.xlu0 %4010, %v5014_v57   ;;  %6638 = vst [vmem:[#allocation35_spill] sm:$0xff] %v5040_v4 }
 0x1d8   : > { %1313 = vperm.xlu2 %4009, %v5018_v51  }
 0x1db   : > { %v814_v6 = vpop.xlane.xlu2 %813 }
 0x1dc   : > { %v5054_v35 = vadd.f32 %v4867_v43, %v814_v6  ;;  %v5078_v6 = vadd.f32 %v4880_v59, %v2321_v45 }
 0x1de   : > { %866 = vperm.xlu1 %4011, %v5024_v12   ;;  %6640 = vst [vmem:[#allocation37_spill] sm:$0xff] %v5054_v35 }
 0x1df   : > { %1358 = vperm.xlu0 %4010, %v5027_v16   ;;  %6642 = vst [vmem:[#allocation39_spill] sm:$0xff] %v5078_v6 }
 0x1e0   : > { %854 = vperm.xlu2 %4009, %v5030_v46  }
 0x1e3   : > { %v2315_v62 = vpop.xlane.xlu2 %2314 }
 0x1e4   : > { %v5065_v5 = vadd.f32 %v4880_v59, %v2315_v62  ;;  %v2327_v62 = vpop.xlane.xlu0 %2326 }
 0x1e5   : > { %v5091_v52 = vadd.f32 %v4880_v59, %v2327_v62  ;;  %v2605_v62 = vmul.f32 0.01, %v4939_v38 }
 0x1e6   : > { %1289 = vperm.xlu1 %4011, %v5037_v49   ;;  %6641 = vst [vmem:[#allocation38_spill] sm:$0xff] %v5065_v5 }
 0x1e7   : > { %2380 = vperm.xlu0 %4010, %v5040_v4   ;;  %6643 = vst [vmem:[#allocation40_spill] sm:$0xff] %v5091_v52 }
 0x1e8   : > { %857 = vperm.xlu2 %4009, %v5043_v1   ;;  %v2549_v1 = vadd.f32 %v2533_v17, %v4899_v39 }
 0x1ea   : > { %vm2573_vm0 = vcmp.ge.f32.partialorder %v2549_v1, 0.0 }
 0x1eb   : > { %v5048_v40 = vpop.xlane.xlu2 %2323 }
 0x1ee   : > { %1295 = vperm.xlu1 %4011, %v5051_v21  }
 0x1f0   : > { %863 = vperm.xlu2 %4009, %v5054_v35   ;;  %v2629_v35 = vsel %vm2581_vm13, %v4939_v38, %v2605_v62  ;;  %v2563_v38 = vadd.f32 %v4910_v20, %v4932_v36  ;;  %vm891_vm13 = vcmask 1046534  }
 0x1f2   : > { %vm2587_vm15 = vcmp.ge.f32.partialorder %v2563_v38, 0.0 }
 0x1f3   : > { %v5058_v3 = vpop.xlane.xlu2 %2332 }
 0x1f6   : > { %1301 = vperm.xlu1 %4011, %v5062_v11  }
 0x1f8   : > { %2365 = vperm.xlu2 %4009, %v5065_v5   ;;  %v2550_v5 = vadd.f32 %v2533_v17, %v4894_v14 }
 0x1fa   : > { %v2598_v31 = vmul.f32 0.01, %v2550_v5  ;;  %vm2574_vm12 = vcmp.ge.f32.partialorder %v2550_v5, 0.0 }
 0x1fb   : > { %v5071_v43 = vpop.permute.xlu2 %1298 }
 0x1fc   : > { %v2622_v13 = vsel %vm2574_vm12, %v2550_v5, %v2598_v31  ;;  %v2653_v5 = vmul.f32 %v4699_v32, %v2629_v35  ;;  %v5120_v31 = vadd.f32 %v4871_v19, %v4945_v42  ;;  %vm889_vm12 = vcmask 1045509  }
 0x1fd   : > { %v2646_v0 = vmul.f32 %v4699_v32, %v2622_v13 }
 0x1fe   : > { %1310 = vperm.xlu1 %4011, %v5075_v15  }
 0x200   : > { %2371 = vperm.xlu2 %4009, %v5078_v6   ;;  %v5099_v6 = vadd.f32 %v4871_v19, %v4901_v18  ;;  %v2608_v18 = vmul.f32 0.01, %v4942_v41 }
 0x203   : > { %v5083_v4 = vpop.permute.xlu2 %1292 }
 0x206   : > { %1316 = vperm.xlu1 %4011, %v5087_v58  }
 0x208   : > { %2377 = vperm.xlu2 %4009, %v5091_v52   ;;  %v5109_v52 = vadd.f32 %v4871_v19, %v4923_v30  ;;  %v2632_v30 = vsel %vm2584_vm14, %v4942_v41, %v2608_v18  ;;  %v2597_v41 = vmul.f32 0.01, %v2549_v1  ;;  %vm893_vm14 = vcmask 1047559  }
 0x209   : > { %v2656_v35 = vmul.f32 %v4699_v32, %v2632_v30  ;;  %v5140_v30 = vadd.f32 %v4880_v59, %v5003_v26  ;;  %v5152_v26 = vadd.f32 %v4880_v59, %v5069_v53 }
 0x20b   : > { %v5095_v45 = vpop.permute.xlu2 %1319  ;;  %6644 = vst [vmem:[#allocation41_spill] sm:$0xff] %v5140_v30 }
 0x20c   : > { %6646 = vst [vmem:[#allocation43_spill] sm:$0xff] %v5152_v26 }
 0x20e   : > { %1325 = vperm.xlu1 %4011, %v5099_v6  }
 0x211   : > { %2671 = vadd.xlane.f32.xlu0 %v2646_v0  ;;  %v2611_v0 = vmul.f32 0.01, %v2563_v38 }
 0x213   : > { %v5105_v61 = vpop.permute.xlu2 %1328  ;;  %v2635_v42 = vsel %vm2587_vm15, %v2563_v38, %v2611_v0  ;;  %v5144_v38 = vpop.xlane.xlu1 %2683  ;;  %vm896_vm15 = vcmask 23552  }
 0x214   : > { %v2659_v20 = vmul.f32 %v4699_v32, %v2635_v42  ;;  %6645 = vst [vmem:[#allocation42_spill] sm:$0xff] %v5144_v38 }
 0x216   : > { %1334 = vperm.xlu1 %4011, %v5109_v52  }
 0x219   : > { %2685 = vadd.xlane.f32.xlu0 %v2653_v5  ;;  %v5131_v5 = vadd.f32 %v4871_v19, %v4959_v50  ;;  %v2551_v19 = vadd.f32 %v2533_v17, %v4932_v36  ;;  %v2526_v50 = vrot.slane %v4887_v27, 1 }
 0x21b   : > { %v5116_v13 = vpop.permute.xlu2 %1337  ;;  %v2599_v42 = vmul.f32 0.01, %v2551_v19  ;;  %vm2575_vm1 = vcmp.ge.f32.partialorder %v2551_v19, 0.0 }
 0x21e   : > { %1343 = vperm.xlu1 %4011, %v5120_v31  }
 0x221   : > { %2691 = vadd.xlane.f32.xlu0 %v2656_v35  ;;  %v2621_v35 = vsel %vm2573_vm0, %v2549_v1, %v2597_v41  ;;  %v2623_v1 = vsel %vm2575_vm1, %v2551_v19, %v2599_v42  ;;  %v5159_v41 = vld [vmem:[%s6523_s8] ss:$0 sm:$0xff]  ;;  %v5170_v19 = vadd.f32 %v4880_v59, %v5048_v40  ;;  %vm1363_vm0 = vcmask 130112  }
 0x222   : > { %v2645_v0 = vmul.f32 %v4699_v32, %v2621_v35  ;;  %v2647_v32 = vmul.f32 %v5159_v41, %v2623_v1  ;;  %v5162_v35 = vpop.xlane.xlu1 %2689  ;;  %vm1367_vm1 = vcmask 195712  }
 0x223   : > { %v5127_v62 = vpop.permute.xlu2 %1346  ;;  %6647 = vst [vmem:[#allocation44_spill] sm:$0xff] %v5162_v35 }
 0x224   : > { %6648 = vst [vmem:[#allocation45_spill] sm:$0xff] %v5170_v19 }
 0x226   : > { %1352 = vperm.xlu1 %4011, %v5131_v5  }
 0x229   : > { %2697 = vadd.xlane.f32.xlu0 %v2659_v20  ;;  %v2534_v20 = vperm.slane %v2526_v50, 0 }
 0x22b   : > { %v5136_v18 = vpop.permute.xlu2 %1355  ;;  %v2552_v17 = vadd.f32 %v2534_v20, %v4899_v39  ;;  %v2553_v38 = vadd.f32 %v2534_v20, %v4894_v14 }
 0x22d   : > { %v2600_v50 = vmul.f32 0.01, %v2552_v17  ;;  %vm2576_vm2 = vcmp.ge.f32.partialorder %v2552_v17, 0.0  ;;  %v2601_v35 = vmul.f32 0.01, %v2553_v38  ;;  %vm2577_vm3 = vcmp.ge.f32.partialorder %v2553_v38, 0.0 }
 0x22e   : > { %2362 = vperm.xlu1 %4011, %v5140_v30   ;;  %v5179_v30 = vadd.f32 %v4880_v59, %v5058_v3  ;;  %v2603_v3 = vmul.f32 0.01, %v4914_v48 }
 0x22f   : > { %v2624_v42 = vsel %vm2576_vm2, %v2552_v17, %v2600_v50  ;;  %v2625_v40 = vsel %vm2577_vm3, %v2553_v38, %v2601_v35  ;;  %v2554_v17 = vadd.f32 %v2534_v20, %v4932_v36  ;;  %v6650_v38 = vlaneseq }
 0x230   : > { %v2648_v1 = vmul.f32 %v5159_v41, %v2624_v42  ;;  %6649 = vst [vmem:[#allocation46_spill] sm:$0xff] %v5179_v30  ;;  %v2649_v50 = vmul.f32 %v5159_v41, %v2625_v40  ;;  %v2627_v40 = vsel %vm2579_vm6, %v4914_v48, %v2603_v3  ;;  %vm1412_vm2 = vcmask 195584  }
 0x231   : > { %2669 = vadd.xlane.f32.xlu2 %v2645_v0  ;;  %v5164_v0 = vpop.permute.xlu0 %1307  ;;  %v2602_v42 = vmul.f32 0.01, %v2554_v17  ;;  %vm2578_vm5 = vcmp.ge.f32.partialorder %v2554_v17, 0.0  ;;  %v5190_v20 = vand.u32 127, %v6650_v38  ;;  %v2606_v38 = vmul.f32 0.01, %v4917_v25 }
 0x232   : > { %vm2586_vm3 = vcmp.ge.f32.partialorder %v4956_v24, 0.0 }
 0x233   : > { %v5148_v29 = vpop.permute.xlu2 %1304  ;;  %v2626_v56 = vsel %vm2578_vm5, %v2554_v17, %v2602_v42  ;;  %vm2585_vm5 = vcmp.ge.f32.partialorder %v4921_v23, 0.0 }
 0x234   : > { %v2650_v54 = vmul.f32 %v5159_v41, %v2626_v56 }
 0x236   : > { %2368 = vperm.xlu1 %4011, %v5152_v26  }
 0x239   : > { %2673 = vadd.xlane.f32.xlu2 %v2647_v32  ;;  %v852_v26 = vpop.permute.xlu1 %851  ;;  %v5175_v32 = vpop.permute.xlu0 %1322 }
 0x23b   : > { %v5166_v53 = vpop.permute.xlu2 %1313 }
 0x23e   : > { %2374 = vperm.xlu1 %4011, %v5170_v19  }
 0x241   : > { %2675 = vadd.xlane.f32.xlu2 %v2648_v1  ;;  %v5184_v1 = vpop.permute.xlu0 %1331 }
 0x243   : > { %v855_v28 = vpop.permute.xlu2 %854 }
 0x244   : > { %v875_v17 = vperm.slane %v855_v28, %v5190_v20 }
 0x246   : > { %2383 = vperm.xlu1 %4011, %v5179_v30  }
 0x248   : > { %v861_v19 = vpop.permute.xlu1 %860 }
 0x249   : > { %2677 = vadd.xlane.f32.xlu2 %v2649_v50  ;;  %v849_v35 = vpop.permute.xlu0 %848  ;;  %v874_v50 = vperm.slane %v852_v26, %v5190_v20 }
 0x24a   : > { %v873_v42 = vperm.slane %v849_v35, %v5190_v20  ;;  %v2630_v35 = vsel %vm2582_vm10, %v4917_v25, %v2606_v38 }
 0x24b   : > { %v858_v12 = vpop.permute.xlu2 %857  ;;  %v2654_v46 = vmul.f32 %v5159_v41, %v2630_v35 }
 0x24c   : > { %v876_v56 = vperm.slane %v858_v12, %v5190_v20  ;;  %v882_v48 = vsel %vm881_vm7, %v874_v50, %v873_v42  ;;  %v877_v12 = vperm.slane %v861_v19, %v5190_v20 }
 0x24d   : > { %v884_v28 = vsel %vm883_vm8, %v875_v17, %v882_v48 }
 0x24e   : > { %v886_v26 = vsel %vm885_vm9, %v876_v56, %v884_v28 }
 0x250   : > { %v867_v59 = vpop.permute.xlu1 %866 }
 0x251   : > { %2679 = vadd.xlane.f32.xlu2 %v2650_v54  ;;  %v2651_v54 = vmul.f32 %v5159_v41, %v2627_v40  ;;  %v888_v40 = vsel %vm887_vm11, %v877_v12, %v886_v26  ;;  %v870_v42 = vpop.permute.xlu0 %869  ;;  %v879_v17 = vperm.slane %v867_v59, %v5190_v20  ;;  %v5217_v59 = vadd.s32 4294967288, %v5190_v20 }
 0x252   : > { %v880_v19 = vperm.slane %v870_v42, %v5190_v20  ;;  %v1369_v42 = vperm.slane %v5071_v43, %v5190_v20 }
 0x253   : > { %v864_v30 = vpop.permute.xlu2 %863  ;;  %v1390_v7 = vperm.slane %v5116_v13, %v5217_v59 }
 0x254   : > { %v878_v3 = vperm.slane %v864_v30, %v5190_v20 }
 0x256   : > { %v890_v50 = vsel %vm889_vm12, %v878_v3, %v888_v40 }
 0x257   : > { %v892_v30 = vsel %vm891_vm13, %v879_v17, %v890_v50  ;;  %v1374_v50 = vperm.slane %v5164_v0, %v5190_v20  ;;  %v5226_v17 = vadd.s32 4294967280, %v5190_v20  ;;  %v1385_v0 = vperm.slane %v5105_v61, %v5217_v59 }
 0x258   : > { %v5198_v39 = vpop.permute.xlu1 %1289  ;;  %v894_v25 = vsel %vm893_vm14, %v880_v19, %v892_v30  ;;  %v1362_v19 = vperm.slane %v5083_v4, %v5217_v59 }
 0x259   : > { %2681 = vadd.xlane.f32.xlu2 %v2651_v54  ;;  %v897_v38 = vsel %vm896_vm15, %v894_v25, -inf  ;;  %v1341_v3 = vpop.permute.xlu0 %1340  ;;  %v1380_v25 = vperm.slane %v5095_v45, %v5217_v59  ;;  %v1360_v43 = vperm.slane %v5198_v39, %v5190_v20  ;;  %v1372_v4 = vperm.slane %v5148_v29, %v5226_v17 }
 0x25a   : > { %v1377_v61 = vperm.slane %v5166_v53, %v5226_v17  ;;  %v1395_v29 = vperm.slane %v5127_v62, %v5217_v59 }
 0x25b   : > { %v1364_v13 = vsel %vm1363_vm0, %v1362_v19, %v1360_v43 }
 0x260   : > { %v1296_v54 = vpop.permute.xlu1 %1295 }
 0x261   : > { %2687 = vadd.xlane.f32.xlu2 %v2654_v46  ;;  %v1350_v46 = vpop.permute.xlu0 %1349  ;;  %v1366_v36 = vperm.slane %v1296_v54, %v5226_v17 }
 0x268   : > { %v1302_v56 = vpop.permute.xlu1 %1301 }
 0x269   : > { %898 = vmax.xlane.f32.xlu2 %v897_v38  ;;  %v1370_v35 = vperm.slane %v1302_v56, %v5217_v59 }
 0x270   : > { %v1311_v48 = vpop.permute.xlu1 %1310 }
 0x271   : > { %v1375_v40 = vperm.slane %v1311_v48, %v5217_v59  ;;  %v1371_v48 = vsel %vm1363_vm0, %v1370_v35, %v1369_v42  ;;  %v1392_v42 = vperm.slane %v1341_v3, %v5226_v17  ;;  %v1400_v3 = vperm.slane %v5136_v18, %v5217_v59 }
 0x272   : > { %v1373_v54 = vsel %vm1367_vm1, %v1372_v4, %v1371_v48 }
 0x273   : > { %v1376_v45 = vsel %vm1363_vm0, %v1375_v40, %v1374_v50  ;;  %v1387_v40 = vperm.slane %v5184_v1, %v5226_v17 }
 0x274   : > { %v1378_v53 = vsel %vm1367_vm1, %v1377_v61, %v1376_v45 }
 0x278   : > { %v1317_v28 = vpop.permute.xlu1 %1316 }
 0x279   : > { %v1379_v30 = vperm.slane %v1317_v28, %v5190_v20 }
 0x27b   : > { %v1381_v39 = vsel %vm1363_vm0, %v1380_v25, %v1379_v30  ;;  %v1397_v25 = vperm.slane %v1350_v46, %v5226_v17 }
 0x280   : > { %v1326_v26 = vpop.permute.xlu1 %1325 }
 0x281   : > { %v1384_v56 = vperm.slane %v1326_v26, %v5190_v20 }
 0x283   : > { %v1386_v35 = vsel %vm1363_vm0, %v1385_v0, %v1384_v56  ;;  %v1359_v56 = vpop.permute.xlu0 %1358 }
 0x284   : > { %v1388_v1 = vsel %vm1367_vm1, %v1387_v40, %v1386_v35  ;;  %v1402_v46 = vperm.slane %v1359_v56, %v5226_v17 }
 0x288   : > { %v1335_v12 = vpop.permute.xlu1 %1334 }
 0x289   : > { %v1389_v28 = vperm.slane %v1335_v12, %v5190_v20  ;;  %v1382_v12 = vperm.slane %v5175_v32, %v5226_v17  ;;  %v1368_v32 = vsel %vm1367_vm1, %v1366_v36, %v1364_v13 }
 0x28b   : > { %v1391_v50 = vsel %vm1363_vm0, %v1390_v7, %v1389_v28  ;;  %v1383_v30 = vsel %vm1367_vm1, %v1382_v12, %v1381_v39  ;;  %v2366_v39 = vpop.permute.xlu2 %2365 }
 0x28c   : > { %v1393_v7 = vsel %vm1367_vm1, %v1392_v42, %v1391_v50 }
 0x290   : > { %v1344_v38 = vpop.permute.xlu1 %1343 }
 0x291   : > { %v1394_v26 = vperm.slane %v1344_v38, %v5190_v20  ;;  %v1404_v38 = vsel %vm881_vm7, %v1373_v54, %v1368_v32  ;;  %v2386_v32 = vperm.slane %v2366_v39, %v5190_v20 }
 0x292   : > { %v1405_v19 = vsel %vm883_vm8, %v1378_v53, %v1404_v38 }
 0x293   : > { %v1396_v62 = vsel %vm1363_vm0, %v1395_v29, %v1394_v26  ;;  %v1406_v48 = vsel %vm885_vm9, %v1383_v30, %v1405_v19  ;;  %v2610_v29 = vmul.f32 0.01, %v4956_v24  ;;  %v2372_v13 = vpop.permute.xlu2 %2371 }
 0x294   : > { %v1398_v43 = vsel %vm1367_vm1, %v1397_v25, %v1396_v62  ;;  %v1407_v28 = vsel %vm887_vm11, %v1388_v1, %v1406_v48  ;;  %v2388_v56 = vperm.slane %v2372_v13, %v5190_v20 }
 0x295   : > { %v1408_v45 = vsel %vm889_vm12, %v1393_v7, %v1407_v28  ;;  %v2634_v35 = vsel %vm2586_vm3, %v4956_v24, %v2610_v29 }
 0x296   : > { %v1409_v61 = vsel %vm891_vm13, %v1398_v43, %v1408_v45  ;;  %v2658_v40 = vmul.f32 %v5159_v41, %v2634_v35  ;;  %v2609_v45 = vmul.f32 0.01, %v4921_v23 }
 0x298   : > { %v1353_v0 = vpop.permute.xlu1 %1352 }
 0x299   : > { %v1399_v36 = vperm.slane %v1353_v0, %v5190_v20  ;;  %v2381_v0 = vpop.permute.xlu0 %2380 }
 0x29b   : > { %v1401_v4 = vsel %vm1363_vm0, %v1400_v3, %v1399_v36  ;;  %v2378_v38 = vpop.permute.xlu2 %2377  ;;  %v2391_v36 = vperm.slane %v2381_v0, %v5190_v20 }
 0x29c   : > { %v1403_v26 = vsel %vm1367_vm1, %v1402_v46, %v1401_v4  ;;  %v2390_v7 = vperm.slane %v2378_v38, %v5190_v20 }
 0x29d   : > { %v1410_v18 = vsel %vm893_vm14, %v1403_v26, %v1409_v61  ;;  %v2633_v26 = vsel %vm2585_vm5, %v4921_v23, %v2609_v45 }
 0x29e   : > { %v1413_v12 = vsel %vm1412_vm2, %v1410_v18, -inf  ;;  %v2657_v61 = vmul.f32 %v5159_v41, %v2633_v26 }
 0x29f   : > { %1414 = vmax.xlane.f32.xlu1 %v1413_v12 }
 0x2a0   : > { %v2363_v54 = vpop.permute.xlu1 %2362 }
 0x2a1   : > { %v2385_v50 = vperm.slane %v2363_v54, %v5190_v20 }
 0x2a3   : > { %v2393_v30 = vsel %vm881_vm7, %v2386_v32, %v2385_v50 }
 0x2a7   : > { %2695 = vadd.xlane.f32.xlu1 %v2658_v40 }
 0x2a8   : > { %v2369_v53 = vpop.permute.xlu1 %2368 }
 0x2a9   : > { %v2387_v42 = vperm.slane %v2369_v53, %v5190_v20 }
 0x2ab   : > { %v2394_v62 = vsel %vm883_vm8, %v2387_v42, %v2393_v30 }
 0x2ac   : > { %v2395_v1 = vsel %vm885_vm9, %v2388_v56, %v2394_v62 }
 0x2b0   : > { %v2375_v25 = vpop.permute.xlu1 %2374 }
 0x2b1   : > { %v2389_v24 = vperm.slane %v2375_v25, %v5190_v20 }
 0x2b3   : > { %v2396_v19 = vsel %vm887_vm11, %v2389_v24, %v2395_v1 }
 0x2b4   : > { %v2397_v3 = vsel %vm889_vm12, %v2390_v7, %v2396_v19 }
 0x2b5   : > { %v2398_v46 = vsel %vm891_vm13, %v2391_v36, %v2397_v3 }
 0x2b8   : > { %v2384_v43 = vpop.permute.xlu1 %2383 }
 0x2b9   : > { %v2392_v48 = vperm.slane %v2384_v43, %v5190_v20 }
 0x2bb   : > { %v2399_v28 = vsel %vm893_vm14, %v2392_v48, %v2398_v46 }
 0x2bc   : > { %v2401_v4 = vsel %vm896_vm15, %v2399_v28, -inf  ;;  %v5357_v28 = vpop.xlane.xlu2 %2669 }
 0x2bd   : > { %2402 = vmax.xlane.f32.xlu2 %v2401_v4 }
 0x2c5   : > { %2693 = vadd.xlane.f32.xlu2 %v2657_v61 }
 0x312   : > { %v5307_v18 = vpop.xlane.xlu1 %1414 }
 0x313   : > { %v5310_v39 = vperm.slane %v5307_v18, 3  ;;  %v1417_v12 = vperm.slane %v5307_v18, 0  ;;  %v5318_v40 = vperm.slane %v5307_v18, 5  ;;  %v1418_v23 = vperm.slane %v5307_v18, 1 }
 0x314   : > { %v1419_v19 = vperm.slane %v5307_v18, 2  ;;  %v1421_v26 = vperm.slane %v5307_v18, 4 }
 0x315   : > { %v1443_v29 = vsub.f32 %v4963_v55, %v5310_v39  ;;  %v1434_v54 = vsub.f32 %v4951_v47, %v1417_v12  ;;  %v1433_v35 = vsub.f32 %v5037_v49, %v1417_v12  ;;  %v1450_v42 = vsub.f32 %v5001_v33, %v5318_v40 }
 0x316   : > { %v1436_v32 = vsub.f32 %v4935_v37, %v1418_v23  ;;  %v1435_v47 = vsub.f32 %v5051_v21, %v1417_v12  ;;  %v5326_v49 = vperm.slane %v5307_v18, 6  ;;  %v1438_v37 = vsub.f32 %v5006_v44, %v1418_v23 }
 0x317   : > { %v1477_v13 = vmul.f32 1.442695, %v1443_v29  ;;  %v1459_v53 = vmul.f32 1.442695, %v1434_v54  ;;  %v1457_v50 = vmul.f32 1.442695, %v1433_v35  ;;  %v1437_v33 = vsub.f32 %v5062_v11, %v1418_v23  ;;  %v5374_v54 = vpop.xlane.xlu2 %2673 }
 0x318   : > { %v1491_v55 = vmul.f32 1.442695, %v1450_v42  ;;  %v1463_v30 = vmul.f32 1.442695, %v1436_v32  ;;  %v1461_v25 = vmul.f32 1.442695, %v1435_v47  ;;  %v1453_v21 = vsub.f32 %v5014_v57, %v5326_v49 }
 0x319   : > { %4073 = vpow2.f32 %v1477_v13  ;;  %v1467_v1 = vmul.f32 1.442695, %v1438_v37  ;;  %v1465_v7 = vmul.f32 1.442695, %v1437_v33  ;;  %v1440_v44 = vsub.f32 %v5075_v15, %v1419_v19 }
 0x31a   : > { %4075 = vpow2.f32 %v1459_v53  ;;  %v1497_v38 = vmul.f32 1.442695, %v1453_v21  ;;  %v1439_v11 = vsub.f32 %v4883_v60, %v1419_v19  ;;  %v1442_v60 = vsub.f32 %v5087_v58, %v5310_v39 }
 0x31b   : > { %4077 = vpow2.f32 %v1457_v50  ;;  %v1471_v36 = vmul.f32 1.442695, %v1440_v44  ;;  %v1441_v15 = vsub.f32 %v5018_v51, %v1419_v19  ;;  %v1445_v58 = vsub.f32 %v5099_v6, %v1421_v26 }
 0x31c   : > { %4079 = vpow2.f32 %v1491_v55  ;;  %v1469_v48 = vmul.f32 1.442695, %v1439_v11  ;;  %v1475_v45 = vmul.f32 1.442695, %v1442_v60  ;;  %v1444_v51 = vsub.f32 %v4929_v34, %v5310_v39 }
 0x31d   : > { %4081 = vpow2.f32 %v1463_v30  ;;  %v1473_v61 = vmul.f32 1.442695, %v1441_v15  ;;  %v1481_v35 = vmul.f32 1.442695, %v1445_v58  ;;  %v1447_v50 = vsub.f32 %v4948_v22, %v1421_v26 }
 0x31e   : > { %4083 = vpow2.f32 %v1461_v25  ;;  %v1479_v23 = vmul.f32 1.442695, %v1444_v51  ;;  %v1446_v42 = vsub.f32 %v4973_v63, %v1421_v26  ;;  %v2530_v39 = vrot.slane %v4887_v27, 5 }
 0x31f   : > { %v5328_v62 = vpop.eup %4073  ;;  %4085 = vpow2.f32 %v1497_v38  ;;  %v5388_v6 = vpop.xlane.xlu2 %2675  ;;  %v1485_v32 = vmul.f32 1.442695, %v1447_v50  ;;  %v1449_v22 = vsub.f32 %v4977_v2, %v5318_v40  ;;  %v1448_v63 = vsub.f32 %v5109_v52, %v5318_v40 }
 0x320   : > { %6651 = vst [vmem:[#allocation47_spill] sm:$0xff] %v5328_v62  ;;  %v5330_v56 = vpop.eup %4075  ;;  %1560 = vperm.xlu1 %4011, %v5328_v62   ;;  %4087 = vpow2.f32 %v1467_v1  ;;  %v1483_v34 = vmul.f32 1.442695, %v1446_v42  ;;  %v5401_v30 = vperm.slane %v2530_v39, 0  ;;  %v2531_v38 = vrot.slane %v4887_v27, 6 }
 0x321   : > { %6652 = vst [vmem:[#allocation48_spill] sm:$0xff] %v5330_v56  ;;  %v5333_v24 = vpop.eup %4077  ;;  %1533 = vperm.xlu0 %4010, %v5330_v56   ;;  %4089 = vpow2.f32 %v1465_v7  ;;  %v1489_v37 = vmul.f32 1.442695, %v1449_v22  ;;  %v1487_v33 = vmul.f32 1.442695, %v1448_v63  ;;  %v1452_v52 = vsub.f32 %v4984_v10, %v5326_v49  ;;  %v6673_v22 = vld [vmem:[#allocation28_spill] sm:$0xff] }
 0x322   : > { %6653 = vst [vmem:[#allocation49_spill] sm:$0xff] %v5333_v24  ;;  %1530 = vperm.xlu2 %4009, %v5333_v24   ;;  %v5342_v0 = vpop.eup %4079  ;;  %4091 = vpow2.f32 %v1471_v36  ;;  %v2565_v25 = vadd.f32 %v5401_v30, %v4894_v14  ;;  %v1451_v40 = vsub.f32 %v5120_v31, %v5326_v49  ;;  %v5418_v7 = vperm.slane %v2531_v38, 0 }
 0x323   : > { %6654 = vst [vmem:[#allocation50_spill] sm:$0xff] %v5342_v0  ;;  %v5344_v3 = vpop.eup %4081  ;;  %4093 = vpow2.f32 %v1469_v48  ;;  %v1495_v11 = vmul.f32 1.442695, %v1452_v52  ;;  %v5423_v36 = vperm.slane %v5307_v18, 7  ;;  %v6676_v52 = vmov 0  }
 0x324   : > { %6655 = vst [vmem:[#allocation51_spill] sm:$0xff] %v5344_v3  ;;  %v5347_v57 = vpop.eup %4083  ;;  %4095 = vpow2.f32 %v1475_v45  ;;  %v2613_v2 = vmul.f32 0.01, %v2565_v25  ;;  %vm2589_vm6 = vcmp.ge.f32.partialorder %v2565_v25, 0.0  ;;  %v2568_v44 = vadd.f32 %v5418_v7, %v4894_v14 }
 0x325   : > { %6656 = vst [vmem:[#allocation52_spill] sm:$0xff] %v5347_v57  ;;  %v5353_v43 = vpop.eup %4085  ;;  %4097 = vpow2.f32 %v1473_v61  ;;  %v1493_v48 = vmul.f32 1.442695, %v1451_v40  ;;  %v1454_v18 = vsub.f32 %v5131_v5, %v5423_v36  ;;  %v1456_v50 = vsub.f32 %v5027_v16, %v5423_v36  ;;  %v6677_v40 = vld [vmem:[#allocation34_spill] sm:$0xff] }
 0x326   : > { %6657 = vst [vmem:[#allocation53_spill] sm:$0xff] %v5353_v43  ;;  %v5355_v46 = vpop.eup %4087  ;;  %4099 = vpow2.f32 %v1481_v35  ;;  %v2637_v27 = vsel %vm2589_vm6, %v2565_v25, %v2613_v2  ;;  %v2616_v31 = vmul.f32 0.01, %v2568_v44  ;;  %vm2592_vm10 = vcmp.ge.f32.partialorder %v2568_v44, 0.0  ;;  %v6674_v25 = vld [vmem:[#allocation25_spill] sm:$0xff] }
 0x327   : > { %6658 = vst [vmem:[#allocation54_spill] sm:$0xff] %v5355_v46  ;;  %v5360_v4 = vpop.eup %4089  ;;  %4101 = vpow2.f32 %v1479_v23  ;;  %v5405_v21 = vpop.xlane.xlu2 %2677  ;;  %v2661_v10 = vmul.f32 %v5159_v41, %v2637_v27  ;;  %v1499_v26 = vmul.f32 1.442695, %v1454_v18 }
 0x328   : > { %1581 = vperm.xlu1 %4011, %v5342_v0   ;;  %6659 = vst [vmem:[#allocation55_spill] sm:$0xff] %v5360_v4  ;;  %v5368_v12 = vpop.eup %4091  ;;  %4103 = vpow2.f32 %v1485_v32  ;;  %v2640_v49 = vsel %vm2592_vm10, %v2568_v44, %v2616_v31  ;;  %v5456_v32 = vld [vmem:[%s4634_s16 + $0x1] ss:$0 sm:$0xff]  ;;  %v5473_v31 = vpop.xlane.xlu0 %2671 }
 0x329   : > { %1539 = vperm.xlu0 %4010, %v5344_v3   ;;  %6660 = vst [vmem:[#allocation56_spill] sm:$0xff] %v5368_v12  ;;  %v5371_v29 = vpop.eup %4093  ;;  %4105 = vpow2.f32 %v1483_v34  ;;  %v2664_v58 = vmul.f32 %v5159_v41, %v2640_v49  ;;  %v1503_v34 = vmul.f32 1.442695, %v1456_v50  ;;  %v6689_v0 = vld [vmem:[#allocation38_spill] sm:$0xff] }
 0x32a   : > { %1536 = vperm.xlu2 %4009, %v5347_v57   ;;  %6661 = vst [vmem:[#allocation57_spill] sm:$0xff] %v5371_v29  ;;  %v5380_v13 = vpop.eup %4095  ;;  %4107 = vpow2.f32 %v1489_v37  ;;  %v2566_v37 = vadd.f32 %v5401_v30, %v6674_v25 }
 0x32b   : > { %6662 = vst [vmem:[#allocation58_spill] sm:$0xff] %v5380_v13  ;;  %v5382_v53 = vpop.eup %4097  ;;  %4109 = vpow2.f32 %v1487_v33 }
 0x32c   : > { %6663 = vst [vmem:[#allocation59_spill] sm:$0xff] %v5382_v53  ;;  %v5391_v47 = vpop.eup %4099  ;;  %4111 = vpow2.f32 %v1495_v11  ;;  %v2614_v2 = vmul.f32 0.01, %v2566_v37  ;;  %vm2590_vm3 = vcmp.ge.f32.partialorder %v2566_v37, 0.0  ;;  %v6678_v11 = vld [vmem:[#allocation24_spill] sm:$0xff] }
 0x32d   : > { %6664 = vst [vmem:[#allocation60_spill] sm:$0xff] %v5391_v47  ;;  %v5393_v55 = vpop.eup %4101  ;;  %4113 = vpow2.f32 %v1493_v48  ;;  %v2564_v48 = vadd.f32 %v5401_v30, %v6678_v11  ;;  %v6679_v30 = vld [vmem:[#allocation32_spill] sm:$0xff] }
 0x32e   : > { %6665 = vst [vmem:[#allocation61_spill] sm:$0xff] %v5393_v55  ;;  %v5408_v1 = vpop.eup %4103  ;;  %4115 = vpow2.f32 %v1499_v26  ;;  %v2638_v44 = vsel %vm2590_vm3, %v2566_v37, %v2614_v2 }
 0x32f   : > { %6666 = vst [vmem:[#allocation62_spill] sm:$0xff] %v5408_v1  ;;  %v5410_v19 = vpop.eup %4105  ;;  %v5427_v15 = vpop.xlane.xlu2 %2679  ;;  %4117 = vpow2.f32 %v1503_v34  ;;  %v2662_v18 = vmul.f32 %v5159_v41, %v2638_v44  ;;  %vm2588_vm5 = vcmp.ge.f32.partialorder %v2564_v48, 0.0 }
 0x330   : > { %1590 = vperm.xlu1 %4011, %v5353_v43   ;;  %6667 = vst [vmem:[#allocation63_spill] sm:$0xff] %v5410_v19  ;;  %v5425_v60 = vpop.eup %4107 }
 0x331   : > { %1545 = vperm.xlu0 %4010, %v5355_v46   ;;  %6668 = vst [vmem:[#allocation64_spill] sm:$0xff] %v5425_v60  ;;  %v5430_v45 = vpop.eup %4109 }
 0x332   : > { %1542 = vperm.xlu2 %4009, %v5360_v4   ;;  %6669 = vst [vmem:[#allocation65_spill] sm:$0xff] %v5430_v45  ;;  %v5436_v61 = vpop.eup %4111 }
 0x333   : > { %6670 = vst [vmem:[#allocation66_spill] sm:$0xff] %v5436_v61  ;;  %v5439_v51 = vpop.eup %4113 }
 0x334   : > { %6671 = vst [vmem:[#allocation67_spill] sm:$0xff] %v5439_v51  ;;  %v5445_v23 = vpop.eup %4115 }
 0x335   : > { %6672 = vst [vmem:[#allocation68_spill] sm:$0xff] %v5445_v23  ;;  %v5464_v16 = vpop.eup %4117 }
 0x336   : > { %6675 = vst [vmem:[#allocation28_spill] sm:$0xff] %v5464_v16 }
 0x337   : > { %v5442_v35 = vpop.xlane.xlu2 %2681 }
 0x338   : > { %4012 = vset.pattern.permute.xlu1 %v4649_v8 }
 0x339   : > { %1551 = vperm.xlu0 %4010, %v5368_v12  }
 0x33a   : > { %1548 = vperm.xlu2 %4009, %v5371_v29  }
 0x33f   : > { %v5448_v5 = vpop.xlane.xlu2 %2687 }
 0x341   : > { %1557 = vperm.xlu0 %4010, %v5380_v13  }
 0x342   : > { %1554 = vperm.xlu2 %4009, %v5382_v53   ;;  %v6692_v53 = vld [vmem:[#allocation27_spill] sm:$0xff] }
 0x347   : > { %v5453_v42 = vpop.xlane.xlu2 %898 }
 0x348   : > { %v901_v39 = vperm.slane %v5453_v42, 0  ;;  %v903_v38 = vperm.slane %v5453_v42, 2  ;;  %v905_v26 = vperm.slane %v5453_v42, 4  ;;  %v907_v2 = vperm.slane %v5453_v42, 6 }
 0x349   : > { %1566 = vperm.xlu0 %4010, %v5391_v47  }
 0x34a   : > { %1563 = vperm.xlu2 %4009, %v5393_v55   ;;  %v917_v63 = vsub.f32 %v6673_v22, %v901_v39  ;;  %v919_v27 = vsub.f32 %v6677_v40, %v903_v38  ;;  %v921_v39 = vsub.f32 %v6679_v30, %v905_v26  ;;  %v6690_v55 = vld [vmem:[#allocation41_spill] sm:$0xff] }
 0x34c   : > { %v925_v33 = vmul.f32 1.442695, %v917_v63  ;;  %v929_v49 = vmul.f32 1.442695, %v919_v27  ;;  %v933_v38 = vmul.f32 1.442695, %v921_v39 }
 0x34e   : > { %4119 = vpow2.f32 %v925_v33 }
 0x34f   : > { %4121 = vpow2.f32 %v929_v49  ;;  %v5486_v40 = vpop.xlane.xlu2 %2402  ;;  %v6681_v49 = vld [vmem:[#allocation26_spill] sm:$0xff] }
 0x350   : > { %4123 = vpow2.f32 %v933_v38  ;;  %v2570_v26 = vadd.f32 %v6681_v49, %v6678_v11  ;;  %v2406_v43 = vperm.slane %v5486_v40, 1  ;;  %v2410_v4 = vperm.slane %v5486_v40, 5 }
 0x351   : > { %1572 = vperm.xlu0 %4010, %v5408_v1   ;;  %v2405_v1 = vperm.slane %v5486_v40, 0  ;;  %v2412_v3 = vperm.slane %v5486_v40, 7 }
 0x352   : > { %1569 = vperm.xlu2 %4009, %v5410_v19   ;;  %vm2594_vm3 = vcmp.ge.f32.partialorder %v2570_v26, 0.0 }
 0x354   : > { %v5477_v34 = vpop.eup %4119 }
 0x355   : > { %v5488_v44 = vpop.eup %4121 }
 0x359   : > { %1578 = vperm.xlu0 %4010, %v5425_v60   ;;  %v2421_v60 = vsub.f32 %v6690_v55, %v2405_v1 }
 0x35a   : > { %1575 = vperm.xlu2 %4009, %v5430_v45   ;;  %2701 = vadd.xlane.f32.xlu1 %v2661_v10  ;;  %v2569_v10 = vadd.f32 %v5418_v7, %v6674_v25  ;;  %v2567_v25 = vadd.f32 %v5418_v7, %v6678_v11  ;;  %v6680_v7 = vld [vmem:[#allocation33_spill] sm:$0xff]  ;;  %v2422_v45 = vsub.f32 %v6689_v0, %v2406_v43  ;;  %v2620_v0 = vmul.f32 0.01, %v6692_v53 }
 0x35b   : > { %v2429_v43 = vmul.f32 1.442695, %v2421_v60 }
 0x35c   : > { %v2617_v50 = vmul.f32 0.01, %v2569_v10  ;;  %vm2593_vm6 = vcmp.ge.f32.partialorder %v2569_v10, 0.0  ;;  %v2615_v27 = vmul.f32 0.01, %v2567_v25  ;;  %vm2591_vm10 = vcmp.ge.f32.partialorder %v2567_v25, 0.0 }
 0x35d   : > { %v2431_v47 = vmul.f32 1.442695, %v2422_v45  ;;  %v2407_v45 = vperm.slane %v5486_v40, 2 }
 0x35e   : > { %v2641_v63 = vsel %vm2593_vm6, %v2569_v10, %v2617_v50  ;;  %v2639_v10 = vsel %vm2591_vm10, %v2567_v25, %v2615_v27  ;;  %v902_v25 = vperm.slane %v5453_v42, 1  ;;  %vm2596_vm6 = vcmp.ge.f32.partialorder %v6692_v53, 0.0 }
 0x35f   : > { %v2665_v33 = vmul.f32 %v5159_v41, %v2641_v63  ;;  %v2663_v30 = vmul.f32 %v5159_v41, %v2639_v10  ;;  %v5499_v63 = vpop.eup %4123  ;;  %vm2221_vm10 = vcmask 261120  }
 0x361   : > { %1587 = vperm.xlu0 %4010, %v5436_v61  }
 0x362   : > { %1584 = vperm.xlu2 %4009, %v5439_v51   ;;  %2707 = vadd.xlane.f32.xlu1 %v2664_v58  ;;  %v2612_v58 = vmul.f32 0.01, %v2564_v48  ;;  %v6688_v51 = vld [vmem:[#allocation23_spill] sm:$0xff] }
 0x364   : > { %v2636_v22 = vsel %vm2588_vm5, %v2564_v48, %v2612_v58  ;;  %v923_v48 = vsub.f32 %v6680_v7, %v907_v2  ;;  %v6682_v58 = vld [vmem:[#allocation31_spill] sm:$0xff] }
 0x365   : > { %v2660_v37 = vmul.f32 %v5159_v41, %v2636_v22  ;;  %v1455_v50 = vsub.f32 %v6682_v58, %v5423_v36  ;;  %v2618_v22 = vmul.f32 0.01, %v2570_v26  ;;  %v6683_v36 = vld [vmem:[#allocation30_spill] sm:$0xff]  ;;  %v904_v58 = vperm.slane %v5453_v42, 3 }
 0x366   : > { %v937_v39 = vmul.f32 1.442695, %v923_v48  ;;  %v918_v2 = vsub.f32 %v6683_v36, %v902_v25 }
 0x367   : > { %v2642_v11 = vsel %vm2594_vm3, %v2570_v26, %v2618_v22  ;;  %v6685_v26 = vld [vmem:[#allocation36_spill] sm:$0xff] }
 0x368   : > { %4125 = vpow2.f32 %v937_v39  ;;  %v2666_v27 = vmul.f32 %v5159_v41, %v2642_v11  ;;  %v927_v10 = vmul.f32 1.442695, %v918_v2  ;;  %v920_v39 = vsub.f32 %v6685_v26, %v904_v58  ;;  %v6686_v2 = vld [vmem:[#allocation37_spill] sm:$0xff] }
 0x369   : > { %v6687_v26 = vld [vmem:[#allocation29_spill] sm:$0xff] }
 0x36a   : > { %1593 = vperm.xlu2 %4009, %v5445_v23   ;;  %v931_v22 = vmul.f32 1.442695, %v920_v39 }
 0x36e   : > { %v5509_v7 = vpop.eup %4125 }
 0x372   : > { %4016 = vset.pattern.permute.xlu2 %v4652_v9 }
 0x37b   : > { %2725 = vperm.xlu1 %4012, %v5456_v32  }
 0x383   : > { %4013 = vset.pattern.permute.xlu1 %v6676_v52 }
 0x384   : > { %1599 = vperm.xlu1 %4013, %v5464_v16  }
 0x38b   : > { %2703 = vadd.xlane.f32.xlu0 %v2662_v18  ;;  %v5490_v18 = vpop.xlane.xlu0 %2685 }
 0x38c   : > { %950 = vperm.xlu1 %4013, %v5477_v34  }
 0x393   : > { %2699 = vadd.xlane.f32.xlu2 %v2660_v37  ;;  %2709 = vadd.xlane.f32.xlu0 %v2665_v33  ;;  %v5501_v37 = vpop.xlane.xlu2 %2693  ;;  %v1501_v33 = vmul.f32 1.442695, %v1455_v50  ;;  %v5505_v38 = vpop.xlane.xlu0 %2691 }
 0x394   : > { %956 = vperm.xlu1 %4013, %v5488_v44  }
 0x395   : > { %4127 = vpow2.f32 %v1501_v33  ;;  %v906_v33 = vperm.slane %v5453_v42, 5 }
 0x396   : > { %4129 = vpow2.f32 %v927_v10 }
 0x397   : > { %4131 = vpow2.f32 %v931_v22 }
 0x39b   : > { %2705 = vadd.xlane.f32.xlu2 %v2663_v30  ;;  %v5511_v48 = vpop.permute.xlu2 %1530  ;;  %v5515_v50 = vpop.eup %4127 }
 0x39c   : > { %962 = vperm.xlu1 %4013, %v5499_v63   ;;  %6684 = vst [vmem:[#allocation25_spill] sm:$0xff] %v5515_v50  ;;  %v5517_v30 = vpop.xlane.xlu0 %2697  ;;  %v5522_v25 = vpop.eup %4129 }
 0x39d   : > { %v5531_v10 = vpop.eup %4131 }
 0x3a3   : > { %2711 = vadd.xlane.f32.xlu2 %v2666_v27  ;;  %v5524_v11 = vpop.permute.xlu2 %1536  ;;  %v922_v27 = vsub.f32 %v6686_v2, %v906_v33 }
 0x3a4   : > { %968 = vperm.xlu1 %4013, %v5509_v7   ;;  %v5526_v36 = vpop.permute.xlu0 %1533 }
 0x3a5   : > { %v935_v61 = vmul.f32 1.442695, %v922_v27 }
 0x3a7   : > { %1596 = vperm.xlu0 %4010, %v5515_v50   ;;  %v908_v50 = vperm.slane %v5453_v42, 7  ;;  %4133 = vpow2.f32 %v935_v61  ;;  %v2571_v42 = vadd.f32 %v6681_v49, %v4894_v14  ;;  %v5550_v61 = vpop.xlane.xlu1 %2695 }
 0x3a9   : > { %v924_v39 = vsub.f32 %v6687_v26, %v908_v50  ;;  %v2619_v50 = vmul.f32 0.01, %v2571_v42  ;;  %vm2595_vm5 = vcmp.ge.f32.partialorder %v2571_v42, 0.0 }
 0x3ab   : > { %v5534_v58 = vpop.permute.xlu2 %1542  ;;  %v939_v23 = vmul.f32 1.442695, %v924_v39  ;;  %v2643_v26 = vsel %vm2595_vm5, %v2571_v42, %v2619_v50  ;;  %v2408_v42 = vperm.slane %v5486_v40, 3 }
 0x3ac   : > { %v5537_v16 = vpop.permute.xlu0 %1539 }
 0x3ad   : > { %v5540_v22 = vpop.eup %4133  ;;  %4135 = vpow2.f32 %v939_v23  ;;  %v2667_v23 = vmul.f32 %v5159_v41, %v2643_v26 }
 0x3ae   : > { %4137 = vpow2.f32 %v2431_v47  ;;  %v6694_v47 = vld [vmem:[#allocation43_spill] sm:$0xff] }
 0x3af   : > { %953 = vperm.xlu0 %4010, %v5522_v25   ;;  %v5558_v14 = vpop.permute.xlu1 %1560  ;;  %4139 = vpow2.f32 %v2429_v43  ;;  %v2423_v1 = vsub.f32 %v6694_v47, %v2407_v45 }
 0x3b1   : > { %v2433_v56 = vmul.f32 1.442695, %v2423_v1 }
 0x3b3   : > { %v5545_v33 = vpop.permute.xlu2 %1548  ;;  %v5552_v27 = vpop.eup %4135 }
 0x3b4   : > { %v5547_v2 = vpop.permute.xlu0 %1545  ;;  %v5580_v46 = vpop.eup %4137 }
 0x3b5   : > { %6693 = vst [vmem:[#allocation34_spill] sm:$0xff] %v5580_v46  ;;  %v1609_v24 = vperm.slane %v5547_v2, %v5226_v17 }
 0x3b7   : > { %959 = vperm.xlu0 %4010, %v5531_v10   ;;  %v5569_v13 = vpop.permute.xlu1 %1581 }
 0x3bb   : > { %2737 = vperm.xlu2 %4016, %v5456_v32   ;;  %v5555_v39 = vpop.permute.xlu2 %1554 }
 0x3bc   : > { %v5560_v49 = vpop.permute.xlu0 %1551 }
 0x3bf   : > { %965 = vperm.xlu0 %4010, %v5540_v22  }
 0x3c3   : > { %4017 = vset.pattern.permute.xlu2 %v6676_v52  ;;  %v5567_v50 = vpop.permute.xlu2 %1563 }
 0x3c4   : > { %v5571_v26 = vpop.permute.xlu0 %1557 }
 0x3c7   : > { %971 = vperm.xlu0 %4010, %v5552_v27  }
 0x3cb   : > { %v5584_v55 = vpop.permute.xlu2 %1569 }
 0x3cc   : > { %v5590_v60 = vpop.permute.xlu0 %1566 }
 0x3cd   : > { %v1621_v2 = vperm.slane %v5590_v60, %v5190_v20  ;;  %v1622_v60 = vperm.slane %v5584_v55, %v5217_v59 }
 0x3ce   : > { %2713 = vadd.xlane.f32.xlu1 %v2667_v23  ;;  %v6691_v23 = vld [vmem:[#allocation39_spill] sm:$0xff] }
 0x3cf   : > { %4014 = vset.pattern.permute.xlu0 %v6688_v51  ;;  %v2424_v29 = vsub.f32 %v6691_v23, %v2408_v42  ;;  %v5588_v42 = vpop.permute.xlu1 %1590 }
 0x3d1   : > { %v2435_v19 = vmul.f32 1.442695, %v2424_v29  ;;  %v6695_v29 = vld [vmem:[#allocation40_spill] sm:$0xff] }
 0x3d2   : > { %v2426_v23 = vsub.f32 %v6695_v29, %v2410_v4  ;;  %v2411_v29 = vperm.slane %v5486_v40, 6 }
 0x3d3   : > { %4141 = vpow2.f32 %v2435_v19  ;;  %v6698_v19 = vld [vmem:[#allocation45_spill] sm:$0xff] }
 0x3d4   : > { %4143 = vpow2.f32 %v2433_v56  ;;  %v5608_v47 = vpop.permute.xlu0 %1572  ;;  %v6702_v56 = vld [vmem:[#allocation35_spill] sm:$0xff] }
 0x3d7   : > { %2731 = vperm.xlu0 %4014, %v5456_v32   ;;  %v2644_v32 = vsel %vm2596_vm6, %v6692_v53, %v2620_v0  ;;  %v2409_v53 = vperm.slane %v5486_v40, 4  ;;  %v2439_v0 = vmul.f32 1.442695, %v2426_v23  ;;  %v5603_v45 = vpop.xlane.xlu1 %2701 }
 0x3d8   : > { %v2668_v62 = vmul.f32 %v5159_v41, %v2644_v32  ;;  %v6699_v41 = vld [vmem:[#allocation46_spill] sm:$0xff]  ;;  %v5606_v32 = vpop.permute.xlu2 %1575 }
 0x3d9   : > { %v2425_v4 = vsub.f32 %v6698_v19, %v2409_v53  ;;  %4145 = vpow2.f32 %v2439_v0  ;;  %v2427_v53 = vsub.f32 %v6702_v56, %v2411_v29  ;;  %v526_v29 = vld [vmem:[%s6524_s9 + $0x8] sm:$0xff] }
 0x3db   : > { %v2437_v1 = vmul.f32 1.442695, %v2425_v4  ;;  %v2441_v19 = vmul.f32 1.442695, %v2427_v53 }
 0x3dc   : > { %v1579_v4 = vpop.permute.xlu0 %1578 }
 0x3dd   : > { %4147 = vpow2.f32 %v2437_v1  ;;  %v527_v1 = vld [vmem:[%s6524_s9 + $0x10] sm:$0xff] }
 0x3de   : > { %1663 = vmatpush.msrb.mxu0 %v527_v1 }
 0x3df   : > { %4015 = vset.pattern.permute.xlu0 %v6676_v52 }
 0x3e0   : > { %2457 = vperm.xlu0 %4015, %v5580_v46   ;;  %v5596_v46 = vpop.eup %4139  ;;  %v1585_v0 = vpop.permute.xlu2 %1584  ;;  %1664 = vmatpush.msrb.mxu0 %v526_v29  ;;  %v1606_v29 = vperm.slane %v5537_v16, %v5190_v20  ;;  %v1617_v16 = vperm.slane %v5558_v14, %v5217_v59 }
 0x3e1   : > { %6696 = vst [vmem:[#allocation24_spill] sm:$0xff] %v5596_v46  ;;  %v5598_v43 = vpop.eup %4141 }
 0x3e2   : > { %6697 = vst [vmem:[#allocation32_spill] sm:$0xff] %v5598_v43  ;;  %v5611_v12 = vpop.eup %4143 }
 0x3e3   : > { %6700 = vst [vmem:[#allocation33_spill] sm:$0xff] %v5611_v12 }
 0x3e4   : > { %2715 = vadd.xlane.f32.xlu2 %v2668_v62  ;;  %v2428_v62 = vsub.f32 %v6699_v41, %v2412_v3  ;;  %v5618_v3 = vpop.xlane.xlu1 %2707 }
 0x3e6   : > { %v2443_v23 = vmul.f32 1.442695, %v2428_v62 }
 0x3e7   : > { %2454 = vperm.xlu1 %4013, %v5596_v46   ;;  %v5613_v46 = vpop.eup %4145 }
 0x3e8   : > { %2463 = vperm.xlu0 %4015, %v5598_v43   ;;  %6701 = vst [vmem:[#allocation26_spill] sm:$0xff] %v5613_v46  ;;  %4149 = vpow2.f32 %v2443_v23  ;;  %v5620_v41 = vpop.eup %4147  ;;  %v1594_v56 = vpop.permute.xlu2 %1593 }
 0x3e9   : > { %6703 = vst [vmem:[#allocation31_spill] sm:$0xff] %v5620_v41  ;;  %4151 = vpow2.f32 %v2441_v19  ;;  %v525_v19 = vld [vmem:[%s6524_s9] sm:$0xff]  ;;  %v1588_v43 = vpop.permute.xlu0 %1587 }
 0x3ea   : > { %1665 = vmatpush.msrb.mxu0 %v525_v19  ;;  %v1616_v19 = vperm.slane %v5571_v26, %v5190_v20  ;;  %v1627_v26 = vperm.slane %v1579_v4, %v5217_v59  ;;  %v1632_v51 = vperm.slane %v1588_v43, %v5217_v59  ;;  %v1631_v43 = vperm.slane %v1585_v0, %v5190_v20 }
 0x3ec   : > { %v1618_v14 = vsel %vm1363_vm0, %v1617_v16, %v1616_v19 }
 0x3ed   : > { %v5626_v62 = vpop.permute.xlu1 %2725 }
 0x3ee   : > { %v5622_v40 = vpop.eup %4149  ;;  %v5638_v53 = vadd.f32 %v5626_v62, %v5357_v28 }
 0x3ef   : > { %2460 = vperm.xlu1 %4013, %v5611_v12   ;;  %6704 = vst [vmem:[#allocation30_spill] sm:$0xff] %v5622_v40  ;;  %v5634_v23 = vpop.eup %4151  ;;  %v1601_v12 = vperm.slane %v5511_v48, %v5190_v20  ;;  %v1607_v48 = vperm.slane %v5534_v58, %v5217_v59  ;;  %v1626_v58 = vperm.slane %v5606_v32, %v5190_v20 }
 0x3f0   : > { %2469 = vperm.xlu0 %4015, %v5613_v46   ;;  %6705 = vst [vmem:[#allocation36_spill] sm:$0xff] %v5634_v23  ;;  %v1602_v46 = vperm.slane %v5526_v36, %v5217_v59  ;;  %v1611_v36 = vperm.slane %v5545_v33, %v5190_v20 }
 0x3f1   : > { %v1608_v9 = vsel %vm1363_vm0, %v1607_v48, %v1606_v29  ;;  %v1628_v32 = vsel %vm1363_vm0, %v1627_v26, %v1626_v58 }
 0x3f7   : > { %2466 = vperm.xlu1 %4013, %v5620_v41   ;;  %v1612_v41 = vperm.slane %v5560_v49, %v5217_v59  ;;  %v1603_v49 = vsel %vm1363_vm0, %v1602_v46, %v1601_v12  ;;  %v1624_v46 = vperm.slane %v5608_v47, %v5226_v17  ;;  %v1619_v12 = vperm.slane %v5567_v50, %v5226_v17 }
 0x3f8   : > { %2475 = vperm.xlu0 %4015, %v5622_v40   ;;  %v1629_v47 = vperm.slane %v5569_v13, %v5226_v17  ;;  %v1623_v50 = vsel %vm1363_vm0, %v1622_v60, %v1621_v2  ;;  %v1636_v13 = vperm.slane %v1594_v56, %v5190_v20  ;;  %v5727_v60 = vadd.f32 %v5626_v62, %v5448_v5 }
 0x3f9   : > { %v1613_v33 = vsel %vm1363_vm0, %v1612_v41, %v1611_v36  ;;  %v1620_v19 = vsel %vm1367_vm1, %v1619_v12, %v1618_v14  ;;  %v1625_v0 = vsel %vm1367_vm1, %v1624_v46, %v1623_v50 }
 0x3fa   : > { %v1630_v48 = vsel %vm1367_vm1, %v1629_v47, %v1628_v32 }
 0x3fe   : > { %v5647_v1 = vpop.xlane.xlu0 %2703 }
 0x3ff   : > { %2472 = vperm.xlu1 %4013, %v5634_v23   ;;  %v1604_v23 = vperm.slane %v5524_v11, %v5226_v17  ;;  %v1614_v11 = vperm.slane %v5555_v39, %v5226_v17  ;;  %v1610_v39 = vsel %vm1367_vm1, %v1609_v24, %v1608_v9  ;;  %v1633_v9 = vsel %vm1363_vm0, %v1632_v51, %v1631_v43 }
 0x400   : > { %2791 = vperm.xlu0 %4015, %v5638_v53   ;;  %v1634_v24 = vperm.slane %v5588_v42, %v5226_v17 }
 0x401   : > { %v1605_v4 = vsel %vm1367_vm1, %v1604_v23, %v1603_v49  ;;  %v1615_v41 = vsel %vm1367_vm1, %v1614_v11, %v1613_v33  ;;  %v1600_v23 = vpop.permute.xlu1 %1599 }
 0x402   : > { %v1641_v55 = vsel %vm881_vm7, %v1610_v39, %v1605_v4  ;;  %v1635_v51 = vsel %vm1367_vm1, %v1634_v24, %v1633_v9  ;;  %v1639_v11 = vperm.slane %v1600_v23, %v5226_v17  ;;  %v5734_v4 = vadd.f32 %v5626_v62, %v5501_v37  ;;  %v6708_v24 = vld [vmem:[#allocation42_spill] sm:$0xff] }
 0x403   : > { %v1642_v36 = vsel %vm883_vm8, %v1615_v41, %v1641_v55 }
 0x404   : > { %v1643_v49 = vsel %vm885_vm9, %v1620_v19, %v1642_v36 }
 0x405   : > { %v1644_v42 = vsel %vm887_vm11, %v1625_v0, %v1643_v49 }
 0x406   : > { %v5645_v40 = vpop.xlane.xlu2 %2699  ;;  %v5667_v57 = vpop.xlane.xlu0 %2709  ;;  %v1645_v2 = vsel %vm889_vm12, %v1630_v48, %v1644_v42 }
 0x407   : > { %v1646_v14 = vsel %vm891_vm13, %v1635_v51, %v1645_v2 }
 0x409   : > { %v951_v50 = vpop.permute.xlu1 %950 }
 0x40e   : > { %v5651_v28 = vpop.xlane.xlu2 %2705 }
 0x40f   : > { %v5746_v5 = vadd.f32 %v5626_v62, %v5651_v28 }
 0x411   : > { %6706 = vst [vmem:[#allocation37_spill] sm:$0xff] %v5746_v5 }
 0x416   : > { %v2712_v29 = vpop.xlane.xlu2 %2711 }
 0x417   : > { %v5752_v37 = vadd.f32 %v5626_v62, %v2712_v29  ;;  %v5768_v29 = vadd.f32 %v5626_v62, %v5388_v6  ;;  %v5785_v6 = vadd.f32 %v5626_v62, %v5442_v35  ;;  %v6709_v35 = vld [vmem:[#allocation44_spill] sm:$0xff] }
 0x419   : > { %v1597_v16 = vpop.permute.xlu0 %1596  ;;  %6707 = vst [vmem:[#allocation29_spill] sm:$0xff] %v5752_v37 }
 0x41a   : > { %v1637_v26 = vperm.slane %v1597_v16, %v5217_v59 }
 0x41c   : > { %v1638_v33 = vsel %vm1363_vm0, %v1637_v26, %v1636_v13 }
 0x41d   : > { %v1640_v58 = vsel %vm1367_vm1, %v1639_v11, %v1638_v33  ;;  %v973_v11 = vperm.slane %v951_v50, %v5190_v20 }
 0x41e   : > { %v2738_v46 = vpop.permute.xlu2 %2737  ;;  %v1647_v56 = vsel %vm893_vm14, %v1640_v58, %v1646_v14 }
 0x41f   : > { %3906 = vmatmul.msk.f32.vlgmr.msrb.gmra.mxu0 %vm1412_vm2, %v1647_v56  ;;  %v5720_v12 = vadd.f32 %v2738_v46, %v5374_v54  ;;  %v5739_v54 = vadd.f32 %v5626_v62, %v5645_v40  ;;  %v5764_v28 = vadd.f32 %v2738_v46, %v5490_v18  ;;  %v957_v18 = vpop.permute.xlu1 %956  ;;  %v5781_v9 = vadd.f32 %v2738_v46, %v5517_v30 }
 0x420   : > { %v5798_v0 = vadd.f32 %v2738_v46, %v5667_v57  ;;  %v975_v2 = vperm.slane %v957_v18, %v5190_v20 }
 0x421   : > { %2797 = vperm.xlu2 %4017, %v5720_v12   ;;  %v5723_v39 = vpop.permute.xlu0 %953 }
 0x429   : > { %2818 = vperm.xlu2 %4017, %v5727_v60   ;;  %v5730_v43 = vpop.permute.xlu0 %959 }
 0x42a   : > { %v976_v33 = vperm.slane %v5730_v43, %v5190_v20 }
 0x431   : > { %2827 = vperm.xlu2 %4017, %v5734_v4   ;;  %v5741_v41 = vpop.permute.xlu0 %965 }
 0x439   : > { %2836 = vperm.xlu2 %4017, %v5739_v54   ;;  %v5748_v32 = vpop.permute.xlu0 %971 }
 0x441   : > { %2845 = vperm.xlu2 %4017, %v5746_v5  }
 0x449   : > { %2854 = vperm.xlu2 %4017, %v5752_v37   ;;  %v2732_v47 = vpop.permute.xlu0 %2731 }
 0x44a   : > { %v5756_v40 = vadd.f32 %v2732_v47, %v5405_v21  ;;  %v5759_v19 = vadd.f32 %v2732_v47, %v5473_v31  ;;  %v5773_v21 = vadd.f32 %v2738_v46, %v5505_v38  ;;  %v5776_v31 = vadd.f32 %v2738_v46, %v5427_v15  ;;  %v963_v38 = vpop.permute.xlu1 %962 }
 0x44b   : > { %v5790_v15 = vadd.f32 %v2738_v46, %v5647_v1  ;;  %v5793_v55 = vadd.f32 %v2732_v47, %v6708_v24  ;;  %v5801_v62 = vadd.f32 %v2732_v47, %v6709_v35  ;;  %v5808_v48 = vadd.f32 %v2732_v47, %v5550_v61 }
 0x44c   : > { %2803 = vperm.xlu1 %4013, %v5756_v40   ;;  %2794 = vperm.xlu0 %4015, %v5759_v19   ;;  %v5813_v16 = vadd.f32 %v2732_v47, %v5603_v45  ;;  %v5817_v49 = vadd.f32 %v2732_v47, %v5618_v3  ;;  %v974_v61 = vperm.slane %v5723_v39, %v5190_v20 }
 0x44d   : > { %v977_v39 = vperm.slane %v963_v38, %v5190_v20  ;;  %v980_v35 = vperm.slane %v5748_v32, %v5190_v20 }
 0x44e   : > { %6710 = vst [vmem:[#allocation38_spill] sm:$0xff] %v5817_v49  ;;  %v981_v45 = vsel %vm881_vm7, %v974_v61, %v973_v11 }
 0x44f   : > { %v982_v58 = vsel %vm883_vm8, %v975_v2, %v981_v45 }
 0x450   : > { %v983_v14 = vsel %vm885_vm9, %v976_v33, %v982_v58 }
 0x451   : > { %v984_v43 = vsel %vm887_vm11, %v977_v39, %v983_v14 }
 0x452   : > { %v969_v30 = vpop.permute.xlu1 %968  ;;  %v2458_v13 = vpop.permute.xlu0 %2457 }
 0x453   : > { %v2478_v24 = vperm.slane %v2458_v13, %v5190_v20 }
 0x454   : > { %2815 = vperm.xlu1 %4013, %v5764_v28   ;;  %2800 = vperm.xlu0 %4015, %v5768_v29  }
 0x457   : > { %v2716_v1 = vpop.xlane.xlu2 %2715 }
 0x458   : > { %v5805_v36 = vadd.f32 %v2738_v46, %v2716_v1  ;;  %v978_v46 = vperm.slane %v5741_v41, %v5190_v20  ;;  %v979_v41 = vperm.slane %v969_v30, %v5190_v20 }
 0x45a   : > { %v2714_v23 = vpop.xlane.xlu1 %2713  ;;  %v2464_v51 = vpop.permute.xlu0 %2463  ;;  %v985_v18 = vsel %vm889_vm12, %v978_v46, %v984_v43 }
 0x45b   : > { %v5822_v42 = vadd.f32 %v2732_v47, %v2714_v23  ;;  %v986_v13 = vsel %vm891_vm13, %v979_v41, %v985_v18 }
 0x45c   : > { %2824 = vperm.xlu1 %4013, %v5773_v21   ;;  %2806 = vperm.xlu0 %4015, %v5776_v31   ;;  %v987_v11 = vsel %vm893_vm14, %v980_v35, %v986_v13 }
 0x45d   : > { %6711 = vst [vmem:[#allocation41_spill] sm:$0xff] %v5822_v42  ;;  %v989_v2 = vsel %vm896_vm15, %v987_v11, 0.0 }
 0x462   : > { %v2455_v57 = vpop.permute.xlu1 %2454  ;;  %v2470_v50 = vpop.permute.xlu0 %2469 }
 0x463   : > { %v2477_v56 = vperm.slane %v2455_v57, %v5190_v20  ;;  %v2480_v57 = vperm.slane %v2464_v51, %v5190_v20  ;;  %v2482_v33 = vperm.slane %v2470_v50, %v5190_v20 }
 0x464   : > { %2833 = vperm.xlu1 %4013, %v5781_v9   ;;  %2809 = vperm.xlu0 %4015, %v5785_v6  }
 0x465   : > { %v2485_v1 = vsel %vm881_vm7, %v2478_v24, %v2477_v56 }
 0x46a   : > { %v2461_v26 = vpop.permute.xlu1 %2460  ;;  %v2476_v30 = vpop.permute.xlu0 %2475 }
 0x46b   : > { %v2479_v47 = vperm.slane %v2461_v26, %v5190_v20  ;;  %v2484_v58 = vperm.slane %v2476_v30, %v5190_v20 }
 0x46c   : > { %2842 = vperm.xlu1 %4013, %v5790_v15   ;;  %2812 = vperm.xlu0 %4015, %v5793_v55  }
 0x46d   : > { %v2486_v23 = vsel %vm883_vm8, %v2479_v47, %v2485_v1 }
 0x46e   : > { %v2487_v61 = vsel %vm885_vm9, %v2480_v57, %v2486_v23 }
 0x472   : > { %v2467_v3 = vpop.permute.xlu1 %2466  ;;  %v2792_v56 = vpop.permute.xlu0 %2791 }
 0x473   : > { %v2481_v38 = vperm.slane %v2467_v3, %v5190_v20 }
 0x474   : > { %2851 = vperm.xlu1 %4013, %v5798_v0   ;;  %2821 = vperm.xlu0 %4015, %v5801_v62  }
 0x475   : > { %v2488_v45 = vsel %vm887_vm11, %v2481_v38, %v2487_v61 }
 0x476   : > { %v2489_v3 = vsel %vm889_vm12, %v2482_v33, %v2488_v45 }
 0x47a   : > { %v2473_v26 = vpop.permute.xlu1 %2472 }
 0x47b   : > { %v2483_v32 = vperm.slane %v2473_v26, %v5190_v20  ;;  %v2798_v43 = vpop.permute.xlu2 %2797 }
 0x47c   : > { %2860 = vperm.xlu1 %4013, %v5805_v36   ;;  %2830 = vperm.xlu0 %4015, %v5808_v48   ;;  %v2865_v5 = vperm.slane %v2798_v43, %v5226_v17 }
 0x47d   : > { %v2490_v51 = vsel %vm891_vm13, %v2483_v32, %v2489_v3 }
 0x47e   : > { %v2491_v14 = vsel %vm893_vm14, %v2484_v58, %v2490_v51  ;;  %v2862_v58 = vperm.slane %v2792_v56, %v5190_v20 }
 0x47f   : > { %v2493_v46 = vsel %vm896_vm15, %v2491_v14, 0.0 }
 0x483   : > { %v2819_v1 = vpop.permute.xlu2 %2818 }
 0x484   : > { %2839 = vperm.xlu0 %4015, %v5813_v16  }
 0x48b   : > { %v2828_v38 = vpop.permute.xlu2 %2827 }
 0x48c   : > { %2848 = vperm.xlu0 %4015, %v5817_v49   ;;  %v2877_v49 = vperm.slane %v2819_v1, %v5190_v20 }
 0x493   : > { %v2837_v61 = vpop.permute.xlu2 %2836 }
 0x494   : > { %2857 = vperm.xlu0 %4015, %v5822_v42  }
 0x49b   : > { %v2846_v32 = vpop.permute.xlu2 %2845 }
 0x4a6   : > { %990 = vadd.xlane.f32.xlu1 %v989_v2 }
 0x4ae   : > { %2494 = vadd.xlane.f32.xlu1 %v2493_v46 }
 0x4be   : > { %v2795_v39 = vpop.permute.xlu0 %2794  ;;  %v2804_v24 = vpop.permute.xlu1 %2803 }
 0x4bf   : > { %v2863_v2 = vperm.slane %v2795_v39, %v5217_v59 }
 0x4c6   : > { %v2801_v47 = vpop.permute.xlu0 %2800  ;;  %v2816_v18 = vpop.permute.xlu1 %2815 }
 0x4c7   : > { %v2867_v3 = vperm.slane %v2801_v47, %v5190_v20  ;;  %v2882_v47 = vperm.slane %v2828_v38, %v5190_v20 }
 0x4ce   : > { %v2807_v50 = vpop.permute.xlu0 %2806  ;;  %v2825_v41 = vpop.permute.xlu1 %2824 }
 0x4cf   : > { %v2870_v14 = vperm.slane %v2807_v50, %v5226_v17 }
 0x4d6   : > { %v2810_v35 = vpop.permute.xlu0 %2809  ;;  %v2834_v26 = vpop.permute.xlu1 %2833 }
 0x4d7   : > { %v2872_v46 = vperm.slane %v2810_v35, %v5190_v20  ;;  %v2864_v35 = vsel %vm1363_vm0, %v2863_v2, %v2862_v58  ;;  %v2855_v58 = vpop.permute.xlu2 %2854 }
 0x4de   : > { %v2813_v23 = vpop.permute.xlu0 %2812  ;;  %v2843_v11 = vpop.permute.xlu1 %2842 }
 0x4df   : > { %v2873_v30 = vperm.slane %v2813_v23, %v5217_v59  ;;  %v2868_v23 = vperm.slane %v2804_v24, %v5217_v59  ;;  %v2892_v24 = vperm.slane %v2846_v32, %v5190_v20 }
 0x4e1   : > { %v2874_v56 = vsel %vm1363_vm0, %v2873_v30, %v2872_v46  ;;  %v2869_v43 = vsel %vm1363_vm0, %v2868_v23, %v2867_v3  ;;  %v2885_v30 = vperm.slane %v2834_v26, %v5226_v17  ;;  %v2890_v3 = vperm.slane %v2843_v11, %v5226_v17 }
 0x4e2   : > { %v2871_v38 = vsel %vm1367_vm1, %v2870_v14, %v2869_v43 }
 0x4e6   : > { %v2822_v57 = vpop.permute.xlu0 %2821  ;;  %v2852_v33 = vpop.permute.xlu1 %2851 }
 0x4e7   : > { %v2878_v51 = vperm.slane %v2822_v57, %v5217_v59  ;;  %v2887_v57 = vperm.slane %v2837_v61, %v5190_v20 }
 0x4e9   : > { %v2879_v1 = vsel %vm1363_vm0, %v2878_v51, %v2877_v49  ;;  %v2895_v51 = vperm.slane %v2852_v33, %v5226_v17 }
 0x4ee   : > { %v2831_v13 = vpop.permute.xlu0 %2830 }
 0x4ef   : > { %v2883_v37 = vperm.slane %v2831_v13, %v5217_v59  ;;  %v2875_v13 = vperm.slane %v2816_v18, %v5226_v17  ;;  %v2866_v18 = vsel %vm1367_vm1, %v2865_v5, %v2864_v35  ;;  %v2897_v5 = vperm.slane %v2855_v58, %v5190_v20  ;;  %v1667_v58 = vpop.f32.mrf.mxu0 }
 0x4f1   : > { %v2884_v61 = vsel %vm1363_vm0, %v2883_v37, %v2882_v47  ;;  %v2861_v37 = vpop.permute.xlu1 %2860 }
 0x4f2   : > { %v2886_v26 = vsel %vm1367_vm1, %v2885_v30, %v2884_v61 }
 0x4f6   : > { %v2840_v45 = vpop.permute.xlu0 %2839 }
 0x4f7   : > { %v2888_v39 = vperm.slane %v2840_v45, %v5217_v59  ;;  %v2880_v45 = vperm.slane %v2825_v41, %v5226_v17  ;;  %v2902_v41 = vsel %vm881_vm7, %v2871_v38, %v2866_v18 }
 0x4f9   : > { %v2889_v2 = vsel %vm1363_vm0, %v2888_v39, %v2887_v57  ;;  %v2881_v49 = vsel %vm1367_vm1, %v2880_v45, %v2879_v1  ;;  %v2900_v57 = vperm.slane %v2861_v37, %v5226_v17 }
 0x4fa   : > { %v2891_v46 = vsel %vm1367_vm1, %v2890_v3, %v2889_v2  ;;  %v1670_v3 = vmax.f32 %v1667_v58, 1e-30 }
 0x4fe   : > { %v2849_v42 = vpop.permute.xlu0 %2848 }
 0x4ff   : > { %v2893_v50 = vperm.slane %v2849_v42, %v5217_v59  ;;  %v2876_v42 = vsel %vm1367_vm1, %v2875_v13, %v2874_v56 }
 0x500   : > { %v2903_v14 = vsel %vm883_vm8, %v2876_v42, %v2902_v41 }
 0x501   : > { %v2894_v32 = vsel %vm1363_vm0, %v2893_v50, %v2892_v24  ;;  %v2904_v11 = vsel %vm885_vm9, %v2881_v49, %v2903_v14 }
 0x502   : > { %v2896_v47 = vsel %vm1367_vm1, %v2895_v51, %v2894_v32  ;;  %v2905_v33 = vsel %vm887_vm11, %v2886_v26, %v2904_v11 }
 0x503   : > { %v2906_v50 = vsel %vm889_vm12, %v2891_v46, %v2905_v33 }
 0x504   : > { %v2907_v13 = vsel %vm891_vm13, %v2896_v47, %v2906_v50 }
 0x506   : > { %v2858_v23 = vpop.permute.xlu0 %2857 }
 0x507   : > { %v2898_v39 = vperm.slane %v2858_v23, %v5217_v59 }
 0x509   : > { %v2899_v56 = vsel %vm1363_vm0, %v2898_v39, %v2897_v5 }
 0x50a   : > { %v2901_v35 = vsel %vm1367_vm1, %v2900_v57, %v2899_v56 }
 0x50b   : > { %v2908_v43 = vsel %vm893_vm14, %v2901_v35, %v2907_v13 }
 0x50c   : > { %v2910_v1 = vsel %vm1412_vm2, %v2908_v43, -inf }
 0x50d   : > { %2911 = vmax.xlane.f32.xlu2 %v2910_v1 }
 0x519   : > { %v991_v24 = vpop.xlane.xlu1 %990 }
 0x51a   : > { %4153 = vrcp.f32 %v991_v24 }
 0x51b   : > { %4155 = vrcp.f32 %v1670_v3 }
 0x520   : > { %v4154_v45 = vpop.eup %4153 }
 0x521   : > { %v993_v38 = vmul.f32 %v4154_v45, %v991_v24  ;;  %v4156_v51 = vpop.eup %4155 }
 0x523   : > { %v994_v61 = vsub.f32 2.0, %v993_v38 }
 0x525   : > { %v5907_v30 = vmul.f32 %v4154_v45, %v994_v61 }
 0x527   : > { %v997_v42 = vperm.slane %v5907_v30, 0  ;;  %v1000_v18 = vperm.slane %v5907_v30, 3  ;;  %v1003_v32 = vperm.slane %v5907_v30, 6 }
 0x529   : > { %v5911_v2 = vmul.f32 %v5477_v34, %v997_v42  ;;  %v5916_v49 = vmul.f32 %v5531_v10, %v1000_v18  ;;  %v5921_v41 = vmul.f32 %v5509_v7, %v1003_v32  ;;  %v1672_v34 = vmul.f32 %v4156_v51, %v1670_v3 }
 0x52b   : > { %2174 = vperm.xlu2 %4017, %v5911_v2   ;;  %v1673_v37 = vsub.f32 2.0, %v1672_v34 }
 0x52d   : > { %v5925_v26 = vmul.f32 %v4156_v51, %v1673_v37 }
 0x52f   : > { %v1676_v10 = vperm.slane %v5925_v26, 0  ;;  %v1697_v14 = vperm.slane %v5925_v26, 3  ;;  %v1711_v46 = vperm.slane %v5925_v26, 5 }
 0x533   : > { %2183 = vperm.xlu2 %4017, %v5916_v49  }
 0x53b   : > { %2192 = vperm.xlu2 %4017, %v5921_v41  }
 0x543   : > { %4018 = vset.pattern.permute.xlu2 %v4649_v8 }
 0x54b   : > { %1681 = vperm.xlu2 %4018, %v1676_v10  }
 0x553   : > { %1702 = vperm.xlu2 %4018, %v1697_v14  }
 0x55b   : > { %1716 = vperm.xlu2 %4018, %v1711_v46  }
 0x563   : > { %4021 = vset.pattern.permute.xlu2 %v6676_v52 }
 0x580   : > { %v5931_v7 = vpop.xlane.xlu2 %2911 }
 0x581   : > { %v2914_v23 = vperm.slane %v5931_v7, 0  ;;  %v5935_v5 = vperm.slane %v5931_v7, 3  ;;  %v5938_v11 = vperm.slane %v5931_v7, 5  ;;  %v2915_v33 = vperm.slane %v5931_v7, 1 }
 0x582   : > { %v2916_v42 = vperm.slane %v5931_v7, 2 }
 0x583   : > { %v2940_v39 = vsub.f32 %v5801_v62, %v5935_v5  ;;  %v2931_v47 = vsub.f32 %v5759_v19, %v2914_v23  ;;  %v2930_v57 = vsub.f32 %v5638_v53, %v2914_v23  ;;  %v2947_v13 = vsub.f32 %v5790_v15, %v5938_v11 }
 0x584   : > { %v2934_v43 = vsub.f32 %v5756_v40, %v2915_v33  ;;  %v2933_v62 = vsub.f32 %v5768_v29, %v2915_v33  ;;  %v2935_v40 = vsub.f32 %v5776_v31, %v2915_v33  ;;  %v2932_v29 = vsub.f32 %v5720_v12, %v2914_v23 }
 0x585   : > { %v2974_v56 = vmul.f32 1.442695, %v2940_v39  ;;  %v2956_v50 = vmul.f32 1.442695, %v2931_v47  ;;  %v2954_v35 = vmul.f32 1.442695, %v2930_v57  ;;  %v2937_v12 = vsub.f32 %v5793_v55, %v2916_v42 }
 0x586   : > { %v2988_v19 = vmul.f32 1.442695, %v2947_v13  ;;  %v2962_v24 = vmul.f32 1.442695, %v2934_v43  ;;  %v2960_v45 = vmul.f32 1.442695, %v2933_v62  ;;  %v2936_v31 = vsub.f32 %v5785_v6, %v2916_v42 }
 0x587   : > { %4157 = vpow2.f32 %v2974_v56  ;;  %v2964_v58 = vmul.f32 1.442695, %v2935_v40  ;;  %v2958_v3 = vmul.f32 1.442695, %v2932_v29  ;;  %v2968_v34 = vmul.f32 1.442695, %v2937_v12 }
 0x588   : > { %4159 = vpow2.f32 %v2956_v50  ;;  %v5948_v1 = vpop.permute.xlu2 %2174  ;;  %v2966_v10 = vmul.f32 1.442695, %v2936_v31  ;;  %v2939_v23 = vsub.f32 %v5727_v60, %v5935_v5  ;;  %v2938_v55 = vsub.f32 %v5764_v28, %v2916_v42 }
 0x589   : > { %4161 = vpow2.f32 %v2954_v35  ;;  %v5995_v60 = vperm.slane %v5931_v7, 6  ;;  %v999_v43 = vperm.slane %v5907_v30, 2 }
 0x58a   : > { %4163 = vpow2.f32 %v2988_v19  ;;  %v2972_v6 = vmul.f32 1.442695, %v2939_v23  ;;  %v2970_v47 = vmul.f32 1.442695, %v2938_v55  ;;  %v998_v19 = vperm.slane %v5907_v30, 1 }
 0x58b   : > { %4165 = vpow2.f32 %v2962_v24  ;;  %v2950_v62 = vsub.f32 %v5798_v0, %v5995_v60  ;;  %v6014_v40 = vmul.f32 %v5488_v44, %v999_v43  ;;  %v1001_v0 = vperm.slane %v5907_v30, 4 }
 0x58c   : > { %4167 = vpow2.f32 %v2960_v45  ;;  %v1683_v55 = vperm.slane %v5925_v26, 1  ;;  %v1718_v43 = vperm.slane %v5925_v26, 6 }
 0x58d   : > { %v5951_v53 = vpop.eup %4157  ;;  %4169 = vpow2.f32 %v2964_v58  ;;  %v2994_v29 = vmul.f32 1.442695, %v2950_v62  ;;  %v6017_v58 = vmul.f32 %v5522_v25, %v998_v19  ;;  %v6025_v44 = vmul.f32 %v5499_v63, %v1001_v0  ;;  %v6073_v19 = vpop.xlane.xlu1 %2494 }
 0x58e   : > { %v5953_v38 = vpop.eup %4159  ;;  %3057 = vperm.xlu2 %4021, %v5951_v53   ;;  %4171 = vpow2.f32 %v2958_v3  ;;  %v1004_v25 = vperm.slane %v5907_v30, 7  ;;  %v2918_v63 = vperm.slane %v5931_v7, 4 }
 0x58f   : > { %v5956_v61 = vpop.eup %4161  ;;  %3030 = vperm.xlu1 %4013, %v5953_v38   ;;  %4173 = vpow2.f32 %v2968_v34  ;;  %v1690_v34 = vperm.slane %v5925_v26, 2 }
 0x590   : > { %3027 = vperm.xlu0 %4015, %v5956_v61   ;;  %v5962_v15 = vpop.permute.xlu2 %2183  ;;  %v5965_v18 = vpop.eup %4163  ;;  %4175 = vpow2.f32 %v2966_v10  ;;  %v6033_v31 = vmul.f32 %v5552_v27, %v1004_v25  ;;  %v2942_v27 = vsub.f32 %v5734_v4, %v2918_v63  ;;  %v1704_v10 = vperm.slane %v5925_v26, 4 }
 0x591   : > { %v5967_v32 = vpop.eup %4165  ;;  %4177 = vpow2.f32 %v2972_v6 }
 0x592   : > { %v5970_v51 = vpop.eup %4167  ;;  %4179 = vpow2.f32 %v2970_v47  ;;  %v2978_v23 = vmul.f32 1.442695, %v2942_v27 }
 0x593   : > { %v5978_v14 = vpop.eup %4169  ;;  %4181 = vpow2.f32 %v2994_v29 }
 0x594   : > { %v5980_v46 = vpop.eup %4171 }
 0x595   : > { %v5987_v57 = vpop.eup %4173 }
 0x596   : > { %3078 = vperm.xlu2 %4021, %v5965_v18   ;;  %v5990_v56 = vpop.eup %4175 }
 0x597   : > { %3039 = vperm.xlu1 %4013, %v5967_v32   ;;  %v5997_v50 = vpop.eup %4177 }
 0x598   : > { %3036 = vperm.xlu0 %4015, %v5970_v51   ;;  %v5976_v37 = vpop.permute.xlu2 %2192  ;;  %v6000_v13 = vpop.eup %4179 }
 0x599   : > { %v6027_v12 = vpop.eup %4181 }
 0x59f   : > { %3042 = vperm.xlu1 %4013, %v5978_v14  }
 0x5a0   : > { %3033 = vperm.xlu0 %4015, %v5980_v46  }
 0x5a5   : > { %v1682_v39 = vpop.permute.xlu2 %1681 }
 0x5a6   : > { %v1740_v33 = vmul.f32 %v1682_v39, %v5911_v2  ;;  %v1002_v2 = vperm.slane %v5907_v30, 5  ;;  %v2941_v30 = vsub.f32 %v5773_v21, %v5935_v5  ;;  %v2943_v39 = vsub.f32 %v5808_v48, %v2918_v63 }
 0x5a7   : > { %3048 = vperm.xlu1 %4013, %v5987_v57   ;;  %v2946_v48 = vsub.f32 %v5813_v16, %v5938_v11  ;;  %v6714_v16 = vld [vmem:[#allocation37_spill] sm:$0xff] }
 0x5a8   : > { %3045 = vperm.xlu0 %4015, %v5990_v56   ;;  %1757 = vperm.xlu2 %4021, %v1740_v33   ;;  %v1018_v24 = vmul.f32 %v5540_v22, %v1002_v2  ;;  %v2976_v6 = vmul.f32 1.442695, %v2941_v30  ;;  %v2980_v33 = vmul.f32 1.442695, %v2943_v39  ;;  %v2948_v29 = vsub.f32 %v6714_v16, %v5995_v60 }
 0x5a9   : > { %v2986_v2 = vmul.f32 1.442695, %v2946_v48 }
 0x5ad   : > { %v1703_v28 = vpop.permute.xlu2 %1702 }
 0x5ae   : > { %v1743_v35 = vmul.f32 %v1703_v28, %v5916_v49  ;;  %v6011_v49 = vperm.slane %v5931_v7, 7  ;;  %v2944_v7 = vsub.f32 %v5781_v9, %v2918_v63  ;;  %v2945_v28 = vsub.f32 %v5739_v54, %v5938_v11 }
 0x5af   : > { %3054 = vperm.xlu1 %4013, %v5997_v50   ;;  %v2990_v54 = vmul.f32 1.442695, %v2948_v29 }
 0x5b0   : > { %3051 = vperm.xlu0 %4015, %v6000_v13   ;;  %1766 = vperm.xlu2 %4021, %v1743_v35   ;;  %v2953_v22 = vsub.f32 %v5805_v36, %v6011_v49  ;;  %v2982_v47 = vmul.f32 1.442695, %v2944_v7  ;;  %v1725_v35 = vperm.slane %v5925_v26, 7  ;;  %v2984_v62 = vmul.f32 1.442695, %v2945_v28 }
 0x5b2   : > { %v3000_v3 = vmul.f32 1.442695, %v2953_v22 }
 0x5b4   : > { %4183 = vpow2.f32 %v3000_v3 }
 0x5b5   : > { %v1717_v45 = vpop.permute.xlu2 %1716  ;;  %4185 = vpow2.f32 %v2978_v23 }
 0x5b6   : > { %v1745_v42 = vmul.f32 %v1717_v45, %v1018_v24  ;;  %4187 = vpow2.f32 %v2976_v6 }
 0x5b7   : > { %2180 = vperm.xlu1 %4013, %v6014_v40   ;;  %4189 = vpow2.f32 %v2982_v47 }
 0x5b8   : > { %2177 = vperm.xlu0 %4015, %v6017_v58   ;;  %1772 = vperm.xlu2 %4021, %v1745_v42   ;;  %4191 = vpow2.f32 %v2980_v33 }
 0x5b9   : > { %4193 = vpow2.f32 %v2986_v2 }
 0x5ba   : > { %v6035_v36 = vpop.eup %4183  ;;  %4195 = vpow2.f32 %v2984_v62 }
 0x5bb   : > { %6712 = vst [vmem:[#allocation39_spill] sm:$0xff] %v6035_v36  ;;  %v6051_v4 = vpop.eup %4185 }
 0x5bc   : > { %v6054_v21 = vpop.eup %4187 }
 0x5bd   : > { %v6059_v9 = vpop.eup %4189 }
 0x5be   : > { %v6061_v5 = vpop.eup %4191 }
 0x5bf   : > { %2189 = vperm.xlu1 %4013, %v1018_v24   ;;  %v6713_v24 = vld [vmem:[#allocation38_spill] sm:$0xff]  ;;  %v6079_v11 = vpop.eup %4193 }
 0x5c0   : > { %2186 = vperm.xlu0 %4015, %v6025_v44   ;;  %3087 = vperm.xlu2 %4021, %v6027_v12   ;;  %v2949_v45 = vsub.f32 %v6713_v24, %v5995_v60  ;;  %v6082_v26 = vpop.eup %4195 }
 0x5c2   : > { %v2992_v42 = vmul.f32 1.442695, %v2949_v45 }
 0x5c4   : > { %4197 = vpow2.f32 %v2992_v42 }
 0x5c5   : > { %4199 = vpow2.f32 %v2990_v54 }
 0x5c7   : > { %4020 = vset.pattern.permute.xlu1 %v4649_v8 }
 0x5c8   : > { %2195 = vperm.xlu0 %4015, %v6033_v31   ;;  %3096 = vperm.xlu2 %4021, %v6035_v36  }
 0x5ca   : > { %v6087_v3 = vpop.eup %4197 }
 0x5cb   : > { %v6089_v60 = vpop.eup %4199 }
 0x5cf   : > { %1695 = vperm.xlu1 %4020, %v1690_v34  }
 0x5d0   : > { %4019 = vset.pattern.permute.xlu0 %v4649_v8  ;;  %4028 = vset.pattern.permute.xlu2 %v4649_v8 }
 0x5d7   : > { %1709 = vperm.xlu1 %4020, %v1704_v10  }
 0x5d8   : > { %1688 = vperm.xlu0 %4019, %v1683_v55  }
 0x5df   : > { %4023 = vset.pattern.permute.xlu1 %v6676_v52 }
 0x5e0   : > { %4022 = vset.pattern.permute.xlu0 %v6676_v52  ;;  %3063 = vperm.xlu1 %4023, %v6051_v4  }
 0x5e1   : > { %3060 = vperm.xlu0 %4022, %v6054_v21  }
 0x5e8   : > { %3069 = vperm.xlu1 %4023, %v6059_v9  }
 0x5e9   : > { %3066 = vperm.xlu0 %4022, %v6061_v5  }
 0x5f0   : > { %4026 = vset.pattern.permute.xlu1 %v4649_v8 }
 0x5f1   : > { %4024 = vset.pattern.permute.xlu0 %v4649_v8 }
 0x5f8   : > { %1730 = vperm.xlu1 %4026, %v1725_v35  }
 0x5f9   : > { %1723 = vperm.xlu0 %4024, %v1718_v43  }
 0x600   : > { %4027 = vset.pattern.permute.xlu1 %v6676_v52 }
 0x601   : > { %4025 = vset.pattern.permute.xlu0 %v6676_v52  ;;  %3075 = vperm.xlu1 %4027, %v6079_v11   ;;  %v3031_v22 = vpop.permute.xlu1 %3030 }
 0x602   : > { %3072 = vperm.xlu0 %4025, %v6082_v26   ;;  %v3028_v0 = vpop.permute.xlu0 %3027  ;;  %v3099_v30 = vperm.slane %v3031_v22, %v5217_v59  ;;  %v6111_v22 = vadd.s32 4294967272, %v5190_v20 }
 0x603   : > { %v3098_v10 = vperm.slane %v3028_v0, %v5190_v20 }
 0x605   : > { %v3100_v47 = vsel %vm1363_vm0, %v3099_v30, %v3098_v10 }
 0x609   : > { %3084 = vperm.xlu1 %4027, %v6087_v3   ;;  %v3040_v25 = vpop.permute.xlu1 %3039 }
 0x60a   : > { %3081 = vperm.xlu0 %4025, %v6089_v60   ;;  %v3037_v63 = vpop.permute.xlu0 %3036  ;;  %v3104_v34 = vperm.slane %v3040_v25, %v5217_v59 }
 0x60b   : > { %v3103_v27 = vperm.slane %v3037_v63, %v5190_v20 }
 0x60d   : > { %v3105_v7 = vsel %vm1363_vm0, %v3104_v34, %v3103_v27  ;;  %v2198_v34 = vperm.slane %v5948_v1, %v6111_v22 }
 0x611   : > { %v3043_v23 = vpop.permute.xlu1 %3042 }
 0x612   : > { %v3106_v55 = vperm.slane %v3043_v23, %v5226_v17  ;;  %v3034_v6 = vpop.permute.xlu0 %3033  ;;  %v2201_v23 = vperm.slane %v5962_v15, %v6111_v22 }
 0x613   : > { %v3101_v39 = vperm.slane %v3034_v6, %v5226_v17 }
 0x614   : > { %v3107_v33 = vsel %vm1367_vm1, %v3106_v55, %v3105_v7 }
 0x615   : > { %v3102_v48 = vsel %vm1367_vm1, %v3101_v39, %v3100_v47 }
 0x616   : > { %v3138_v28 = vsel %vm881_vm7, %v3107_v33, %v3102_v48  ;;  %v2204_v48 = vperm.slane %v5976_v37, %v6111_v22  ;;  %v3058_v37 = vpop.permute.xlu2 %3057 }
 0x619   : > { %v3049_v35 = vpop.permute.xlu1 %3048 }
 0x61a   : > { %v3046_v2 = vpop.permute.xlu0 %3045  ;;  %v3109_v43 = vperm.slane %v3049_v35, %v5217_v59 }
 0x61b   : > { %v3108_v62 = vperm.slane %v3046_v2, %v5190_v20 }
 0x61d   : > { %v3110_v29 = vsel %vm1363_vm0, %v3109_v43, %v3108_v62 }
 0x621   : > { %v3055_v24 = vpop.permute.xlu1 %3054 }
 0x622   : > { %v3052_v45 = vpop.permute.xlu0 %3051 }
 0x623   : > { %v3111_v16 = vperm.slane %v3052_v45, %v5226_v17 }
 0x625   : > { %v3112_v42 = vsel %vm1367_vm1, %v3111_v16, %v3110_v29 }
 0x626   : > { %v3139_v54 = vsel %vm883_vm8, %v3112_v42, %v3138_v28 }
 0x629   : > { %v2181_v0 = vpop.permute.xlu1 %2180 }
 0x62a   : > { %v2178_v25 = vpop.permute.xlu0 %2177  ;;  %v2200_v27 = vperm.slane %v2181_v0, %v6111_v22  ;;  %v3113_v0 = vperm.slane %v3055_v24, %v5190_v20 }
 0x62b   : > { %v2199_v63 = vperm.slane %v2178_v25, %v6111_v22 }
 0x62d   : > { %v2206_v30 = vsel %vm881_vm7, %v2199_v63, %v2198_v34  ;;  %v3114_v63 = vperm.slane %v3058_v37, %v5217_v59  ;;  %v4212_v37 = vld [vmem:[%s6524_s9] sm:$0xff] }
 0x62e   : > { %v2207_v10 = vsel %vm883_vm8, %v2200_v27, %v2206_v30 }
 0x62f   : > { %v2208_v39 = vsel %vm885_vm9, %v2201_v23, %v2207_v10 }
 0x631   : > { %v2190_v55 = vpop.permute.xlu1 %2189 }
 0x632   : > { %v2187_v6 = vpop.permute.xlu0 %2186  ;;  %v2203_v47 = vperm.slane %v2190_v55, %v6111_v22 }
 0x633   : > { %v2202_v7 = vperm.slane %v2187_v6, %v6111_v22 }
 0x635   : > { %v2209_v33 = vsel %vm887_vm11, %v2202_v7, %v2208_v39 }
 0x636   : > { %v2210_v1 = vsel %vm889_vm12, %v2203_v47, %v2209_v33  ;;  %v6715_v47 = vld [vmem:[#allocation41_spill] sm:$0xff] }
 0x637   : > { %v2211_v15 = vsel %vm891_vm13, %v2204_v48, %v2210_v1  ;;  %v2952_v33 = vsub.f32 %v6715_v47, %v6011_v49 }
 0x63a   : > { %v2196_v28 = vpop.permute.xlu0 %2195 }
 0x63b   : > { %v2205_v35 = vperm.slane %v2196_v28, %v6111_v22  ;;  %v2998_v28 = vmul.f32 1.442695, %v2952_v33 }
 0x63d   : > { %v6131_v2 = vsel %vm893_vm14, %v2205_v35, %v2211_v15  ;;  %4201 = vpow2.f32 %v2998_v28 }
 0x641   : > { %v1696_v43 = vpop.permute.xlu1 %1695 }
 0x642   : > { %v1742_v62 = vmul.f32 %v1696_v43, %v6014_v40  ;;  %v3115_v40 = vsel %vm1363_vm0, %v3114_v63, %v3113_v0  ;;  %v3079_v0 = vpop.permute.xlu2 %3078 }
 0x644   : > { %1763 = vperm.xlu1 %4027, %v1742_v62  }
 0x649   : > { %v1710_v45 = vpop.permute.xlu1 %1709 }
 0x64a   : > { %v1744_v16 = vmul.f32 %v1710_v45, %v6025_v44  ;;  %v1689_v29 = vpop.permute.xlu0 %1688  ;;  %v6156_v45 = vpop.eup %4201 }
 0x64b   : > { %v1741_v42 = vmul.f32 %v1689_v29, %v6017_v58  ;;  %v6719_v29 = vld [vmem:[#allocation23_spill] sm:$0xff] }
 0x64c   : > { %1769 = vperm.xlu1 %4027, %v1744_v16  }
 0x64d   : > { %1760 = vperm.xlu0 %4025, %v1741_v42   ;;  %v4211_v42 = vld [vmem:[%s6524_s9 + $0x8] sm:$0xff] }
 0x652   : > { %v3064_v25 = vpop.permute.xlu1 %3063 }
 0x653   : > { %v3061_v34 = vpop.permute.xlu0 %3060  ;;  %v3118_v55 = vperm.slane %v3064_v25, %v5190_v20 }
 0x654   : > { %v3116_v27 = vperm.slane %v3061_v34, %v5226_v17  ;;  %v1758_v34 = vpop.permute.xlu2 %1757 }
 0x656   : > { %v3117_v30 = vsel %vm1367_vm1, %v3116_v27, %v3115_v40 }
 0x657   : > { %v3140_v44 = vsel %vm885_vm9, %v3117_v30, %v3139_v54  ;;  %v6716_v54 = vld [vmem:[#allocation29_spill] sm:$0xff] }
 0x658   : > { %v2951_v1 = vsub.f32 %v6716_v54, %v6011_v49  ;;  %v6718_v49 = vld [vmem:[#allocation22_spill] sm:$0xff] }
 0x65a   : > { %v3070_v10 = vpop.permute.xlu1 %3069  ;;  %v2996_v43 = vmul.f32 1.442695, %v2951_v1 }
 0x65b   : > { %v3121_v58 = vperm.slane %v3070_v10, %v5226_v17  ;;  %v3067_v23 = vpop.permute.xlu0 %3066 }
 0x65c   : > { %v3119_v24 = vperm.slane %v3067_v23, %v5217_v59  ;;  %4203 = vpow2.f32 %v2996_v43  ;;  %v1767_v30 = vpop.permute.xlu2 %1766 }
 0x65d   : > { %v1783_v33 = vperm.slane %v1767_v30, %v5190_v20 }
 0x65e   : > { %v3120_v6 = vsel %vm1363_vm0, %v3119_v24, %v3118_v55  ;;  %v1780_v55 = vperm.slane %v1758_v34, %v5190_v20 }
 0x65f   : > { %v3122_v7 = vsel %vm1367_vm1, %v3121_v58, %v3120_v6 }
 0x660   : > { %v6148_v39 = vsel %vm887_vm11, %v3122_v7, %v3140_v44 }
 0x662   : > { %v6158_v16 = vpop.eup %4203 }
 0x663   : > { %6717 = vst [vmem:[#allocation27_spill] sm:$0xff] %v6158_v16 }
 0x664   : > { %v1773_v23 = vpop.permute.xlu2 %1772 }
 0x66a   : > { %v1731_v48 = vpop.permute.xlu1 %1730 }
 0x66b   : > { %v1747_v35 = vmul.f32 %v1731_v48, %v6033_v31  ;;  %v1724_v15 = vpop.permute.xlu0 %1723  ;;  %v4210_v31 = vld [vmem:[%s6524_s9 + $0x10] sm:$0xff] }
 0x66c   : > { %v1746_v62 = vmul.f32 %v1724_v15, %v5921_v41  ;;  %v6167_v41 = vld [vmem:[%s6720_s24] sm:$0x7]  ;;  %v3088_v1 = vpop.permute.xlu2 %3087  ;;  %v1785_v15 = vperm.slane %v1773_v23, %v5190_v20 }
 0x66d   : > { %1778 = vperm.xlu1 %4027, %v1747_v35   ;;  %3907 = vmatpush.msk.msrb.mxu1 %vm796_vm4, %v6167_v41 }
 0x66e   : > { %1775 = vperm.xlu0 %4025, %v1746_v62  }
 0x66f   : > { %3160 = vmatpush.msra.mxu1 %v4210_v31 }
 0x671   : > { %3161 = vmatpush.msra.mxu1 %v4211_v42 }
 0x673   : > { %3162 = vmatpush.msra.mxu1 %v4212_v37  ;;  %v3076_v25 = vpop.permute.xlu1 %3075 }
 0x674   : > { %v3073_v63 = vpop.permute.xlu0 %3072  ;;  %v3124_v31 = vperm.slane %v3076_v25, %v5217_v59  ;;  %v3126_v25 = vperm.slane %v3079_v0, %v5226_v17 }
 0x675   : > { %3093 = vperm.xlu1 %4027, %v6156_v45   ;;  %v3123_v42 = vperm.slane %v3073_v63, %v5190_v20 }
 0x676   : > { %3090 = vperm.xlu0 %4025, %v6158_v16  }
 0x677   : > { %v3125_v23 = vsel %vm1363_vm0, %v3124_v31, %v3123_v42 }
 0x67b   : > { %v3085_v27 = vpop.permute.xlu1 %3084 }
 0x67c   : > { %v3082_v40 = vpop.permute.xlu0 %3081  ;;  %v3129_v34 = vperm.slane %v3085_v27, %v5217_v59 }
 0x67d   : > { %4030 = vset.pattern.permute.xlu1 %v6718_v49  ;;  %v3128_v30 = vperm.slane %v3082_v40, %v5190_v20  ;;  %v3127_v40 = vsel %vm1367_vm1, %v3126_v25, %v3125_v23 }
 0x67e   : > { %4029 = vset.pattern.permute.xlu0 %v6719_v29  ;;  %v3142_v0 = vsel %vm889_vm12, %v3127_v40, %v6148_v39 }
 0x67f   : > { %v3130_v63 = vsel %vm1363_vm0, %v3129_v34, %v3128_v30 }
 0x6b6   : > { %v1764_v44 = vpop.permute.xlu1 %1763 }
 0x6b7   : > { %v1782_v6 = vperm.slane %v1764_v44, %v5190_v20 }
 0x6be   : > { %v1770_v7 = vpop.permute.xlu1 %1769 }
 0x6bf   : > { %v1761_v10 = vpop.permute.xlu0 %1760  ;;  %v1784_v48 = vperm.slane %v1770_v7, %v5190_v20 }
 0x6c0   : > { %v1781_v58 = vperm.slane %v1761_v10, %v5190_v20 }
 0x6c2   : > { %v1788_v24 = vsel %vm881_vm7, %v1781_v58, %v1780_v55  ;;  %v3131_v55 = vperm.slane %v3088_v1, %v5226_v17 }
 0x6c3   : > { %v1789_v47 = vsel %vm883_vm8, %v1782_v6, %v1788_v24  ;;  %v3097_v24 = vpop.permute.xlu2 %3096 }
 0x6c4   : > { %v1790_v54 = vsel %vm885_vm9, %v1783_v33, %v1789_v47  ;;  %v3132_v47 = vsel %vm1367_vm1, %v3131_v55, %v3130_v63 }
 0x6c5   : > { %v1791_v35 = vsel %vm887_vm11, %v1784_v48, %v1790_v54  ;;  %v3136_v54 = vperm.slane %v3097_v24, %v5226_v17 }
 0x6c6   : > { %v1792_v44 = vsel %vm889_vm12, %v1785_v15, %v1791_v35 }
 0x6df   : > { %v1779_v28 = vpop.permute.xlu1 %1778 }
 0x6e0   : > { %v1787_v43 = vperm.slane %v1779_v28, %v5190_v20  ;;  %v1776_v62 = vpop.permute.xlu0 %1775  ;;  %v3143_v28 = vsel %vm891_vm13, %v3132_v47, %v3142_v0 }
 0x6e1   : > { %v1786_v37 = vperm.slane %v1776_v62, %v5190_v20 }
 0x6e3   : > { %v1793_v10 = vsel %vm891_vm13, %v1786_v37, %v1792_v44 }
 0x6e4   : > { %v1794_v58 = vsel %vm893_vm14, %v1787_v43, %v1793_v10 }
 0x6e5   : > { %3908 = vmatmul.msk.f32.vlgmr.msrb.gmra.mxu1 %vm896_vm15, %v1794_v58 }
 0x6e7   : > { %v3094_v27 = vpop.permute.xlu1 %3093 }
 0x6e8   : > { %v3134_v6 = vperm.slane %v3094_v27, %v5217_v59  ;;  %v3091_v7 = vpop.permute.xlu0 %3090 }
 0x6e9   : > { %v3133_v33 = vperm.slane %v3091_v7, %v5190_v20  ;;  %v6721_v7 = vld [vmem:[#allocation52_spill] sm:$0xff] }
 0x6eb   : > { %v3135_v48 = vsel %vm1363_vm0, %v3134_v6, %v3133_v33 }
 0x6ec   : > { %v3137_v1 = vsel %vm1367_vm1, %v3136_v54, %v3135_v48 }
 0x6ed   : > { %v3144_v35 = vsel %vm893_vm14, %v3137_v1, %v3143_v28 }
 0x6ee   : > { %3912 = vmatmul.msk.f32.vlgmr.msra.gmra.mxu1 %vm1412_vm2, %v3144_v35 }
 0x762   : > { %v1817_v15 = vpop.f32.mrf.mxu1 }
 0x763   : > { %v1821_v43 = vperm.slane %v1817_v15, 0  ;;  %v1840_v62 = vperm.slane %v1817_v15, 1  ;;  %v1859_v39 = vperm.slane %v1817_v15, 2  ;;  %v1878_v31 = vperm.slane %v1817_v15, 3 }
 0x764   : > { %v1897_v34 = vperm.slane %v1817_v15, 4  ;;  %v1916_v30 = vperm.slane %v1817_v15, 5  ;;  %v1954_v23 = vperm.slane %v1817_v15, 7  ;;  %v1935_v24 = vperm.slane %v1817_v15, 6 }
 0x765   : > { %1838 = vperm.xlu1 %4030, %v1821_v43   ;;  %1832 = vperm.xlu0 %4029, %v1821_v43  }
 0x766   : > { %1826 = vperm.xlu2 %4028, %v1821_v43   ;;  %v6722_v43 = vld [vmem:[#allocation49_spill] sm:$0xff] }
 0x76b   : > { %v3164_v42 = vpop.f32.mrf.mxu1 }
 0x76c   : > { %v3167_v37 = vmax.f32 %v3164_v42, 1e-30 }
 0x76d   : > { %4031 = vset.pattern.permute.xlu1 %v6719_v29  ;;  %4033 = vset.pattern.permute.xlu0 %v4649_v8 }
 0x76e   : > { %1845 = vperm.xlu2 %4028, %v1840_v62   ;;  %4205 = vrcp.f32 %v3167_v37 }
 0x76f   : > { %4207 = vrcp.f32 %v6073_v19 }
 0x774   : > { %v4206_v44 = vpop.eup %4205 }
 0x775   : > { %1851 = vperm.xlu1 %4031, %v1840_v62   ;;  %1864 = vperm.xlu0 %4033, %v1859_v39   ;;  %v3169_v10 = vmul.f32 %v4206_v44, %v3167_v37  ;;  %v6723_v37 = vld [vmem:[#allocation56_spill] sm:$0xff] }
 0x776   : > { %4032 = vset.pattern.permute.xlu2 %v6718_v49 }
 0x777   : > { %v3170_v58 = vsub.f32 2.0, %v3169_v10 }
 0x779   : > { %v3171_v25 = vmul.f32 %v4206_v44, %v3170_v58  ;;  %v6724_v44 = vld [vmem:[#allocation51_spill] sm:$0xff]  ;;  %v6725_v58 = vld [vmem:[#allocation48_spill] sm:$0xff] }
 0x77b   : > { %v3173_v63 = vperm.slane %v3171_v25, 0  ;;  %v3208_v55 = vperm.slane %v3171_v25, 5  ;;  %v3180_v40 = vperm.slane %v3171_v25, 1  ;;  %v3194_v54 = vperm.slane %v3171_v25, 3 }
 0x77c   : > { %v3187_v0 = vperm.slane %v3171_v25, 2  ;;  %v3215_v1 = vperm.slane %v3171_v25, 6  ;;  %v3201_v28 = vperm.slane %v3171_v25, 4 }
 0x77d   : > { %1870 = vperm.xlu1 %4031, %v1859_v39   ;;  %4036 = vset.pattern.permute.xlu0 %v6718_v49 }
 0x77e   : > { %1857 = vperm.xlu2 %4032, %v1840_v62  }
 0x785   : > { %4034 = vset.pattern.permute.xlu1 %v4649_v8  ;;  %1895 = vperm.xlu0 %4036, %v1878_v31  }
 0x786   : > { %1876 = vperm.xlu2 %4032, %v1859_v39   ;;  %v3222_v39 = vperm.slane %v3171_v25, 7  ;;  %v6726_v25 = vld [vmem:[#allocation47_spill] sm:$0xff] }
 0x78d   : > { %1883 = vperm.xlu1 %4034, %v1878_v31   ;;  %4039 = vset.pattern.permute.xlu0 %v6719_v29 }
 0x78e   : > { %4035 = vset.pattern.permute.xlu2 %v6719_v29 }
 0x795   : > { %1902 = vperm.xlu1 %4034, %v1897_v34   ;;  %1927 = vperm.xlu0 %4039, %v1916_v30  }
 0x796   : > { %1889 = vperm.xlu2 %4035, %v1878_v31  }
 0x79d   : > { %4037 = vset.pattern.permute.xlu1 %v6718_v49  ;;  %4042 = vset.pattern.permute.xlu0 %v4649_v8 }
 0x79e   : > { %1908 = vperm.xlu2 %4035, %v1897_v34  }
 0x7a5   : > { %1914 = vperm.xlu1 %4037, %v1897_v34   ;;  %1959 = vperm.xlu0 %4042, %v1954_v23  }
 0x7a6   : > { %4038 = vset.pattern.permute.xlu2 %v4649_v8 }
 0x7ad   : > { %1933 = vperm.xlu1 %4037, %v1916_v30   ;;  %3178 = vperm.xlu0 %4042, %v3173_v63  }
 0x7ae   : > { %1921 = vperm.xlu2 %4038, %v1916_v30  }
 0x7b5   : > { %4040 = vset.pattern.permute.xlu1 %v6719_v29  ;;  %3213 = vperm.xlu0 %4042, %v3208_v55  }
 0x7b6   : > { %1940 = vperm.xlu2 %4038, %v1935_v24  }
 0x7bd   : > { %1946 = vperm.xlu1 %4040, %v1935_v24   ;;  %4047 = vset.pattern.permute.xlu0 %v6676_v52 }
 0x7be   : > { %4041 = vset.pattern.permute.xlu2 %v6718_v49 }
 0x7c0   : > { %v1827_v27 = vpop.permute.xlu2 %1826 }
 0x7c1   : > { %v1997_v62 = vmul.f32 %v6722_v43, %v1827_v27 }
 0x7c5   : > { %1965 = vperm.xlu1 %4040, %v1954_v23  }
 0x7c6   : > { %1952 = vperm.xlu2 %4041, %v1935_v24   ;;  %v6727_v24 = vld [vmem:[#allocation54_spill] sm:$0xff] }
 0x7c8   : > { %v1846_v33 = vpop.permute.xlu2 %1845 }
 0x7c9   : > { %v2000_v10 = vmul.f32 %v6724_v44, %v1846_v33 }
 0x7cd   : > { %4043 = vset.pattern.permute.xlu1 %v4649_v8 }
 0x7ce   : > { %1971 = vperm.xlu2 %4041, %v1954_v23  }
 0x7d5   : > { %3185 = vperm.xlu1 %4043, %v3180_v40   ;;  %v6728_v40 = vld [vmem:[#allocation55_spill] sm:$0xff] }
 0x7d6   : > { %4044 = vset.pattern.permute.xlu2 %v4649_v8 }
 0x7d7   : > { %v1839_v6 = vpop.permute.xlu1 %1838  ;;  %v1833_v31 = vpop.permute.xlu0 %1832 }
 0x7d8   : > { %v1999_v47 = vmul.f32 %v6721_v7, %v1839_v6  ;;  %v1858_v48 = vpop.permute.xlu2 %1857  ;;  %v1998_v23 = vmul.f32 %v6725_v58, %v1833_v31  ;;  %v6732_v31 = vld [vmem:[#allocation64_spill] sm:$0xff] }
 0x7d9   : > { %v2002_v27 = vmul.f32 %v6727_v24, %v1858_v48  ;;  %v6733_v48 = vld [vmem:[#allocation61_spill] sm:$0xff] }
 0x7da   : > { %2052 = vperm.xlu0 %4047, %v1999_v47  }
 0x7dd   : > { %3199 = vperm.xlu1 %4043, %v3194_v54   ;;  %v6729_v54 = vld [vmem:[#allocation63_spill] sm:$0xff] }
 0x7de   : > { %3192 = vperm.xlu2 %4044, %v3187_v0   ;;  %v6730_v0 = vld [vmem:[#allocation59_spill] sm:$0xff] }
 0x7e0   : > { %v1877_v15 = vpop.permute.xlu2 %1876 }
 0x7e5   : > { %3220 = vperm.xlu1 %4043, %v3215_v1   ;;  %v2005_v1 = vmul.f32 %v6730_v0, %v1877_v15 }
 0x7e6   : > { %3206 = vperm.xlu2 %4044, %v3201_v28   ;;  %v6731_v28 = vld [vmem:[#allocation57_spill] sm:$0xff] }
 0x7e7   : > { %v1852_v35 = vpop.permute.xlu1 %1851  ;;  %v1865_v63 = vpop.permute.xlu0 %1864 }
 0x7e8   : > { %v2001_v6 = vmul.f32 %v6728_v40, %v1852_v35  ;;  %v2003_v43 = vmul.f32 %v6731_v28, %v1865_v63  ;;  %v6738_v40 = vld [vmem:[#allocation50_spill] sm:$0xff] }
 0x7ed   : > { %4045 = vset.pattern.permute.xlu1 %v6676_v52 }
 0x7ee   : > { %3227 = vperm.xlu2 %4044, %v3222_v39   ;;  %2046 = vperm.xlu1 %4045, %v1997_v62  }
 0x7ef   : > { %v1871_v42 = vpop.permute.xlu1 %1870 }
 0x7f0   : > { %v2004_v34 = vmul.f32 %v6723_v37, %v1871_v42  ;;  %v1890_v30 = vpop.permute.xlu2 %1889  ;;  %v6734_v37 = vld [vmem:[#allocation58_spill] sm:$0xff] }
 0x7f1   : > { %v2007_v55 = vmul.f32 %v6726_v25, %v1890_v30 }
 0x7f2   : > { %2067 = vperm.xlu0 %4047, %v2004_v34  }
 0x7f6   : > { %4046 = vset.pattern.permute.xlu2 %v6676_v52  ;;  %2055 = vperm.xlu1 %4045, %v2000_v10   ;;  %v6735_v10 = vld [vmem:[#allocation60_spill] sm:$0xff] }
 0x7f7   : > { %2049 = vperm.xlu2 %4046, %v1998_v23   ;;  %v1896_v47 = vpop.permute.xlu0 %1895  ;;  %v6736_v23 = vld [vmem:[#allocation62_spill] sm:$0xff] }
 0x7f8   : > { %v1909_v7 = vpop.permute.xlu2 %1908  ;;  %v2008_v35 = vmul.f32 %v6733_v48, %v1896_v47  ;;  %v4208_v47 = vpop.eup %4207 }
 0x7f9   : > { %v2010_v33 = vmul.f32 %v6729_v54, %v1909_v7  ;;  %v6739_v54 = vld [vmem:[#allocation67_spill] sm:$0xff]  ;;  %v2497_v0 = vmul.f32 %v4208_v47, %v6073_v19 }
 0x7fa   : > { %2076 = vperm.xlu0 %4047, %v2007_v55   ;;  %v6737_v55 = vld [vmem:[#allocation65_spill] sm:$0xff] }
 0x7fe   : > { %2061 = vperm.xlu1 %4045, %v2002_v27  }
 0x7ff   : > { %2058 = vperm.xlu2 %4046, %v2001_v6   ;;  %v1884_v62 = vpop.permute.xlu1 %1883 }
 0x800   : > { %v2006_v34 = vmul.f32 %v6734_v37, %v1884_v62  ;;  %v2498_v62 = vsub.f32 2.0, %v2497_v0  ;;  %v6742_v37 = vld [vmem:[#allocation28_spill] sm:$0xff] }
 0x802   : > { %2085 = vperm.xlu0 %4047, %v2010_v33   ;;  %v2499_v48 = vmul.f32 %v4208_v47, %v2498_v62  ;;  %v6747_v47 = vld [vmem:[#allocation31_spill] sm:$0xff] }
 0x804   : > { %v2508_v62 = vperm.slane %v2499_v48, 7 }
 0x806   : > { %2070 = vperm.xlu1 %4045, %v2005_v1   ;;  %v6740_v1 = vld [vmem:[#allocation53_spill] sm:$0xff] }
 0x807   : > { %2064 = vperm.xlu2 %4046, %v2003_v43   ;;  %v1928_v39 = vpop.permute.xlu0 %1927  ;;  %v1903_v30 = vpop.permute.xlu1 %1902 }
 0x808   : > { %v2013_v42 = vmul.f32 %v6732_v31, %v1928_v39  ;;  %v1922_v44 = vpop.permute.xlu2 %1921  ;;  %v2009_v58 = vmul.f32 %v6735_v10, %v1903_v30  ;;  %v6741_v39 = vld [vmem:[#allocation68_spill] sm:$0xff]  ;;  %v6743_v30 = vld [vmem:[#allocation66_spill] sm:$0xff]  ;;  %v2503_v10 = vperm.slane %v2499_v48, 2 }
 0x809   : > { %v2012_v24 = vmul.f32 %v6737_v55, %v1922_v44 }
 0x80a   : > { %2094 = vperm.xlu0 %4047, %v2013_v42  }
 0x80e   : > { %2079 = vperm.xlu1 %4045, %v2008_v35  }
 0x80f   : > { %2073 = vperm.xlu2 %4046, %v2006_v34  }
 0x810   : > { %v1941_v25 = vpop.permute.xlu2 %1940 }
 0x811   : > { %v2015_v33 = vmul.f32 %v6739_v54, %v1941_v25 }
 0x817   : > { %2082 = vperm.xlu2 %4046, %v2009_v58   ;;  %v1915_v15 = vpop.permute.xlu1 %1914  ;;  %v1960_v43 = vpop.permute.xlu0 %1959  ;;  %v6744_v58 = vld [vmem:[#allocation33_spill] sm:$0xff] }
 0x818   : > { %v2011_v63 = vmul.f32 %v6736_v23, %v1915_v15  ;;  %v2018_v31 = vmul.f32 %v6741_v39, %v1960_v43  ;;  %v2519_v15 = vmul.f32 %v6744_v58, %v2503_v10  ;;  %v6745_v23 = vld [vmem:[#allocation25_spill] sm:$0xff]  ;;  %v2502_v43 = vperm.slane %v2499_v48, 1 }
 0x81a   : > { %2088 = vperm.xlu1 %4045, %v2011_v63  }
 0x81f   : > { %2091 = vperm.xlu2 %4046, %v2012_v24   ;;  %v1934_v27 = vpop.permute.xlu1 %1933  ;;  %v2501_v24 = vperm.slane %v2499_v48, 0 }
 0x820   : > { %v2014_v6 = vmul.f32 %v6738_v40, %v1934_v27  ;;  %v1953_v7 = vpop.permute.xlu2 %1952  ;;  %v3179_v27 = vpop.permute.xlu0 %3178  ;;  %v2505_v40 = vperm.slane %v2499_v48, 4 }
 0x821   : > { %v2017_v28 = vmul.f32 %v6740_v1, %v1953_v7 }
 0x822   : > { %2097 = vperm.xlu1 %4045, %v2014_v6   ;;  %v6746_v6 = vld [vmem:[#allocation24_spill] sm:$0xff]  ;;  %v2521_v54 = vmul.f32 %v6747_v47, %v2505_v40  ;;  %v2507_v40 = vperm.slane %v2499_v48, 6 }
 0x823   : > { %v2517_v7 = vmul.f32 %v6746_v6, %v2501_v24  ;;  %v6753_v47 = vld [vmem:[#allocation36_spill] sm:$0xff] }
 0x827   : > { %2100 = vperm.xlu2 %4046, %v2015_v33   ;;  %v3237_v33 = vmul.f32 %v3179_v27, %v2517_v7 }
 0x828   : > { %v1972_v42 = vpop.permute.xlu2 %1971  ;;  %v3214_v39 = vpop.permute.xlu0 %3213 }
 0x829   : > { %v2020_v34 = vmul.f32 %v6742_v37, %v1972_v42 }
 0x82a   : > { %2106 = vperm.xlu1 %4045, %v2017_v28   ;;  %v2506_v28 = vperm.slane %v2499_v48, 5 }
 0x82f   : > { %2109 = vperm.xlu2 %4046, %v2018_v31   ;;  %v1947_v35 = vpop.permute.xlu1 %1946  ;;  %v6748_v31 = vld [vmem:[#allocation26_spill] sm:$0xff] }
 0x830   : > { %v2016_v44 = vmul.f32 %v6743_v30, %v1947_v35  ;;  %v2522_v42 = vmul.f32 %v6748_v31, %v2506_v28  ;;  %v6749_v35 = vld [vmem:[#allocation34_spill] sm:$0xff] }
 0x831   : > { %v2518_v37 = vmul.f32 %v6749_v35, %v2502_v43  ;;  %v6750_v30 = vld [vmem:[#allocation30_spill] sm:$0xff] }
 0x832   : > { %2103 = vperm.xlu0 %4047, %v2016_v44   ;;  %2115 = vperm.xlu1 %4045, %v2020_v34   ;;  %v6265_v44 = vmul.f32 %v6750_v30, %v2508_v62  ;;  %v3242_v10 = vmul.f32 %v3214_v39, %v2522_v42 }
 0x834   : > { %6751 = vst [vmem:[#allocation43_spill] sm:$0xff] %v6265_v44 }
 0x837   : > { %v1966_v19 = vpop.permute.xlu1 %1965 }
 0x838   : > { %v2019_v63 = vmul.f32 %v6745_v23, %v1966_v19  ;;  %v3193_v25 = vpop.permute.xlu2 %3192 }
 0x839   : > { %v3239_v55 = vmul.f32 %v3193_v25, %v2519_v15  ;;  %v6752_v25 = vld [vmem:[#allocation32_spill] sm:$0xff] }
 0x83a   : > { %2112 = vperm.xlu0 %4047, %v2019_v63   ;;  %v2504_v63 = vperm.slane %v2499_v48, 3 }
 0x83b   : > { %3260 = vperm.xlu2 %4046, %v3239_v55  }
 0x83c   : > { %v2520_v55 = vmul.f32 %v6752_v25, %v2504_v63  ;;  %v2217_v25 = vld [vmem:[%s4616_s22] sm:$0xff] }
 0x840   : > { %v3207_v0 = vpop.permute.xlu2 %3206 }
 0x841   : > { %v3241_v1 = vmul.f32 %v3207_v0, %v2521_v54 }
 0x842   : > { %3254 = vperm.xlu0 %4047, %v3237_v33   ;;  %v6270_v33 = vmul.f32 %v6753_v47, %v2507_v40 }
 0x843   : > { %3266 = vperm.xlu2 %4046, %v3241_v1  }
 0x844   : > { %6754 = vst [vmem:[#allocation40_spill] sm:$0xff] %v6270_v33 }
 0x847   : > { %v3186_v34 = vpop.permute.xlu1 %3185 }
 0x848   : > { %v3238_v19 = vmul.f32 %v3186_v34, %v2518_v37  ;;  %v3228_v58 = vpop.permute.xlu2 %3227 }
 0x849   : > { %v3244_v23 = vmul.f32 %v3228_v58, %v6265_v44  ;;  %v2219_v58 = vld [vmem:[%s4616_s22 + $0x10] sm:$0xff] }
 0x84a   : > { %3269 = vperm.xlu0 %4047, %v3242_v10   ;;  %3257 = vperm.xlu1 %4045, %v3238_v19   ;;  %v2220_v19 = vld [vmem:[%s4616_s22 + $0x18] sm:$0xff] }
 0x84b   : > { %3275 = vperm.xlu2 %4046, %v3244_v23   ;;  %2237 = vmatpush.msra.mxu0 %v2220_v19 }
 0x84d   : > { %2238 = vmatpush.msra.mxu0 %v2219_v58 }
 0x84f   : > { %v3200_v24 = vpop.permute.xlu1 %3199 }
 0x850   : > { %v3240_v27 = vmul.f32 %v3200_v24, %v2520_v55 }
 0x851   : > { %v2050_v6 = vpop.permute.xlu2 %2049 }
 0x852   : > { %3671 = vperm.xlu0 %4047, %v2518_v37   ;;  %3263 = vperm.xlu1 %4045, %v3240_v27  }
 0x853   : > { %3668 = vperm.xlu2 %4046, %v2517_v7  }
 0x857   : > { %v3221_v0 = vpop.permute.xlu1 %3220 }
 0x858   : > { %v3243_v1 = vmul.f32 %v3221_v0, %v6270_v33 }
 0x859   : > { %v2059_v28 = vpop.permute.xlu2 %2058 }
 0x85a   : > { %3680 = vperm.xlu0 %4047, %v2521_v54   ;;  %3272 = vperm.xlu1 %4045, %v3243_v1   ;;  %v2053_v54 = vpop.permute.xlu0 %2052  ;;  %v2118_v1 = vperm.slane %v2050_v6, %v5217_v59  ;;  %v2123_v44 = vperm.slane %v2059_v28, %v5217_v59 }
 0x85b   : > { %3677 = vperm.xlu2 %4046, %v2520_v55   ;;  %v2120_v58 = vperm.slane %v2053_v54, %v5226_v17 }
 0x860   : > { %v2047_v43 = vpop.permute.xlu1 %2046 }
 0x861   : > { %v2065_v7 = vpop.permute.xlu2 %2064  ;;  %v2117_v40 = vperm.slane %v2047_v43, %v5190_v20 }
 0x862   : > { %3674 = vperm.xlu1 %4045, %v2519_v15   ;;  %4048 = vset.pattern.permute.xlu0 %v4649_v8 }
 0x863   : > { %4050 = vset.pattern.permute.xlu2 %v6718_v49  ;;  %v2119_v43 = vsel %vm1363_vm0, %v2118_v1, %v2117_v40 }
 0x864   : > { %v2068_v35 = vpop.permute.xlu0 %2067 }
 0x865   : > { %v2128_v0 = vperm.slane %v2068_v35, %v5217_v59 }
 0x868   : > { %v2056_v48 = vpop.permute.xlu1 %2055 }
 0x869   : > { %v2074_v39 = vpop.permute.xlu2 %2073  ;;  %v2122_v19 = vperm.slane %v2056_v48, %v5190_v20 }
 0x86a   : > { %3683 = vperm.xlu1 %4045, %v2522_v42   ;;  %v2218_v42 = vld [vmem:[%s4616_s22 + $0x8] sm:$0xff]  ;;  %v2132_v16 = vperm.slane %v2074_v39, %v5190_v20  ;;  %v2121_v39 = vsel %vm1367_vm1, %v2120_v58, %v2119_v43 }
 0x86b   : > { %2239 = vmatpush.msra.mxu0 %v2218_v42  ;;  %v2127_v42 = vperm.slane %v2065_v7, %v5190_v20 }
 0x86c   : > { %v2077_v34 = vpop.permute.xlu0 %2076 }
 0x86d   : > { %2240 = vmatpush.msra.mxu0 %v2217_v25  ;;  %v2133_v33 = vperm.slane %v2077_v34, %v5217_v59  ;;  %v2129_v6 = vsel %vm1363_vm0, %v2128_v0, %v2127_v42 }
 0x86f   : > { %3913 = vmatpush.msk.msrb.mxu0 %vm796_vm4, %v6167_v41  ;;  %vm2215_vm4 = vcmask 220160  }
 0x870   : > { %v2062_v62 = vpop.permute.xlu1 %2061 }
 0x871   : > { %v2083_v37 = vpop.permute.xlu2 %2082  ;;  %v2125_v25 = vperm.slane %v2062_v62, %v5226_v17  ;;  %v2124_v62 = vsel %vm1363_vm0, %v2123_v44, %v2122_v19 }
 0x872   : > { %4049 = vset.pattern.permute.xlu1 %v6719_v29 }
 0x873   : > { %v2126_v34 = vsel %vm1367_vm1, %v2125_v25, %v2124_v62 }
 0x874   : > { %v2086_v23 = vpop.permute.xlu0 %2085 }
 0x875   : > { %v2138_v48 = vperm.slane %v2086_v23, %v5217_v59 }
 0x878   : > { %v2071_v31 = vpop.permute.xlu1 %2070 }
 0x879   : > { %v2092_v30 = vpop.permute.xlu2 %2091  ;;  %v2130_v35 = vperm.slane %v2071_v31, %v5226_v17  ;;  %v2137_v31 = vperm.slane %v2083_v37, %v5190_v20  ;;  %v2157_v37 = vsel %vm881_vm7, %v2126_v34, %v2121_v39 }
 0x87a   : > { %v2142_v44 = vperm.slane %v2092_v30, %v5190_v20 }
 0x87b   : > { %v2131_v1 = vsel %vm1367_vm1, %v2130_v35, %v2129_v6 }
 0x87c   : > { %v2095_v24 = vpop.permute.xlu0 %2094  ;;  %v2158_v42 = vsel %vm883_vm8, %v2131_v1, %v2157_v37 }
 0x87d   : > { %v2143_v28 = vperm.slane %v2095_v24, %v5217_v59  ;;  %v2139_v24 = vsel %vm1363_vm0, %v2138_v48, %v2137_v31 }
 0x880   : > { %v2080_v15 = vpop.permute.xlu1 %2079 }
 0x881   : > { %v2101_v63 = vpop.permute.xlu2 %2100  ;;  %v2135_v54 = vperm.slane %v2080_v15, %v5226_v17  ;;  %v2134_v15 = vsel %vm1363_vm0, %v2133_v33, %v2132_v16 }
 0x882   : > { %v2147_v0 = vperm.slane %v2101_v63, %v5190_v20  ;;  %v2144_v63 = vsel %vm1363_vm0, %v2143_v28, %v2142_v44 }
 0x889   : > { %v2110_v27 = vpop.permute.xlu2 %2109 }
 0x88c   : > { %v2089_v10 = vpop.permute.xlu1 %2088 }
 0x88d   : > { %v2140_v40 = vperm.slane %v2089_v10, %v5226_v17  ;;  %v2136_v10 = vsel %vm1367_vm1, %v2135_v54, %v2134_v15 }
 0x88e   : > { %v2159_v25 = vsel %vm885_vm9, %v2136_v10, %v2158_v42 }
 0x894   : > { %v2098_v55 = vpop.permute.xlu1 %2097 }
 0x895   : > { %v6289_v36 = vpop.permute.xlu2 %3260  ;;  %v2145_v23 = vperm.slane %v2098_v55, %v5226_v17  ;;  %v2141_v55 = vsel %vm1367_vm1, %v2140_v40, %v2139_v24 }
 0x896   : > { %v2160_v6 = vsel %vm887_vm11, %v2141_v55, %v2159_v25 }
 0x897   : > { %v2146_v30 = vsel %vm1367_vm1, %v2145_v23, %v2144_v63 }
 0x89c   : > { %v2107_v47 = vpop.permute.xlu1 %2106 }
 0x89d   : > { %v2150_v16 = vperm.slane %v2107_v47, %v5226_v17  ;;  %v3267_v48 = vpop.permute.xlu2 %3266  ;;  %v2161_v47 = vsel %vm889_vm12, %v2146_v30, %v2160_v6 }
 0x89e   : > { %v3281_v30 = vperm.slane %v3267_v48, %v5190_v20 }
 0x8a4   : > { %v2104_v41 = vpop.permute.xlu0 %2103  ;;  %v2116_v33 = vpop.permute.xlu1 %2115 }
 0x8a5   : > { %v2148_v7 = vperm.slane %v2104_v41, %v5217_v59  ;;  %v2152_v41 = vperm.slane %v2110_v27, %v5190_v20  ;;  %v2155_v54 = vperm.slane %v2116_v33, %v5226_v17 }
 0x8a7   : > { %v2149_v19 = vsel %vm1363_vm0, %v2148_v7, %v2147_v0  ;;  %v3276_v0 = vpop.permute.xlu2 %3275 }
 0x8a8   : > { %v2151_v43 = vsel %vm1367_vm1, %v2150_v16, %v2149_v19 }
 0x8a9   : > { %v2162_v62 = vsel %vm891_vm13, %v2151_v43, %v2161_v47  ;;  %v3284_v43 = vperm.slane %v3276_v0, %v5190_v20 }
 0x8ac   : > { %v2113_v58 = vpop.permute.xlu0 %2112 }
 0x8ad   : > { %v2153_v35 = vperm.slane %v2113_v58, %v5217_v59 }
 0x8af   : > { %v2154_v7 = vsel %vm1363_vm0, %v2153_v35, %v2152_v41  ;;  %v3669_v44 = vpop.permute.xlu2 %3668 }
 0x8b0   : > { %v2156_v28 = vsel %vm1367_vm1, %v2155_v54, %v2154_v7  ;;  %v3691_v37 = vperm.slane %v3669_v44, %v6111_v22 }
 0x8b1   : > { %v2163_v27 = vsel %vm893_vm14, %v2156_v28, %v2162_v62 }
 0x8b2   : > { %v2214_v40 = vsel %vm1412_vm2, %v2163_v27, %v6131_v2  ;;  %v3279_v2 = vperm.slane %v6289_v36, %v5190_v20 }
 0x8b3   : > { %v2216_v34 = vsel %vm2215_vm4, %v2214_v40, 0.0 }
 0x8b4   : > { %v3255_v31 = vpop.permute.xlu0 %3254  ;;  %3909 = vmatmul.msk.f32.vlgmr.msra.gmra.mxu0 %vm2221_vm10, %v2216_v34 }
 0x8b5   : > { %v3277_v39 = vperm.slane %v3255_v31, %v5190_v20 }
 0x8b7   : > { %v6379_v44 = vpop.permute.xlu2 %3677 }
 0x8bc   : > { %v3270_v23 = vpop.permute.xlu0 %3269  ;;  %v3258_v15 = vpop.permute.xlu1 %3257 }
 0x8bd   : > { %v3278_v1 = vperm.slane %v3258_v15, %v5190_v20  ;;  %v3282_v25 = vperm.slane %v3270_v23, %v5190_v20 }
 0x8bf   : > { %v3285_v24 = vsel %vm881_vm7, %v3278_v1, %v3277_v39 }
 0x8c0   : > { %v3286_v33 = vsel %vm883_vm8, %v3279_v2, %v3285_v24 }
 0x8c4   : > { %v3672_v10 = vpop.permute.xlu0 %3671  ;;  %v3264_v19 = vpop.permute.xlu1 %3263 }
 0x8c5   : > { %v3692_v63 = vperm.slane %v3672_v10, %v6111_v22  ;;  %v3280_v55 = vperm.slane %v3264_v19, %v5190_v20 }
 0x8c7   : > { %v3699_v16 = vsel %vm881_vm7, %v3692_v63, %v3691_v37  ;;  %v3287_v42 = vsel %vm885_vm9, %v3280_v55, %v3286_v33 }
 0x8c8   : > { %v3288_v58 = vsel %vm887_vm11, %v3281_v30, %v3287_v42 }
 0x8c9   : > { %v3289_v35 = vsel %vm889_vm12, %v3282_v25, %v3288_v58 }
 0x8cc   : > { %v3273_v36 = vpop.permute.xlu1 %3272  ;;  %v6383_v24 = vpop.permute.xlu0 %3680 }
 0x8cd   : > { %v3283_v41 = vperm.slane %v3273_v36, %v5190_v20 }
 0x8cf   : > { %v3290_v6 = vsel %vm891_vm13, %v3283_v41, %v3289_v35 }
 0x8d0   : > { %v3291_v54 = vsel %vm893_vm14, %v3284_v43, %v3290_v6 }
 0x8d1   : > { %3914 = vmatmul.msk.f32.vlgmr.msrb.gmra.mxu0 %vm896_vm15, %v3291_v54 }
 0x8d4   : > { %v3675_v47 = vpop.permute.xlu1 %3674 }
 0x8d5   : > { %v3693_v48 = vperm.slane %v3675_v47, %v6111_v22 }
 0x8d7   : > { %v6357_v7 = vsel %vm883_vm8, %v3693_v48, %v3699_v16 }
 0x8dc   : > { %v6381_v39 = vpop.permute.xlu1 %3683 }
 0x931   : > { %v2242_v62 = vpop.f32.mrf.mxu0 }
 0x932   : > { %2245 = vst [vmem:[%s6361_s12] sm:$0xff] %v2242_v62 }
 0x94e   : > { %v3311_v28 = vpop.f32.mrf.mxu0 }
 0x94f   : > { %v3315_v27 = vperm.slane %v3311_v28, 0  ;;  %v3334_v40 = vperm.slane %v3311_v28, 1  ;;  %v3353_v34 = vperm.slane %v3311_v28, 2  ;;  %v3372_v31 = vperm.slane %v3311_v28, 3 }
 0x950   : > { %v3391_v0 = vperm.slane %v3311_v28, 4  ;;  %v3410_v23 = vperm.slane %v3311_v28, 5  ;;  %v3429_v15 = vperm.slane %v3311_v28, 6  ;;  %v3448_v1 = vperm.slane %v3311_v28, 7 }
 0x951   : > { %3332 = vperm.xlu2 %4050, %v3315_v27   ;;  %3326 = vperm.xlu1 %4049, %v3315_v27  }
 0x952   : > { %3320 = vperm.xlu0 %4048, %v3315_v27  }
 0x959   : > { %4052 = vset.pattern.permute.xlu2 %v6719_v29  ;;  %4051 = vset.pattern.permute.xlu1 %v4649_v8 }
 0x95a   : > { %4053 = vset.pattern.permute.xlu0 %v6718_v49 }
 0x961   : > { %3345 = vperm.xlu2 %4052, %v3334_v40   ;;  %3339 = vperm.xlu1 %4051, %v3334_v40  }
 0x962   : > { %3351 = vperm.xlu0 %4053, %v3334_v40  }
 0x969   : > { %3364 = vperm.xlu2 %4052, %v3353_v34   ;;  %3358 = vperm.xlu1 %4051, %v3353_v34  }
 0x96a   : > { %4056 = vset.pattern.permute.xlu0 %v6719_v29 }
 0x971   : > { %4055 = vset.pattern.permute.xlu2 %v4649_v8  ;;  %4054 = vset.pattern.permute.xlu1 %v6718_v49 }
 0x972   : > { %3383 = vperm.xlu0 %4056, %v3372_v31  }
 0x979   : > { %3377 = vperm.xlu2 %4055, %v3372_v31   ;;  %3370 = vperm.xlu1 %4054, %v3353_v34  }
 0x97a   : > { %4059 = vset.pattern.permute.xlu0 %v4649_v8 }
 0x981   : > { %3396 = vperm.xlu2 %4055, %v3391_v0   ;;  %3389 = vperm.xlu1 %4054, %v3372_v31  }
 0x982   : > { %3415 = vperm.xlu0 %4059, %v3410_v23  }
 0x989   : > { %4058 = vset.pattern.permute.xlu2 %v6718_v49  ;;  %4057 = vset.pattern.permute.xlu1 %v6719_v29 }
 0x98a   : > { %4062 = vset.pattern.permute.xlu0 %v6718_v49 }
 0x991   : > { %3408 = vperm.xlu2 %4058, %v3391_v0   ;;  %3402 = vperm.xlu1 %4057, %v3391_v0  }
 0x992   : > { %3446 = vperm.xlu0 %4062, %v3429_v15  }
 0x999   : > { %3427 = vperm.xlu2 %4058, %v3410_v23   ;;  %3421 = vperm.xlu1 %4057, %v3410_v23   ;;  %v6758_v23 = vld [vmem:[#allocation39_spill] sm:$0xff] }
 0x99a   : > { %4065 = vset.pattern.permute.xlu0 %v6676_v52 }
 0x9a1   : > { %4061 = vset.pattern.permute.xlu2 %v6719_v29  ;;  %4060 = vset.pattern.permute.xlu1 %v4649_v8 }
 0x9a9   : > { %3440 = vperm.xlu2 %4061, %v3429_v15   ;;  %3434 = vperm.xlu1 %4060, %v3429_v15  }
 0x9ab   : > { %v3333_v10 = vpop.permute.xlu2 %3332 }
 0x9b1   : > { %3459 = vperm.xlu2 %4061, %v3448_v1   ;;  %3453 = vperm.xlu1 %4060, %v3448_v1  }
 0x9b9   : > { %4063 = vset.pattern.permute.xlu1 %v6718_v49  ;;  %4064 = vset.pattern.permute.xlu2 %v6676_v52 }
 0x9bb   : > { %v3346_v49 = vpop.permute.xlu2 %3345 }
 0x9bc   : > { %v3495_v37 = vmul.f32 %v5967_v32, %v3346_v49 }
 0x9c1   : > { %3465 = vperm.xlu1 %4063, %v3448_v1  }
 0x9c3   : > { %v3327_v29 = vpop.permute.xlu1 %3326  ;;  %v3365_v42 = vpop.permute.xlu2 %3364 }
 0x9c4   : > { %v3492_v8 = vmul.f32 %v5953_v38, %v3327_v29  ;;  %v3321_v19 = vpop.permute.xlu0 %3320  ;;  %v3498_v32 = vmul.f32 %v5987_v57, %v3365_v42 }
 0x9c5   : > { %v3491_v2 = vmul.f32 %v5956_v61, %v3321_v19  ;;  %v3493_v61 = vmul.f32 %v5980_v46, %v3333_v10 }
 0x9c6   : > { %3543 = vperm.xlu0 %4065, %v3492_v8  }
 0x9c7   : > { %3540 = vperm.xlu2 %4064, %v3491_v2  }
 0x9c9   : > { %4066 = vset.pattern.permute.xlu1 %v6676_v52 }
 0x9cf   : > { %3552 = vperm.xlu2 %4064, %v3495_v37  }
 0x9d3   : > { %v3340_v63 = vpop.permute.xlu1 %3339  ;;  %v3378_v52 = vpop.permute.xlu2 %3377 }
 0x9d4   : > { %v3494_v55 = vmul.f32 %v5970_v51, %v3340_v63  ;;  %v3352_v16 = vpop.permute.xlu0 %3351  ;;  %v3500_v58 = vmul.f32 %v5997_v50, %v3378_v52  ;;  %v3709_v52 = vld [vmem:[%s4616_s22 + $0x20] sm:$0xff] }
 0x9d5   : > { %v3496_v33 = vmul.f32 %v5978_v14, %v3352_v16  ;;  %v3712_v16 = vld [vmem:[%s4616_s22 + $0x38] sm:$0xff] }
 0x9d6   : > { %3549 = vperm.xlu1 %4066, %v3494_v55   ;;  %3728 = vmatpush.msrb.mxu1 %v3712_v16 }
 0x9d7   : > { %3555 = vperm.xlu2 %4064, %v3496_v33   ;;  %v3711_v33 = vld [vmem:[%s4616_s22 + $0x30] sm:$0xff] }
 0x9d8   : > { %3729 = vmatpush.msrb.mxu1 %v3711_v33  ;;  %v3695_v33 = vperm.slane %v6383_v24, %v6111_v22 }
 0x9db   : > { %v3359_v38 = vpop.permute.xlu1 %3358  ;;  %v3397_v51 = vpop.permute.xlu2 %3396 }
 0x9dc   : > { %v3497_v30 = vmul.f32 %v5990_v56, %v3359_v38  ;;  %v3503_v43 = vmul.f32 %v6051_v4, %v3397_v51 }
 0x9de   : > { %3558 = vperm.xlu0 %4065, %v3497_v30   ;;  %3546 = vperm.xlu1 %4066, %v3493_v61   ;;  %v3710_v30 = vld [vmem:[%s4616_s22 + $0x28] sm:$0xff]  ;;  %s3924_s22 = sshll.u32 %s4503_s21, 4 }
 0x9df   : > { %3730 = vmatpush.msrb.mxu1 %v3710_v30  ;;  %s3750_s26 = scalar_lea.hbm %s6760_s17, %s3924_s22 }
 0x9e0   : > { %s3753_s13 = sshll.u32 %s3750_s26, 4  ;;  %s3754_s13 = int_to_ptr.hbm [resolvable:$true] %s3753_s13 }
 0x9e1   : > { %3731 = vmatpush.msrb.mxu1 %v3709_v52  ;;  %s4347_s16 = sshra.s32 %s3754_s13, 4  ;;  %s4348_s16 = int_to_ptr.hbm [resolvable:$true] %s4347_s16 }
 0x9e2   : > { %s4349_s19 = scalar_lea.hbm %s4348_s16, 16  ;;  %p4354_p10 = scmp.lt.s32.totalorder %s4348_s16, %s6761_s28 }
 0x9e3   : > { %p4350_p4 = scmp.ne.s32.totalorder %s4348_s16, %s4349_s19  ;;  %p4355_p11 = scmp.lt.s32.totalorder %s4353_s15, %s4349_s19 }
 0x9e4   : > { %v3384_v25 = vpop.permute.xlu0 %3383 }
 0x9e5   : > { %v3501_v36 = vmul.f32 %v5951_v53, %v3384_v25  ;;  %p4351_p8 = pnand %p4350_p4, %p4548_p3  ;;  %p4356_p9 = por %p4355_p11, %p4354_p10 }
 0x9e6   : > { %3561 = vperm.xlu1 %4066, %v3498_v32   ;;  %3567 = vperm.xlu0 %4065, %v3500_v58  }
 0x9e7   : > { %p4352_p2 = pneg %p4351_p8 }
 0x9e9   : > { %p4357_p12 = pnand %p4356_p9, %p4352_p2 }
 0x9eb   : > { %v3371_v14 = vpop.permute.xlu1 %3370  ;;  %v3409_v46 = vpop.permute.xlu2 %3408 }
 0x9ec   : > { %v3499_v41 = vmul.f32 %v6000_v13, %v3371_v14  ;;  %v3505_v50 = vmul.f32 %v6059_v9, %v3409_v46 }
 0x9ee   : > { %3564 = vperm.xlu2 %4064, %v3499_v41   ;;  %3570 = vperm.xlu1 %4066, %v3501_v36  }
 0x9f3   : > { %v3390_v56 = vpop.permute.xlu1 %3389  ;;  %v3428_v57 = vpop.permute.xlu2 %3427 }
 0x9f4   : > { %v3502_v35 = vmul.f32 %v6054_v21, %v3390_v56  ;;  %v3416_v47 = vpop.permute.xlu0 %3415  ;;  %v3508_v62 = vmul.f32 %v5965_v18, %v3428_v57  ;;  %v6757_v18 = vld [vmem:[#allocation43_spill] sm:$0xff] }
 0x9f5   : > { %v3506_v4 = vmul.f32 %v6082_v26, %v3416_v47  ;;  %v6755_v26 = vld [vmem:[#allocation27_spill] sm:$0xff] }
 0x9f6   : > { %3573 = vperm.xlu1 %4066, %v3502_v35   ;;  %3576 = vperm.xlu2 %4064, %v3503_v43  }
 0x9fe   : > { %3582 = vperm.xlu2 %4064, %v3505_v50  }
 0xa03   : > { %v3403_v6 = vpop.permute.xlu1 %3402  ;;  %v3441_v54 = vpop.permute.xlu2 %3440 }
 0xa04   : > { %v3504_v53 = vmul.f32 %v6061_v5, %v3403_v6  ;;  %v3510_v13 = vmul.f32 %v6087_v3, %v3441_v54  ;;  %v3447_v3 = vpop.permute.xlu0 %3446 }
 0xa05   : > { %v3511_v34 = vmul.f32 %v6027_v12, %v3447_v3 }
 0xa06   : > { %3579 = vperm.xlu0 %4065, %v3504_v53   ;;  %3597 = vperm.xlu2 %4064, %v3510_v13  }
 0xa0b   : > { %v3422_v48 = vpop.permute.xlu1 %3421  ;;  %v3460_v9 = vpop.permute.xlu2 %3459 }
 0xa0c   : > { %v3507_v21 = vmul.f32 %v6079_v11, %v3422_v48  ;;  %v3513_v27 = vmul.f32 %v6156_v45, %v3460_v9  ;;  %v6756_v11 = vld [vmem:[#allocation40_spill] sm:$0xff] }
 0xa0e   : > { %3588 = vperm.xlu1 %4066, %v3507_v21   ;;  %3585 = vperm.xlu0 %4065, %v3506_v4  }
 0xa16   : > { %3591 = vperm.xlu0 %4065, %v3508_v62  }
 0xa1b   : > { %v3435_v28 = vpop.permute.xlu1 %3434 }
 0xa1c   : > { %v3509_v5 = vmul.f32 %v6089_v60, %v3435_v28 }
 0xa1e   : > { %3594 = vperm.xlu1 %4066, %v3509_v5   ;;  %3606 = vperm.xlu0 %4065, %v3513_v27  }
 0xa21   : > { %v3541_v60 = vpop.permute.xlu2 %3540 }
 0xa22   : > { %v3611_v46 = vperm.slane %v3541_v60, %v5190_v20 }
 0xa23   : > { %v3454_v40 = vpop.permute.xlu1 %3453 }
 0xa24   : > { %v3512_v31 = vmul.f32 %v6755_v26, %v3454_v40 }
 0xa26   : > { %3600 = vperm.xlu1 %4066, %v3511_v34   ;;  %3603 = vperm.xlu2 %4064, %v3512_v31  }
 0xa27   : > { %3686 = vperm.xlu0 %4065, %v6756_v11  }
 0xa29   : > { %v3553_v1 = vpop.permute.xlu2 %3552 }
 0xa2a   : > { %v3617_v6 = vperm.slane %v3553_v1, %v5217_v59 }
 0xa2e   : > { %3689 = vperm.xlu1 %4066, %v6757_v18  }
 0xa31   : > { %v3556_v12 = vpop.permute.xlu2 %3555 }
 0xa32   : > { %v3619_v54 = vperm.slane %v3556_v12, %v5226_v17 }
 0xa33   : > { %v3466_v0 = vpop.permute.xlu1 %3465 }
 0xa34   : > { %v3514_v45 = vmul.f32 %v6758_v23, %v3466_v0  ;;  %v3694_v23 = vperm.slane %v6379_v44, %v6111_v22 }
 0xa36   : > { %3609 = vperm.xlu2 %4064, %v3514_v45  }
 0xa38   : > { %v3544_v10 = vpop.permute.xlu0 %3543 }
 0xa39   : > { %v3612_v14 = vperm.slane %v3544_v10, %v5217_v59 }
 0xa3b   : > { %v3613_v53 = vsel %vm1363_vm0, %v3612_v14, %v3611_v46 }
 0xa48   : > { %v3550_v15 = vpop.permute.xlu1 %3549  ;;  %v3565_v2 = vpop.permute.xlu2 %3564 }
 0xa49   : > { %v3616_v56 = vperm.slane %v3550_v15, %v5190_v20  ;;  %v3624_v47 = vperm.slane %v3565_v2, %v5226_v17  ;;  %v3701_v2 = vsel %vm885_vm9, %v3694_v23, %v6357_v7 }
 0xa4a   : > { %v3702_v30 = vsel %vm887_vm11, %v3695_v33, %v3701_v2 }
 0xa4b   : > { %v3618_v62 = vsel %vm1363_vm0, %v3617_v6, %v3616_v56 }
 0xa4c   : > { %v3620_v45 = vsel %vm1367_vm1, %v3619_v54, %v3618_v62 }
 0xa50   : > { %v3547_v29 = vpop.permute.xlu1 %3546  ;;  %v3559_v8 = vpop.permute.xlu0 %3558 }
 0xa51   : > { %v3577_v63 = vpop.permute.xlu2 %3576  ;;  %v3621_v35 = vperm.slane %v3559_v8, %v5190_v20  ;;  %v3614_v57 = vperm.slane %v3547_v29, %v5226_v17 }
 0xa52   : > { %v3631_v48 = vperm.slane %v3577_v63, %v5190_v20  ;;  %v3696_v63 = vperm.slane %v6381_v39, %v6111_v22 }
 0xa53   : > { %v3615_v5 = vsel %vm1367_vm1, %v3614_v57, %v3613_v53 }
 0xa54   : > { %v3651_v1 = vsel %vm881_vm7, %v3620_v45, %v3615_v5 }
 0xa58   : > { %v3562_v19 = vpop.permute.xlu1 %3561  ;;  %v3568_v49 = vpop.permute.xlu0 %3567 }
 0xa59   : > { %v3583_v61 = vpop.permute.xlu2 %3582  ;;  %v3622_v41 = vperm.slane %v3562_v19, %v5217_v59  ;;  %v3626_v9 = vperm.slane %v3568_v49, %v5190_v20 }
 0xa5a   : > { %v3634_v11 = vperm.slane %v3583_v61, %v5226_v17 }
 0xa5b   : > { %v3623_v4 = vsel %vm1363_vm0, %v3622_v41, %v3621_v35 }
 0xa5c   : > { %v3625_v31 = vsel %vm1367_vm1, %v3624_v47, %v3623_v4 }
 0xa5d   : > { %v3652_v44 = vsel %vm883_vm8, %v3625_v31, %v3651_v1 }
 0xa60   : > { %v3571_v37 = vpop.permute.xlu1 %3570 }
 0xa61   : > { %v3598_v51 = vpop.permute.xlu2 %3597  ;;  %v3627_v13 = vperm.slane %v3571_v37, %v5217_v59 }
 0xa62   : > { %v3642_v60 = vperm.slane %v3598_v51, %v5217_v59 }
 0xa63   : > { %v3628_v18 = vsel %vm1363_vm0, %v3627_v13, %v3626_v9 }
 0xa68   : > { %v3574_v42 = vpop.permute.xlu1 %3573 }
 0xa69   : > { %v3629_v21 = vperm.slane %v3574_v42, %v5226_v17 }
 0xa6b   : > { %v3630_v15 = vsel %vm1367_vm1, %v3629_v21, %v3628_v18 }
 0xa78   : > { %v3580_v55 = vpop.permute.xlu0 %3579 }
 0xa79   : > { %v3632_v50 = vperm.slane %v3580_v55, %v5217_v59  ;;  %v3653_v55 = vsel %vm885_vm9, %v3630_v15, %v3652_v44 }
 0xa7b   : > { %v3633_v3 = vsel %vm1363_vm0, %v3632_v50, %v3631_v48 }
 0xa7c   : > { %v3635_v10 = vsel %vm1367_vm1, %v3634_v11, %v3633_v3 }
 0xa7d   : > { %v3654_v7 = vsel %vm887_vm11, %v3635_v10, %v3653_v55 }
 0xa80   : > { %v3586_v38 = vpop.permute.xlu0 %3585  ;;  %v3589_v32 = vpop.permute.xlu1 %3588 }
 0xa81   : > { %v3604_v43 = vpop.permute.xlu2 %3603  ;;  %v3637_v28 = vperm.slane %v3589_v32, %v5217_v59  ;;  %v3636_v27 = vperm.slane %v3586_v38, %v5190_v20  ;;  %v3703_v32 = vsel %vm889_vm12, %v3696_v63, %v3702_v30 }
 0xa82   : > { %v3646_v16 = vperm.slane %v3604_v43, %v5190_v20 }
 0xa83   : > { %v3638_v29 = vsel %vm1363_vm0, %v3637_v28, %v3636_v27 }
 0xa88   : > { %v3592_v58 = vpop.permute.xlu0 %3591 }
 0xa89   : > { %v3639_v40 = vperm.slane %v3592_v58, %v5226_v17 }
 0xa8b   : > { %v3640_v49 = vsel %vm1367_vm1, %v3639_v40, %v3638_v29 }
 0xa8c   : > { %v3655_v61 = vsel %vm889_vm12, %v3640_v49, %v3654_v7 }
 0xa90   : > { %v3595_v25 = vpop.permute.xlu1 %3594  ;;  %v3607_v36 = vpop.permute.xlu0 %3606 }
 0xa91   : > { %v3641_v34 = vperm.slane %v3595_v25, %v5190_v20  ;;  %v3647_v12 = vperm.slane %v3607_v36, %v5217_v59  ;;  %v3610_v8 = vpop.permute.xlu2 %3609 }
 0xa92   : > { %v3649_v42 = vperm.slane %v3610_v8, %v5226_v17 }
 0xa93   : > { %v3643_v37 = vsel %vm1363_vm0, %v3642_v60, %v3641_v34  ;;  %v3648_v39 = vsel %vm1363_vm0, %v3647_v12, %v3646_v16 }
 0xa98   : > { %v3601_v26 = vpop.permute.xlu1 %3600 }
 0xa99   : > { %v3644_v0 = vperm.slane %v3601_v26, %v5226_v17  ;;  %v3687_v19 = vpop.permute.xlu0 %3686  ;;  %v3650_v17 = vsel %vm1367_vm1, %v3649_v42, %v3648_v39 }
 0xa9a   : > { %v3697_v38 = vperm.slane %v3687_v19, %v6111_v22 }
 0xa9b   : > { %v3645_v59 = vsel %vm1367_vm1, %v3644_v0, %v3643_v37 }
 0xa9c   : > { %v3656_v20 = vsel %vm891_vm13, %v3645_v59, %v3655_v61  ;;  %v3704_v58 = vsel %vm891_vm13, %v3697_v38, %v3703_v32 }
 0xa9d   : > { %v3657_v25 = vsel %vm893_vm14, %v3650_v17, %v3656_v20 }
 0xaa0   : > { %v3690_v52 = vpop.permute.xlu1 %3689 }
 0xaa1   : > { %v3698_v24 = vperm.slane %v3690_v52, %v6111_v22 }
 0xaa3   : > { %v3705_v51 = vsel %vm893_vm14, %v3698_v24, %v3704_v58 }
 0xaa4   : > { %v3707_v14 = vsel %vm1412_vm2, %v3657_v25, %v3705_v51 }
 0xaa5   : > { %v3708_v36 = vsel %vm2215_vm4, %v3707_v14, 0.0 }
 0xaa6   : > { %3915 = vmatmul.msk.f32.vlgmr.msrb.gmra.mxu1 %vm2221_vm10, %v3708_v36 }
 0xb23   : > { %v3733_v22 = vpop.f32.mrf.mxu1 }
 0xb24   : > { %3916 = vst [vmem:[%s6361_s12 + $0x8] sm:$0xff] %v3733_v22 }
 0xb25   : > { %4360 = shalt.err (!%p4357_p12)
}
 0xb26   : > { %s4420_s10 = smov 128   ;;  %s4421_s27 = smov 8  }
 0xb27   : > { %3937 = dma.vmem_to_hbm [thread:$0]  (%p4548_p3), %s3752_s23, 256, %s3754_s13, %s3739_s14, %s4420_s10, %s4420_s10, %s4421_s27  }
 0xb28 PF: > { %s6762_s30 = sld [smem:[#allocation16_spill]]  ;;  %p6764_p13 = scmp.ge.s32.totalorder %s4411_s20, 2 }
 0xb2a   : > { %p3954_p0 = pnand %p6764_p13, %p4517_p6 }
 0xb2c   : > { %p3955_p5 = pneg %p3954_p0 }
 0xb2e   : > { %s3768_s12 = sand.u32 1, %s6762_s30  }
 0xb2f   : > { %s3769_s22 = scalar_lea.sflag [#allocation4], %s3768_s12 }
 0xb30   : > { %4394 = dma.done.wait (%p3955_p5), %s3769_s22, 256  }
 0xb31   : > { %4396 = vsyncadd (%p3955_p5), %s3769_s22, 4294967040  ;;  %s6765_s20 = sld [smem:[#allocation19_spill]]  ;;  %s6768_s17 = smov %s4403_s18 }
 0xb32   : > { %s6766_s29 = sld [smem:[#allocation17_spill]] }
 0xb33   : > { %s6767_s19 = sld [smem:[#allocation21_spill]] }
 0xb37   : > { %p28_p7 = scmp.ge.s32.totalorder %s6765_s20, 4  }
 0xb38   : > { %s6769_s18 = smov %s6766_s29 }
 0xb39   :  { %30 = sbr.rel (!%p28_p7) target bundleno = 14 (0xe), region = 139 }
 0xb3e   :  { %3775 = vsyncpa [#allocation3], 1 }
 0xb3f   :  { %3777 = vsyncpa [#allocation3 + $0x1], 1 }
 0xb40   :  { %3778 = vsyncpa [#allocation6], 1 }
 0xb41   :  { %3780 = vsyncpa [#allocation6 + $0x1], 1 }
 0xb42   :  { %3781 = vsyncpa [#allocation9], 1 }
 0xb43   :  { %3782 = vsyncpa [#allocation4], 1 }
 0xb44   :  { %3784 = vsyncpa [#allocation4 + $0x1], 1 }

</bundles_post_ra>
